<compile_context>
chip_gen: v7x
topology: tpu7x:2x2x1
jax: 0.10.0
libtpu: 0.0.40
codegen_flags: <defaults>
</compile_context>

<pallas_src>
import math
from functools import partial

import jax
import jax.numpy as jnp
from jax import lax
from jax.experimental import pallas as pl
from jax.experimental.pallas import tpu as pltpu

_VMEM = pl.BlockSpec(memory_space=pltpu.MemorySpace.VMEM)
_HIDDEN = 64
_HEADS = 4


# ----------------------- Kernel 1: fused GCN stack -------------------------

def _gcn_stack_kernel(adj_ref, x0_ref,
                      w1_ref, b1_ref, w2_ref, b2_ref, w3_ref, b3_ref,
                      wla_ref, wlb_ref, wlc_ref, bl_ref,
                      wkv_ref, bkv_ref,
                      kv_ref):
    """conv1..3 (+relu), gmt.lin1, and GMPool_G's GCNConv K/V — adj loaded once."""
    adj = adj_ref[...]

    def gcn(x, w_ref, b_ref):
        xw = jnp.dot(x, w_ref[...], preferred_element_type=jnp.float32)
        return jnp.dot(adj, xw, preferred_element_type=jnp.float32) + b_ref[...]

    x1 = jnp.maximum(gcn(x0_ref[...], w1_ref, b1_ref), 0.0)
    x2 = jnp.maximum(gcn(x1, w2_ref, b2_ref), 0.0)
    x3 = jnp.maximum(gcn(x2, w3_ref, b3_ref), 0.0)

    # concat([x1,x2,x3], -1) @ W_lin1  ==  x1@Wa + x2@Wb + x3@Wc  (no XLU concat)
    h = (jnp.dot(x1, wla_ref[...], preferred_element_type=jnp.float32)
         + jnp.dot(x2, wlb_ref[...], preferred_element_type=jnp.float32)
         + jnp.dot(x3, wlc_ref[...], preferred_element_type=jnp.float32)
         + bl_ref[...])

    # GMPool_G keys/values: GCNConv(h) with [Wk | Wv] concatenated -> one adj matmul
    # and one 128-lane-dense (unmasked vst) output store.
    hkv = jnp.dot(h, wkv_ref[...], preferred_element_type=jnp.float32)
    kv = jnp.dot(adj, hkv, preferred_element_type=jnp.float32) + bkv_ref[...]
    kv_ref[...] = kv.astype(kv_ref.dtype)


def gcn_stack(adj, x0, p):
    n = x0.shape[0]
    ins = [adj, x0,
           p["conv1_w"], p["conv1_b"], p["conv2_w"], p["conv2_b"],
           p["conv3_w"], p["conv3_b"],
           p["gmt_lin1_wa"], p["gmt_lin1_wb"], p["gmt_lin1_wc"], p["gmt_lin1_b"],
           p["pma1_wkv"], p["pma1_bkv"]]
    return pl.pallas_call(
        _gcn_stack_kernel,
        out_shape=jax.ShapeDtypeStruct((n, 2 * _HIDDEN), jnp.float32),
        in_specs=[_VMEM] * len(ins),
        out_specs=_VMEM,
    )(*ins)


# ----------------- Kernel 2: fused GMT pooling + MLP head ------------------

def _gmt_head_kernel(kv_ref, mask_ref,
                     s1_ref, wq1_ref, bq1_ref, wo1_ref, bo1_ref,
                     wq2_ref, bq2_ref, wk2_ref, bk2_ref, wv2_ref, bv2_ref,
                     wo2_ref, bo2_ref,
                     s3_ref, wq3_ref, bq3_ref, wk3_ref, bk3_ref, wv3_ref, bv3_ref,
                     wo3_ref, bo3_ref,
                     wp_ref, bp_ref, w1_ref, b1_ref, w2_ref, b2_ref,
                     o_ref, *, num_heads, batch_size, dim_v):
    dh = dim_v // num_heads
    scale = 1.0 / math.sqrt(dim_v)

    # Full-width per-head lane masks (hoisted: JAX does not CSE broadcast_in_dim).
    lane = lax.broadcasted_iota(jnp.int32, (1, dim_v), 1)
    head_masks = [((lane >= h * dh) & (lane < (h + 1) * dh)).astype(jnp.float32)
                  for h in range(num_heads)]

    def linear(x, w_ref, b_ref):
        return jnp.dot(x, w_ref[...], preferred_element_type=jnp.float32) + b_ref[...]

    def mab(q, k, v, add_mask, wo_ref, bo_ref):
        # Per-head attention without 16-lane slicing: zero out non-head lanes of Q
        # (scores) and V (outputs); outputs of all heads sum into one lane-dense
        # (S, dim_v) value. Scale 1/sqrt(dim_V) folded into the Q-side mask.
        attn = jnp.zeros_like(q)
        for hm in head_masks:
            s = lax.dot_general(q * (hm * scale), k, (((1,), (1,)), ((), ())),
                                preferred_element_type=jnp.float32)
            if add_mask is not None:
                s = s + add_mask
            s = s - jnp.max(s, axis=-1, keepdims=True)
            p = jnp.exp(s)
            # EUP-approx reciprocal (~1e-3 rel deviation vs exact softmax; fine for
            # inference — switch approx=False for strict parity tests).
            p = p * pl.reciprocal(jnp.sum(p, axis=-1, keepdims=True), approx=True)
            attn = attn + jnp.dot(p, v * hm, preferred_element_type=jnp.float32)
        out = q + attn                                       # residual
        return out + jnp.maximum(linear(out, wo_ref, bo_ref), 0.0)  # out + relu(fc_o)

    # Seed queries are shared across the batch: compute fc_q(seeds) once.
    q1 = linear(s1_ref[...], wq1_ref, bq1_ref)               # (k1, D)
    q3 = linear(s3_ref[...], wq3_ref, bq3_ref)               # (1, D)

    pooled = []
    for b in range(batch_size):                              # static unroll (B small)
        kv = kv_ref[b]                                       # (Nmax, 2D) lane-dense load
        kd, vd = kv[:, :dim_v], kv[:, dim_v:]
        m = mask_ref[b]                                      # (1, Nmax) additive mask
        # GMPool_G : PMA with GCNConv K/V (computed in kernel 1), masked keys.
        h = mab(q1, kd, vd, m, wo1_ref, bo1_ref)
        # SelfAtt : SAB with Linear K/V, no mask.
        h = mab(linear(h, wq2_ref, bq2_ref),
                linear(h, wk2_ref, bk2_ref),
                linear(h, wv2_ref, bv2_ref),
                None, wo2_ref, bo2_ref)
        # GMPool_I : PMA with a single seed, Linear K/V, no mask.
        h = mab(q3,
                linear(h, wk3_ref, bk3_ref),
                linear(h, wv3_ref, bv3_ref),
                None, wo3_ref, bo3_ref)
        pooled.append(h)                                     # (1, D)
    x = jnp.concatenate(pooled, axis=0)                      # (B, D)

    # Head: gmt.lin2 -> lin1 + relu -> dropout(eval) -> lin2 -> log_softmax.
    x = linear(x, wp_ref, bp_ref)
    x = jnp.maximum(linear(x, w1_ref, b1_ref), 0.0)
    # TODO(synk): F.dropout(p=0.5) implemented as identity (eval mode); training-mode
    # dropout would use pltpu.prng_seed / pltpu.prng_random_bits.
    z = linear(x, w2_ref, b2_ref)
    z = z - jnp.max(z, axis=-1, keepdims=True)
    o_ref[...] = (z - jnp.log(jnp.sum(jnp.exp(z), axis=-1, keepdims=True))
                  ).astype(o_ref.dtype)


def gmt_head(dense_kv, attn_mask, params, B):
    p1, p2, p3 = params["pma1"], params["sab2"], params["pma3"]
    num_classes = params["lin2_w"].shape[1]
    ins = [dense_kv, attn_mask,
           p1["S"], p1["fc_q_w"], p1["fc_q_b"], p1["fc_o_w"], p1["fc_o_b"],
           p2["fc_q_w"], p2["fc_q_b"], p2["lk_w"], p2["lk_b"],
           p2["lv_w"], p2["lv_b"], p2["fc_o_w"], p2["fc_o_b"],
           p3["S"], p3["fc_q_w"], p3["fc_q_b"], p3["lk_w"], p3["lk_b"],
           p3["lv_w"], p3["lv_b"], p3["fc_o_w"], p3["fc_o_b"],
           params["gmt_lin2_w"], params["gmt_lin2_b"],
           params["lin1_w"], params["lin1_b"], params["lin2_w"], params["lin2_b"]]
    return pl.pallas_call(
        partial(_gmt_head_kernel, num_heads=_HEADS, batch_size=B, dim_v=_HIDDEN),
        out_shape=jax.ShapeDtypeStruct((B, num_classes), jnp.float32),
        in_specs=[_VMEM] * len(ins),
        out_specs=_VMEM,
    )(*ins)


# ------------------------------- JAX glue ----------------------------------

def gcn_norm_dense(edge_index, num_nodes):
    src, dst = edge_index[0], edge_index[1]
    a = jnp.zeros((num_nodes, num_nodes), jnp.float32).at[dst, src].add(1.0)
    a = a + jnp.eye(num_nodes, dtype=jnp.float32)          # add self-loops
    deg = a.sum(axis=1)
    dinv = jnp.where(deg > 0, 1.0 / jnp.sqrt(deg), 0.0)
    return dinv[:, None] * a * dinv[None, :]


def net_forward(params, x0, adj, batch, pos, B, Nmax):
    D = _HIDDEN
    # 1. fused GCN stack -> GMPool_G's GCNConv keys/values for every node, (N, 128)
    kv_nodes = gcn_stack(adj, x0, params)

    # to_dense_batch scatter (JAX glue)
    dense_kv = jnp.zeros((B, Nmax, 2 * D), jnp.float32).at[batch, pos].set(kv_nodes)
    valid = jnp.zeros((B, Nmax), jnp.float32).at[batch, pos].set(1.0)
    attn_mask = ((1.0 - valid) * -1e9).reshape(B, 1, Nmax)

    # 2. fused GMT pooling (GMPool_G -> SelfAtt -> GMPool_I) + gmt.lin2 + MLP head.
    return gmt_head(dense_kv, attn_mask, params, B)


# ------------------------------- parameters --------------------------------

def glorot(key, shape):
    fan_in, fan_out = shape[-2], shape[-1]
    limit = math.sqrt(6.0 / (fan_in + fan_out))
    return jax.random.uniform(key, shape, jnp.float32, -limit, limit)


def init_params(key, num_features, num_classes, k1):
    keys = iter(jax.random.split(key, 64))

    def lin(in_c, out_c):
        return glorot(next(keys), (in_c, out_c)), jnp.zeros((1, out_c), jnp.float32)

    def mab_params(num_seeds=None, d=_HIDDEN, with_kv=True):
        p = {}
        p["fc_q_w"], p["fc_q_b"] = lin(d, d)
        if with_kv:
            p["lk_w"], p["lk_b"] = lin(d, d)
            p["lv_w"], p["lv_b"] = lin(d, d)
        p["fc_o_w"], p["fc_o_b"] = lin(d, d)
        if num_seeds is not None:
            p["S"] = glorot(next(keys), (num_seeds, d))
        return p

    prm = {}
    prm["conv1_w"], prm["conv1_b"] = lin(num_features, 32)
    prm["conv2_w"], prm["conv2_b"] = lin(32, 32)
    prm["conv3_w"], prm["conv3_b"] = lin(32, 32)

    # gmt.lin1 : (96 -> 64), pre-split into three (32,64) chunks so the in-kernel
    # concat([x1,x2,x3]) becomes three partial matmuls.
    wl, bl = lin(96, _HIDDEN)
    prm["gmt_lin1_wa"], prm["gmt_lin1_wb"], prm["gmt_lin1_wc"] = wl[:32], wl[32:64], wl[64:]
    prm["gmt_lin1_b"] = bl

    # GMPool_G: fc_q/fc_o/seeds live in the fused GMT kernel; GCNConv K/V weights are
    # concatenated as [Wk | Wv] for the fused GCN-stack kernel (single adj matmul).
    prm["pma1"] = mab_params(k1, with_kv=False)
    wk, bk = lin(_HIDDEN, _HIDDEN)
    wv, bv = lin(_HIDDEN, _HIDDEN)
    prm["pma1_wkv"] = jnp.concatenate([wk, wv], axis=1)   # (64, 128)
    prm["pma1_bkv"] = jnp.concatenate([bk, bv], axis=1)   # (1, 128)

    prm["sab2"] = mab_params(None)        # SelfAtt
    prm["pma3"] = mab_params(1)           # GMPool_I
    prm["gmt_lin2_w"], prm["gmt_lin2_b"] = lin(_HIDDEN, 32)
    prm["lin1_w"], prm["lin1_b"] = lin(32, 16)
    prm["lin2_w"], prm["lin2_b"] = lin(16, num_classes)
    return prm


# ---------------------------------- main ------------------------------------

if __name__ == "__main__":
    key = jax.random.PRNGKey(0)
    num_features, num_classes = 3, 2          # PROTEINS: 3 features, 2 classes
    avg_num_nodes, pooling_ratio = 10, 0.25   # synthetic dataset-average
    k1 = math.ceil(avg_num_nodes * pooling_ratio)

    # Synthetic batch of 2 small graphs (7 and 5 nodes, undirected cycles).
    sizes = [7, 5]
    N, B, Nmax = sum(sizes), len(sizes), max(sizes)
    batch_list, pos_list = [], []
    for g, s in enumerate(sizes):
        batch_list += [g] * s
        pos_list += list(range(s))
    batch = jnp.array(batch_list, jnp.int32)
    pos = jnp.array(pos_list, jnp.int32)

    edges = []
    for i in range(7):                         # 7-cycle on nodes 0..6
        j = (i + 1) % 7
        edges += [(i, j), (j, i)]
    for i in range(5):                         # 5-cycle on nodes 7..11
        a, b = 7 + i, 7 + (i + 1) % 5
        edges += [(a, b), (b, a)]
    edge_index = jnp.array(edges, jnp.int32).T          # (2, 24)

    kx, kp = jax.random.split(key)
    x0 = jax.random.normal(kx, (N, num_features), jnp.float32)
    params = init_params(kp, num_features, num_classes, k1)

    adj = gcn_norm_dense(edge_index, N)                 # dense normalized (A + I)

    fwd = jax.jit(net_forward, static_argnums=(5, 6))
    out = fwd(params, x0, adj, batch, pos, B, Nmax)
    out = jax.block_until_ready(out)
    assert out.shape == (B, num_classes), out.shape
    print("KERNEL_OK")
</pallas_src>

<mosaic_0001>
module attributes {stable_mosaic.version = 11 : i64} {
  func.func @_gcn_stack_kernel(%arg0: memref<12x12xf32, #tpu.memory_space<vmem>>, %arg1: memref<12x3xf32, #tpu.memory_space<vmem>>, %arg2: memref<3x32xf32, #tpu.memory_space<vmem>>, %arg3: memref<1x32xf32, #tpu.memory_space<vmem>>, %arg4: memref<32x32xf32, #tpu.memory_space<vmem>>, %arg5: memref<1x32xf32, #tpu.memory_space<vmem>>, %arg6: memref<32x32xf32, #tpu.memory_space<vmem>>, %arg7: memref<1x32xf32, #tpu.memory_space<vmem>>, %arg8: memref<32x64xf32, #tpu.memory_space<vmem>>, %arg9: memref<32x64xf32, #tpu.memory_space<vmem>>, %arg10: memref<32x64xf32, #tpu.memory_space<vmem>>, %arg11: memref<1x64xf32, #tpu.memory_space<vmem>>, %arg12: memref<64x128xf32, #tpu.memory_space<vmem>>, %arg13: memref<1x128xf32, #tpu.memory_space<vmem>>, %arg14: memref<12x128xf32, #tpu.memory_space<vmem>>) attributes {dimension_semantics = [], scalar_prefetch = 0 : i64, scratch_operands = 0 : i64, tpu.core_type = #tpu.core_type<tc>} {
    %c0 = arith.constant 0 : index
    %c0_0 = arith.constant 0 : index
    %0 = vector.load %arg0[%c0, %c0_0] : memref<12x12xf32, #tpu.memory_space<vmem>>, vector<12x12xf32>
    %c0_1 = arith.constant 0 : index
    %c0_2 = arith.constant 0 : index
    %1 = vector.load %arg1[%c0_1, %c0_2] : memref<12x3xf32, #tpu.memory_space<vmem>>, vector<12x3xf32>
    %c0_3 = arith.constant 0 : index
    %c0_4 = arith.constant 0 : index
    %2 = vector.load %arg2[%c0_3, %c0_4] : memref<3x32xf32, #tpu.memory_space<vmem>>, vector<3x32xf32>
    %cst = arith.constant dense<0.000000e+00> : vector<12x32xf32>
    %3 = tpu.matmul %1, %2, %cst {dimension_numbers = #tpu.dot_dimension_numbers<[1], [0], [0], [1], [0, 0, 1, 1], [], []>} : vector<12x3xf32>, vector<3x32xf32>, vector<12x32xf32> -> vector<12x32xf32>
    %cst_5 = arith.constant dense<0.000000e+00> : vector<12x32xf32>
    %4 = tpu.matmul %0, %3, %cst_5 {dimension_numbers = #tpu.dot_dimension_numbers<[1], [0], [0], [1], [0, 0, 1, 1], [], []>} : vector<12x12xf32>, vector<12x32xf32>, vector<12x32xf32> -> vector<12x32xf32>
    %c0_6 = arith.constant 0 : index
    %c0_7 = arith.constant 0 : index
    %5 = vector.load %arg3[%c0_6, %c0_7] : memref<1x32xf32, #tpu.memory_space<vmem>>, vector<1x32xf32>
    %6 = vector.broadcast %5 : vector<1x32xf32> to vector<12x32xf32>
    %7 = arith.addf %4, %6 : vector<12x32xf32>
    %cst_8 = arith.constant 0.000000e+00 : f32
    %8 = vector.broadcast %cst_8 : f32 to vector<12x32xf32>
    %9 = arith.maximumf %7, %8 : vector<12x32xf32>
    %c0_9 = arith.constant 0 : index
    %c0_10 = arith.constant 0 : index
    %10 = vector.load %arg4[%c0_9, %c0_10] : memref<32x32xf32, #tpu.memory_space<vmem>>, vector<32x32xf32>
    %cst_11 = arith.constant dense<0.000000e+00> : vector<12x32xf32>
    %11 = tpu.matmul %9, %10, %cst_11 {dimension_numbers = #tpu.dot_dimension_numbers<[1], [0], [0], [1], [0, 0, 1, 1], [], []>} : vector<12x32xf32>, vector<32x32xf32>, vector<12x32xf32> -> vector<12x32xf32>
    %cst_12 = arith.constant dense<0.000000e+00> : vector<12x32xf32>
    %12 = tpu.matmul %0, %11, %cst_12 {dimension_numbers = #tpu.dot_dimension_numbers<[1], [0], [0], [1], [0, 0, 1, 1], [], []>} : vector<12x12xf32>, vector<12x32xf32>, vector<12x32xf32> -> vector<12x32xf32>
    %c0_13 = arith.constant 0 : index
    %c0_14 = arith.constant 0 : index
    %13 = vector.load %arg5[%c0_13, %c0_14] : memref<1x32xf32, #tpu.memory_space<vmem>>, vector<1x32xf32>
    %14 = vector.broadcast %13 : vector<1x32xf32> to vector<12x32xf32>
    %15 = arith.addf %12, %14 : vector<12x32xf32>
    %cst_15 = arith.constant 0.000000e+00 : f32
    %16 = vector.broadcast %cst_15 : f32 to vector<12x32xf32>
    %17 = arith.maximumf %15, %16 : vector<12x32xf32>
    %c0_16 = arith.constant 0 : index
    %c0_17 = arith.constant 0 : index
    %18 = vector.load %arg6[%c0_16, %c0_17] : memref<32x32xf32, #tpu.memory_space<vmem>>, vector<32x32xf32>
    %cst_18 = arith.constant dense<0.000000e+00> : vector<12x32xf32>
    %19 = tpu.matmul %17, %18, %cst_18 {dimension_numbers = #tpu.dot_dimension_numbers<[1], [0], [0], [1], [0, 0, 1, 1], [], []>} : vector<12x32xf32>, vector<32x32xf32>, vector<12x32xf32> -> vector<12x32xf32>
    %cst_19 = arith.constant dense<0.000000e+00> : vector<12x32xf32>
    %20 = tpu.matmul %0, %19, %cst_19 {dimension_numbers = #tpu.dot_dimension_numbers<[1], [0], [0], [1], [0, 0, 1, 1], [], []>} : vector<12x12xf32>, vector<12x32xf32>, vector<12x32xf32> -> vector<12x32xf32>
    %c0_20 = arith.constant 0 : index
    %c0_21 = arith.constant 0 : index
    %21 = vector.load %arg7[%c0_20, %c0_21] : memref<1x32xf32, #tpu.memory_space<vmem>>, vector<1x32xf32>
    %22 = vector.broadcast %21 : vector<1x32xf32> to vector<12x32xf32>
    %23 = arith.addf %20, %22 : vector<12x32xf32>
    %cst_22 = arith.constant 0.000000e+00 : f32
    %24 = vector.broadcast %cst_22 : f32 to vector<12x32xf32>
    %25 = arith.maximumf %23, %24 : vector<12x32xf32>
    %c0_23 = arith.constant 0 : index
    %c0_24 = arith.constant 0 : index
    %26 = vector.load %arg8[%c0_23, %c0_24] : memref<32x64xf32, #tpu.memory_space<vmem>>, vector<32x64xf32>
    %cst_25 = arith.constant dense<0.000000e+00> : vector<12x64xf32>
    %27 = tpu.matmul %9, %26, %cst_25 {dimension_numbers = #tpu.dot_dimension_numbers<[1], [0], [0], [1], [0, 0, 1, 1], [], []>} : vector<12x32xf32>, vector<32x64xf32>, vector<12x64xf32> -> vector<12x64xf32>
    %c0_26 = arith.constant 0 : index
    %c0_27 = arith.constant 0 : index
    %28 = vector.load %arg9[%c0_26, %c0_27] : memref<32x64xf32, #tpu.memory_space<vmem>>, vector<32x64xf32>
    %cst_28 = arith.constant dense<0.000000e+00> : vector<12x64xf32>
    %29 = tpu.matmul %17, %28, %cst_28 {dimension_numbers = #tpu.dot_dimension_numbers<[1], [0], [0], [1], [0, 0, 1, 1], [], []>} : vector<12x32xf32>, vector<32x64xf32>, vector<12x64xf32> -> vector<12x64xf32>
    %30 = arith.addf %27, %29 : vector<12x64xf32>
    %c0_29 = arith.constant 0 : index
    %c0_30 = arith.constant 0 : index
    %31 = vector.load %arg10[%c0_29, %c0_30] : memref<32x64xf32, #tpu.memory_space<vmem>>, vector<32x64xf32>
    %cst_31 = arith.constant dense<0.000000e+00> : vector<12x64xf32>
    %32 = tpu.matmul %25, %31, %cst_31 {dimension_numbers = #tpu.dot_dimension_numbers<[1], [0], [0], [1], [0, 0, 1, 1], [], []>} : vector<12x32xf32>, vector<32x64xf32>, vector<12x64xf32> -> vector<12x64xf32>
    %33 = arith.addf %30, %32 : vector<12x64xf32>
    %c0_32 = arith.constant 0 : index
    %c0_33 = arith.constant 0 : index
    %34 = vector.load %arg11[%c0_32, %c0_33] : memref<1x64xf32, #tpu.memory_space<vmem>>, vector<1x64xf32>
    %35 = vector.broadcast %34 : vector<1x64xf32> to vector<12x64xf32>
    %36 = arith.addf %33, %35 : vector<12x64xf32>
    %c0_34 = arith.constant 0 : index
    %c0_35 = arith.constant 0 : index
    %37 = vector.load %arg12[%c0_34, %c0_35] : memref<64x128xf32, #tpu.memory_space<vmem>>, vector<64x128xf32>
    %cst_36 = arith.constant dense<0.000000e+00> : vector<12x128xf32>
    %38 = tpu.matmul %36, %37, %cst_36 {dimension_numbers = #tpu.dot_dimension_numbers<[1], [0], [0], [1], [0, 0, 1, 1], [], []>} : vector<12x64xf32>, vector<64x128xf32>, vector<12x128xf32> -> vector<12x128xf32>
    %cst_37 = arith.constant dense<0.000000e+00> : vector<12x128xf32>
    %39 = tpu.matmul %0, %38, %cst_37 {dimension_numbers = #tpu.dot_dimension_numbers<[1], [0], [0], [1], [0, 0, 1, 1], [], []>} : vector<12x12xf32>, vector<12x128xf32>, vector<12x128xf32> -> vector<12x128xf32>
    %c0_38 = arith.constant 0 : index
    %c0_39 = arith.constant 0 : index
    %40 = vector.load %arg13[%c0_38, %c0_39] : memref<1x128xf32, #tpu.memory_space<vmem>>, vector<1x128xf32>
    %41 = vector.broadcast %40 : vector<1x128xf32> to vector<12x128xf32>
    %42 = arith.addf %39, %41 : vector<12x128xf32>
    %c0_40 = arith.constant 0 : index
    %c0_41 = arith.constant 0 : index
    %43 = vector.load %arg14[%c0_40, %c0_41] : memref<12x128xf32, #tpu.memory_space<vmem>>, vector<12x128xf32>
    tpu.vector_store %arg14[%c0_40, %c0_41], %42 {strides = array<i32>} : memref<12x128xf32, #tpu.memory_space<vmem>>, vector<12x128xf32>,
    return
  }
}

module attributes {stable_mosaic.version = 11 : i64} {
  func.func @_gmt_head_kernel(%arg0: memref<2x7x128xf32, #tpu.memory_space<vmem>>, %arg1: memref<2x1x7xf32, #tpu.memory_space<vmem>>, %arg2: memref<3x64xf32, #tpu.memory_space<vmem>>, %arg3: memref<64x64xf32, #tpu.memory_space<vmem>>, %arg4: memref<1x64xf32, #tpu.memory_space<vmem>>, %arg5: memref<64x64xf32, #tpu.memory_space<vmem>>, %arg6: memref<1x64xf32, #tpu.memory_space<vmem>>, %arg7: memref<64x64xf32, #tpu.memory_space<vmem>>, %arg8: memref<1x64xf32, #tpu.memory_space<vmem>>, %arg9: memref<64x64xf32, #tpu.memory_space<vmem>>, %arg10: memref<1x64xf32, #tpu.memory_space<vmem>>, %arg11: memref<64x64xf32, #tpu.memory_space<vmem>>, %arg12: memref<1x64xf32, #tpu.memory_space<vmem>>, %arg13: memref<64x64xf32, #tpu.memory_space<vmem>>, %arg14: memref<1x64xf32, #tpu.memory_space<vmem>>, %arg15: memref<1x64xf32, #tpu.memory_space<vmem>>, %arg16: memref<64x64xf32, #tpu.memory_space<vmem>>, %arg17: memref<1x64xf32, #tpu.memory_space<vmem>>, %arg18: memref<64x64xf32, #tpu.memory_space<vmem>>, %arg19: memref<1x64xf32, #tpu.memory_space<vmem>>, %arg20: memref<64x64xf32, #tpu.memory_space<vmem>>, %arg21: memref<1x64xf32, #tpu.memory_space<vmem>>, %arg22: memref<64x64xf32, #tpu.memory_space<vmem>>, %arg23: memref<1x64xf32, #tpu.memory_space<vmem>>, %arg24: memref<64x32xf32, #tpu.memory_space<vmem>>, %arg25: memref<1x32xf32, #tpu.memory_space<vmem>>, %arg26: memref<32x16xf32, #tpu.memory_space<vmem>>, %arg27: memref<1x16xf32, #tpu.memory_space<vmem>>, %arg28: memref<16x2xf32, #tpu.memory_space<vmem>>, %arg29: memref<1x2xf32, #tpu.memory_space<vmem>>, %arg30: memref<2x2xf32, #tpu.memory_space<vmem>>) attributes {dimension_semantics = [], scalar_prefetch = 0 : i64, scratch_operands = 0 : i64, tpu.core_type = #tpu.core_type<tc>} {
    %0 = tpu.iota {dimensions = array<i32: 1>} : vector<1x64xi32>
    %c0_i32 = arith.constant 0 : i32
    %1 = vector.broadcast %c0_i32 : i32 to vector<1x64xi32>
    %2 = arith.cmpi sge, %0, %1 : vector<1x64xi32>
    %c16_i32 = arith.constant 16 : i32
    %3 = vector.broadcast %c16_i32 : i32 to vector<1x64xi32>
    %4 = arith.cmpi slt, %0, %3 : vector<1x64xi32>
    %5 = arith.andi %2, %4 : vector<1x64xi1>
    %6 = arith.extui %5 : vector<1x64xi1> to vector<1x64xi32>
    %7 = arith.sitofp %6 : vector<1x64xi32> to vector<1x64xf32>
    %c16_i32_0 = arith.constant 16 : i32
    %8 = vector.broadcast %c16_i32_0 : i32 to vector<1x64xi32>
    %9 = arith.cmpi sge, %0, %8 : vector<1x64xi32>
    %c32_i32 = arith.constant 32 : i32
    %10 = vector.broadcast %c32_i32 : i32 to vector<1x64xi32>
    %11 = arith.cmpi slt, %0, %10 : vector<1x64xi32>
    %12 = arith.andi %9, %11 : vector<1x64xi1>
    %13 = arith.extui %12 : vector<1x64xi1> to vector<1x64xi32>
    %14 = arith.sitofp %13 : vector<1x64xi32> to vector<1x64xf32>
    %c32_i32_1 = arith.constant 32 : i32
    %15 = vector.broadcast %c32_i32_1 : i32 to vector<1x64xi32>
    %16 = arith.cmpi sge, %0, %15 : vector<1x64xi32>
    %c48_i32 = arith.constant 48 : i32
    %17 = vector.broadcast %c48_i32 : i32 to vector<1x64xi32>
    %18 = arith.cmpi slt, %0, %17 : vector<1x64xi32>
    %19 = arith.andi %16, %18 : vector<1x64xi1>
    %20 = arith.extui %19 : vector<1x64xi1> to vector<1x64xi32>
    %21 = arith.sitofp %20 : vector<1x64xi32> to vector<1x64xf32>
    %c48_i32_2 = arith.constant 48 : i32
    %22 = vector.broadcast %c48_i32_2 : i32 to vector<1x64xi32>
    %23 = arith.cmpi sge, %0, %22 : vector<1x64xi32>
    %c64_i32 = arith.constant 64 : i32
    %24 = vector.broadcast %c64_i32 : i32 to vector<1x64xi32>
    %25 = arith.cmpi slt, %0, %24 : vector<1x64xi32>
    %26 = arith.andi %23, %25 : vector<1x64xi1>
    %27 = arith.extui %26 : vector<1x64xi1> to vector<1x64xi32>
    %28 = arith.sitofp %27 : vector<1x64xi32> to vector<1x64xf32>
    %c0 = arith.constant 0 : index
    %c0_3 = arith.constant 0 : index
    %29 = vector.load %arg2[%c0, %c0_3] : memref<3x64xf32, #tpu.memory_space<vmem>>, vector<3x64xf32>
    %c0_4 = arith.constant 0 : index
    %c0_5 = arith.constant 0 : index
    %30 = vector.load %arg3[%c0_4, %c0_5] : memref<64x64xf32, #tpu.memory_space<vmem>>, vector<64x64xf32>
    %cst = arith.constant dense<0.000000e+00> : vector<3x64xf32>
    %31 = tpu.matmul %29, %30, %cst {dimension_numbers = #tpu.dot_dimension_numbers<[1], [0], [0], [1], [0, 0, 1, 1], [], []>} : vector<3x64xf32>, vector<64x64xf32>, vector<3x64xf32> -> vector<3x64xf32>
    %c0_6 = arith.constant 0 : index
    %c0_7 = arith.constant 0 : index
    %32 = vector.load %arg4[%c0_6, %c0_7] : memref<1x64xf32, #tpu.memory_space<vmem>>, vector<1x64xf32>
    %33 = vector.broadcast %32 : vector<1x64xf32> to vector<3x64xf32>
    %34 = arith.addf %31, %33 : vector<3x64xf32>
    %c0_8 = arith.constant 0 : index
    %c0_9 = arith.constant 0 : index
    %35 = vector.load %arg15[%c0_8, %c0_9] : memref<1x64xf32, #tpu.memory_space<vmem>>, vector<1x64xf32>
    %c0_10 = arith.constant 0 : index
    %c0_11 = arith.constant 0 : index
    %36 = vector.load %arg16[%c0_10, %c0_11] : memref<64x64xf32, #tpu.memory_space<vmem>>, vector<64x64xf32>
    %cst_12 = arith.constant dense<0.000000e+00> : vector<1x64xf32>
    %37 = tpu.matmul %35, %36, %cst_12 {dimension_numbers = #tpu.dot_dimension_numbers<[1], [0], [0], [1], [0, 0, 1, 1], [], []>} : vector<1x64xf32>, vector<64x64xf32>, vector<1x64xf32> -> vector<1x64xf32>
    %c0_13 = arith.constant 0 : index
    %c0_14 = arith.constant 0 : index
    %38 = vector.load %arg17[%c0_13, %c0_14] : memref<1x64xf32, #tpu.memory_space<vmem>>, vector<1x64xf32>
    %39 = arith.addf %37, %38 : vector<1x64xf32>
    %c0_15 = arith.constant 0 : index
    %c0_16 = arith.constant 0 : index
    %c0_17 = arith.constant 0 : index
    %40 = vector.load %arg0[%c0_15, %c0_16, %c0_17] : memref<2x7x128xf32, #tpu.memory_space<vmem>>, vector<1x7x128xf32>
    %41 = vector.shape_cast %40 : vector<1x7x128xf32> to vector<7x128xf32>
    %42 = vector.extract_strided_slice %41 {offsets = [0, 0], sizes = [7, 64], strides = [1, 1]} : vector<7x128xf32> to vector<7x64xf32>
    %43 = vector.extract_strided_slice %41 {offsets = [0, 64], sizes = [7, 64], strides = [1, 1]} : vector<7x128xf32> to vector<7x64xf32>
    %c0_18 = arith.constant 0 : index
    %c0_19 = arith.constant 0 : index
    %c0_20 = arith.constant 0 : index
    %44 = vector.load %arg1[%c0_18, %c0_19, %c0_20] : memref<2x1x7xf32, #tpu.memory_space<vmem>>, vector<1x1x7xf32>
    %45 = vector.shape_cast %44 : vector<1x1x7xf32> to vector<1x7xf32>
    %cst_21 = arith.constant 0.000000e+00 : f32
    %46 = vector.broadcast %cst_21 : f32 to vector<3x64xf32>
    %cst_22 = arith.constant 1.250000e-01 : f32
    %47 = vector.broadcast %cst_22 : f32 to vector<1x64xf32>
    %48 = arith.mulf %7, %47 : vector<1x64xf32>
    %49 = vector.broadcast %48 : vector<1x64xf32> to vector<3x64xf32>
    %50 = arith.mulf %34, %49 : vector<3x64xf32>
    %cst_23 = arith.constant dense<0.000000e+00> : vector<3x7xf32>
    %51 = tpu.matmul %50, %42, %cst_23 {dimension_numbers = #tpu.dot_dimension_numbers<[1], [1], [0], [0], [0, 0, 1, 0], [], []>} : vector<3x64xf32>, vector<7x64xf32>, vector<3x7xf32> -> vector<3x7xf32>
    %52 = vector.broadcast %45 : vector<1x7xf32> to vector<3x7xf32>
    %53 = arith.addf %51, %52 : vector<3x7xf32>
    %cst_24 = arith.constant dense<0xFF800000> : vector<3xf32>
    %54 = vector.multi_reduction <maximumf>, %53, %cst_24 [1] : vector<3x7xf32> to vector<3xf32>
    %55 = vector.shape_cast %54 : vector<3xf32> to vector<3x1xf32>
    %56 = vector.broadcast %55 : vector<3x1xf32> to vector<3x7xf32>
    %57 = arith.subf %53, %56 : vector<3x7xf32>
    %58 = math.exp %57 : vector<3x7xf32>
    %cst_25 = arith.constant dense<0.000000e+00> : vector<3xf32>
    %59 = vector.multi_reduction <add>, %58, %cst_25 [1] : vector<3x7xf32> to vector<3xf32>
    %60 = vector.shape_cast %59 : vector<3xf32> to vector<3x1xf32>
    %61 = tpu.reciprocal %60 {approx = true} : vector<3x1xf32> -> vector<3x1xf32>
    %62 = vector.broadcast %61 : vector<3x1xf32> to vector<3x7xf32>
    %63 = arith.mulf %58, %62 : vector<3x7xf32>
    %64 = vector.broadcast %7 : vector<1x64xf32> to vector<7x64xf32>
    %65 = arith.mulf %43, %64 : vector<7x64xf32>
    %cst_26 = arith.constant dense<0.000000e+00> : vector<3x64xf32>
    %66 = tpu.matmul %63, %65, %cst_26 {dimension_numbers = #tpu.dot_dimension_numbers<[1], [0], [0], [1], [0, 0, 1, 1], [], []>} : vector<3x7xf32>, vector<7x64xf32>, vector<3x64xf32> -> vector<3x64xf32>
    %67 = arith.addf %46, %66 : vector<3x64xf32>
    %cst_27 = arith.constant 1.250000e-01 : f32
    %68 = vector.broadcast %cst_27 : f32 to vector<1x64xf32>
    %69 = arith.mulf %14, %68 : vector<1x64xf32>
    %70 = vector.broadcast %69 : vector<1x64xf32> to vector<3x64xf32>
    %71 = arith.mulf %34, %70 : vector<3x64xf32>
    %cst_28 = arith.constant dense<0.000000e+00> : vector<3x7xf32>
    %72 = tpu.matmul %71, %42, %cst_28 {dimension_numbers = #tpu.dot_dimension_numbers<[1], [1], [0], [0], [0, 0, 1, 0], [], []>} : vector<3x64xf32>, vector<7x64xf32>, vector<3x7xf32> -> vector<3x7xf32>
    %73 = vector.broadcast %45 : vector<1x7xf32> to vector<3x7xf32>
    %74 = arith.addf %72, %73 : vector<3x7xf32>
    %cst_29 = arith.constant dense<0xFF800000> : vector<3xf32>
    %75 = vector.multi_reduction <maximumf>, %74, %cst_29 [1] : vector<3x7xf32> to vector<3xf32>
    %76 = vector.shape_cast %75 : vector<3xf32> to vector<3x1xf32>
    %77 = vector.broadcast %76 : vector<3x1xf32> to vector<3x7xf32>
    %78 = arith.subf %74, %77 : vector<3x7xf32>
    %79 = math.exp %78 : vector<3x7xf32>
    %cst_30 = arith.constant dense<0.000000e+00> : vector<3xf32>
    %80 = vector.multi_reduction <add>, %79, %cst_30 [1] : vector<3x7xf32> to vector<3xf32>
    %81 = vector.shape_cast %80 : vector<3xf32> to vector<3x1xf32>
    %82 = tpu.reciprocal %81 {approx = true} : vector<3x1xf32> -> vector<3x1xf32>
    %83 = vector.broadcast %82 : vector<3x1xf32> to vector<3x7xf32>
    %84 = arith.mulf %79, %83 : vector<3x7xf32>
    %85 = vector.broadcast %14 : vector<1x64xf32> to vector<7x64xf32>
    %86 = arith.mulf %43, %85 : vector<7x64xf32>
    %cst_31 = arith.constant dense<0.000000e+00> : vector<3x64xf32>
    %87 = tpu.matmul %84, %86, %cst_31 {dimension_numbers = #tpu.dot_dimension_numbers<[1], [0], [0], [1], [0, 0, 1, 1], [], []>} : vector<3x7xf32>, vector<7x64xf32>, vector<3x64xf32> -> vector<3x64xf32>
    %88 = arith.addf %67, %87 : vector<3x64xf32>
    %cst_32 = arith.constant 1.250000e-01 : f32
    %89 = vector.broadcast %cst_32 : f32 to vector<1x64xf32>
    %90 = arith.mulf %21, %89 : vector<1x64xf32>
    %91 = vector.broadcast %90 : vector<1x64xf32> to vector<3x64xf32>
    %92 = arith.mulf %34, %91 : vector<3x64xf32>
    %cst_33 = arith.constant dense<0.000000e+00> : vector<3x7xf32>
    %93 = tpu.matmul %92, %42, %cst_33 {dimension_numbers = #tpu.dot_dimension_numbers<[1], [1], [0], [0], [0, 0, 1, 0], [], []>} : vector<3x64xf32>, vector<7x64xf32>, vector<3x7xf32> -> vector<3x7xf32>
    %94 = vector.broadcast %45 : vector<1x7xf32> to vector<3x7xf32>
    %95 = arith.addf %93, %94 : vector<3x7xf32>
    %cst_34 = arith.constant dense<0xFF800000> : vector<3xf32>
    %96 = vector.multi_reduction <maximumf>, %95, %cst_34 [1] : vector<3x7xf32> to vector<3xf32>
    %97 = vector.shape_cast %96 : vector<3xf32> to vector<3x1xf32>
    %98 = vector.broadcast %97 : vector<3x1xf32> to vector<3x7xf32>
    %99 = arith.subf %95, %98 : vector<3x7xf32>
    %100 = math.exp %99 : vector<3x7xf32>
    %cst_35 = arith.constant dense<0.000000e+00> : vector<3xf32>
    %101 = vector.multi_reduction <add>, %100, %cst_35 [1] : vector<3x7xf32> to vector<3xf32>
    %102 = vector.shape_cast %101 : vector<3xf32> to vector<3x1xf32>
    %103 = tpu.reciprocal %102 {approx = true} : vector<3x1xf32> -> vector<3x1xf32>
    %104 = vector.broadcast %103 : vector<3x1xf32> to vector<3x7xf32>
    %105 = arith.mulf %100, %104 : vector<3x7xf32>
    %106 = vector.broadcast %21 : vector<1x64xf32> to vector<7x64xf32>
    %107 = arith.mulf %43, %106 : vector<7x64xf32>
    %cst_36 = arith.constant dense<0.000000e+00> : vector<3x64xf32>
    %108 = tpu.matmul %105, %107, %cst_36 {dimension_numbers = #tpu.dot_dimension_numbers<[1], [0], [0], [1], [0, 0, 1, 1], [], []>} : vector<3x7xf32>, vector<7x64xf32>, vector<3x64xf32> -> vector<3x64xf32>
    %109 = arith.addf %88, %108 : vector<3x64xf32>
    %cst_37 = arith.constant 1.250000e-01 : f32
    %110 = vector.broadcast %cst_37 : f32 to vector<1x64xf32>
    %111 = arith.mulf %28, %110 : vector<1x64xf32>
    %112 = vector.broadcast %111 : vector<1x64xf32> to vector<3x64xf32>
    %113 = arith.mulf %34, %112 : vector<3x64xf32>
    %cst_38 = arith.constant dense<0.000000e+00> : vector<3x7xf32>
    %114 = tpu.matmul %113, %42, %cst_38 {dimension_numbers = #tpu.dot_dimension_numbers<[1], [1], [0], [0], [0, 0, 1, 0], [], []>} : vector<3x64xf32>, vector<7x64xf32>, vector<3x7xf32> -> vector<3x7xf32>
    %115 = vector.broadcast %45 : vector<1x7xf32> to vector<3x7xf32>
    %116 = arith.addf %114, %115 : vector<3x7xf32>
    %cst_39 = arith.constant dense<0xFF800000> : vector<3xf32>
    %117 = vector.multi_reduction <maximumf>, %116, %cst_39 [1] : vector<3x7xf32> to vector<3xf32>
    %118 = vector.shape_cast %117 : vector<3xf32> to vector<3x1xf32>
    %119 = vector.broadcast %118 : vector<3x1xf32> to vector<3x7xf32>
    %120 = arith.subf %116, %119 : vector<3x7xf32>
    %121 = math.exp %120 : vector<3x7xf32>
    %cst_40 = arith.constant dense<0.000000e+00> : vector<3xf32>
    %122 = vector.multi_reduction <add>, %121, %cst_40 [1] : vector<3x7xf32> to vector<3xf32>
    %123 = vector.shape_cast %122 : vector<3xf32> to vector<3x1xf32>
    %124 = tpu.reciprocal %123 {approx = true} : vector<3x1xf32> -> vector<3x1xf32>
    %125 = vector.broadcast %124 : vector<3x1xf32> to vector<3x7xf32>
    %126 = arith.mulf %121, %125 : vector<3x7xf32>
    %127 = vector.broadcast %28 : vector<1x64xf32> to vector<7x64xf32>
    %128 = arith.mulf %43, %127 : vector<7x64xf32>
    %cst_41 = arith.constant dense<0.000000e+00> : vector<3x64xf32>
    %129 = tpu.matmul %126, %128, %cst_41 {dimension_numbers = #tpu.dot_dimension_numbers<[1], [0], [0], [1], [0, 0, 1, 1], [], []>} : vector<3x7xf32>, vector<7x64xf32>, vector<3x64xf32> -> vector<3x64xf32>
    %130 = arith.addf %109, %129 : vector<3x64xf32>
    %131 = arith.addf %34, %130 : vector<3x64xf32>
    %c0_42 = arith.constant 0 : index
    %c0_43 = arith.constant 0 : index
    %132 = vector.load %arg5[%c0_42, %c0_43] : memref<64x64xf32, #tpu.memory_space<vmem>>, vector<64x64xf32>
    %cst_44 = arith.constant dense<0.000000e+00> : vector<3x64xf32>
    %133 = tpu.matmul %131, %132, %cst_44 {dimension_numbers = #tpu.dot_dimension_numbers<[1], [0], [0], [1], [0, 0, 1, 1], [], []>} : vector<3x64xf32>, vector<64x64xf32>, vector<3x64xf32> -> vector<3x64xf32>
    %c0_45 = arith.constant 0 : index
    %c0_46 = arith.constant 0 : index
    %134 = vector.load %arg6[%c0_45, %c0_46] : memref<1x64xf32, #tpu.memory_space<vmem>>, vector<1x64xf32>
    %135 = vector.broadcast %134 : vector<1x64xf32> to vector<3x64xf32>
    %136 = arith.addf %133, %135 : vector<3x64xf32>
    %cst_47 = arith.constant 0.000000e+00 : f32
    %137 = vector.broadcast %cst_47 : f32 to vector<3x64xf32>
    %138 = arith.maximumf %136, %137 : vector<3x64xf32>
    %139 = arith.addf %131, %138 : vector<3x64xf32>
    %c0_48 = arith.constant 0 : index
    %c0_49 = arith.constant 0 : index
    %140 = vector.load %arg7[%c0_48, %c0_49] : memref<64x64xf32, #tpu.memory_space<vmem>>, vector<64x64xf32>
    %cst_50 = arith.constant dense<0.000000e+00> : vector<3x64xf32>
    %141 = tpu.matmul %139, %140, %cst_50 {dimension_numbers = #tpu.dot_dimension_numbers<[1], [0], [0], [1], [0, 0, 1, 1], [], []>} : vector<3x64xf32>, vector<64x64xf32>, vector<3x64xf32> -> vector<3x64xf32>
    %c0_51 = arith.constant 0 : index
    %c0_52 = arith.constant 0 : index
    %142 = vector.load %arg8[%c0_51, %c0_52] : memref<1x64xf32, #tpu.memory_space<vmem>>, vector<1x64xf32>
    %143 = vector.broadcast %142 : vector<1x64xf32> to vector<3x64xf32>
    %144 = arith.addf %141, %143 : vector<3x64xf32>
    %c0_53 = arith.constant 0 : index
    %c0_54 = arith.constant 0 : index
    %145 = vector.load %arg9[%c0_53, %c0_54] : memref<64x64xf32, #tpu.memory_space<vmem>>, vector<64x64xf32>
    %cst_55 = arith.constant dense<0.000000e+00> : vector<3x64xf32>
    %146 = tpu.matmul %139, %145, %cst_55 {dimension_numbers = #tpu.dot_dimension_numbers<[1], [0], [0], [1], [0, 0, 1, 1], [], []>} : vector<3x64xf32>, vector<64x64xf32>, vector<3x64xf32> -> vector<3x64xf32>
    %c0_56 = arith.constant 0 : index
    %c0_57 = arith.constant 0 : index
    %147 = vector.load %arg10[%c0_56, %c0_57] : memref<1x64xf32, #tpu.memory_space<vmem>>, vector<1x64xf32>
    %148 = vector.broadcast %147 : vector<1x64xf32> to vector<3x64xf32>
    %149 = arith.addf %146, %148 : vector<3x64xf32>
    %c0_58 = arith.constant 0 : index
    %c0_59 = arith.constant 0 : index
    %150 = vector.load %arg11[%c0_58, %c0_59] : memref<64x64xf32, #tpu.memory_space<vmem>>, vector<64x64xf32>
    %cst_60 = arith.constant dense<0.000000e+00> : vector<3x64xf32>
    %151 = tpu.matmul %139, %150, %cst_60 {dimension_numbers = #tpu.dot_dimension_numbers<[1], [0], [0], [1], [0, 0, 1, 1], [], []>} : vector<3x64xf32>, vector<64x64xf32>, vector<3x64xf32> -> vector<3x64xf32>
    %c0_61 = arith.constant 0 : index
    %c0_62 = arith.constant 0 : index
    %152 = vector.load %arg12[%c0_61, %c0_62] : memref<1x64xf32, #tpu.memory_space<vmem>>, vector<1x64xf32>
    %153 = vector.broadcast %152 : vector<1x64xf32> to vector<3x64xf32>
    %154 = arith.addf %151, %153 : vector<3x64xf32>
    %cst_63 = arith.constant 0.000000e+00 : f32
    %155 = vector.broadcast %cst_63 : f32 to vector<3x64xf32>
    %cst_64 = arith.constant 1.250000e-01 : f32
    %156 = vector.broadcast %cst_64 : f32 to vector<1x64xf32>
    %157 = arith.mulf %7, %156 : vector<1x64xf32>
    %158 = vector.broadcast %157 : vector<1x64xf32> to vector<3x64xf32>
    %159 = arith.mulf %144, %158 : vector<3x64xf32>
    %cst_65 = arith.constant dense<0.000000e+00> : vector<3x3xf32>
    %160 = tpu.matmul %159, %149, %cst_65 {dimension_numbers = #tpu.dot_dimension_numbers<[1], [1], [0], [0], [0, 0, 1, 0], [], []>} : vector<3x64xf32>, vector<3x64xf32>, vector<3x3xf32> -> vector<3x3xf32>
    %cst_66 = arith.constant dense<0xFF800000> : vector<3xf32>
    %161 = vector.multi_reduction <maximumf>, %160, %cst_66 [1] : vector<3x3xf32> to vector<3xf32>
    %162 = vector.shape_cast %161 : vector<3xf32> to vector<3x1xf32>
    %163 = vector.broadcast %162 : vector<3x1xf32> to vector<3x3xf32>
    %164 = arith.subf %160, %163 : vector<3x3xf32>
    %165 = math.exp %164 : vector<3x3xf32>
    %cst_67 = arith.constant dense<0.000000e+00> : vector<3xf32>
    %166 = vector.multi_reduction <add>, %165, %cst_67 [1] : vector<3x3xf32> to vector<3xf32>
    %167 = vector.shape_cast %166 : vector<3xf32> to vector<3x1xf32>
    %168 = tpu.reciprocal %167 {approx = true} : vector<3x1xf32> -> vector<3x1xf32>
    %169 = vector.broadcast %168 : vector<3x1xf32> to vector<3x3xf32>
    %170 = arith.mulf %165, %169 : vector<3x3xf32>
    %171 = vector.broadcast %7 : vector<1x64xf32> to vector<3x64xf32>
    %172 = arith.mulf %154, %171 : vector<3x64xf32>
    %cst_68 = arith.constant dense<0.000000e+00> : vector<3x64xf32>
    %173 = tpu.matmul %170, %172, %cst_68 {dimension_numbers = #tpu.dot_dimension_numbers<[1], [0], [0], [1], [0, 0, 1, 1], [], []>} : vector<3x3xf32>, vector<3x64xf32>, vector<3x64xf32> -> vector<3x64xf32>
    %174 = arith.addf %155, %173 : vector<3x64xf32>
    %cst_69 = arith.constant 1.250000e-01 : f32
    %175 = vector.broadcast %cst_69 : f32 to vector<1x64xf32>
    %176 = arith.mulf %14, %175 : vector<1x64xf32>
    %177 = vector.broadcast %176 : vector<1x64xf32> to vector<3x64xf32>
    %178 = arith.mulf %144, %177 : vector<3x64xf32>
    %cst_70 = arith.constant dense<0.000000e+00> : vector<3x3xf32>
    %179 = tpu.matmul %178, %149, %cst_70 {dimension_numbers = #tpu.dot_dimension_numbers<[1], [1], [0], [0], [0, 0, 1, 0], [], []>} : vector<3x64xf32>, vector<3x64xf32>, vector<3x3xf32> -> vector<3x3xf32>
    %cst_71 = arith.constant dense<0xFF800000> : vector<3xf32>
    %180 = vector.multi_reduction <maximumf>, %179, %cst_71 [1] : vector<3x3xf32> to vector<3xf32>
    %181 = vector.shape_cast %180 : vector<3xf32> to vector<3x1xf32>
    %182 = vector.broadcast %181 : vector<3x1xf32> to vector<3x3xf32>
    %183 = arith.subf %179, %182 : vector<3x3xf32>
    %184 = math.exp %183 : vector<3x3xf32>
    %cst_72 = arith.constant dense<0.000000e+00> : vector<3xf32>
    %185 = vector.multi_reduction <add>, %184, %cst_72 [1] : vector<3x3xf32> to vector<3xf32>
    %186 = vector.shape_cast %185 : vector<3xf32> to vector<3x1xf32>
    %187 = tpu.reciprocal %186 {approx = true} : vector<3x1xf32> -> vector<3x1xf32>
    %188 = vector.broadcast %187 : vector<3x1xf32> to vector<3x3xf32>
    %189 = arith.mulf %184, %188 : vector<3x3xf32>
    %190 = vector.broadcast %14 : vector<1x64xf32> to vector<3x64xf32>
    %191 = arith.mulf %154, %190 : vector<3x64xf32>
    %cst_73 = arith.constant dense<0.000000e+00> : vector<3x64xf32>
    %192 = tpu.matmul %189, %191, %cst_73 {dimension_numbers = #tpu.dot_dimension_numbers<[1], [0], [0], [1], [0, 0, 1, 1], [], []>} : vector<3x3xf32>, vector<3x64xf32>, vector<3x64xf32> -> vector<3x64xf32>
    %193 = arith.addf %174, %192 : vector<3x64xf32>
    %cst_74 = arith.constant 1.250000e-01 : f32
    %194 = vector.broadcast %cst_74 : f32 to vector<1x64xf32>
    %195 = arith.mulf %21, %194 : vector<1x64xf32>
    %196 = vector.broadcast %195 : vector<1x64xf32> to vector<3x64xf32>
    %197 = arith.mulf %144, %196 : vector<3x64xf32>
    %cst_75 = arith.constant dense<0.000000e+00> : vector<3x3xf32>
    %198 = tpu.matmul %197, %149, %cst_75 {dimension_numbers = #tpu.dot_dimension_numbers<[1], [1], [0], [0], [0, 0, 1, 0], [], []>} : vector<3x64xf32>, vector<3x64xf32>, vector<3x3xf32> -> vector<3x3xf32>
    %cst_76 = arith.constant dense<0xFF800000> : vector<3xf32>
    %199 = vector.multi_reduction <maximumf>, %198, %cst_76 [1] : vector<3x3xf32> to vector<3xf32>
    %200 = vector.shape_cast %199 : vector<3xf32> to vector<3x1xf32>
    %201 = vector.broadcast %200 : vector<3x1xf32> to vector<3x3xf32>
    %202 = arith.subf %198, %201 : vector<3x3xf32>
    %203 = math.exp %202 : vector<3x3xf32>
    %cst_77 = arith.constant dense<0.000000e+00> : vector<3xf32>
    %204 = vector.multi_reduction <add>, %203, %cst_77 [1] : vector<3x3xf32> to vector<3xf32>
    %205 = vector.shape_cast %204 : vector<3xf32> to vector<3x1xf32>
    %206 = tpu.reciprocal %205 {approx = true} : vector<3x1xf32> -> vector<3x1xf32>
    %207 = vector.broadcast %206 : vector<3x1xf32> to vector<3x3xf32>
    %208 = arith.mulf %203, %207 : vector<3x3xf32>
    %209 = vector.broadcast %21 : vector<1x64xf32> to vector<3x64xf32>
    %210 = arith.mulf %154, %209 : vector<3x64xf32>
    %cst_78 = arith.constant dense<0.000000e+00> : vector<3x64xf32>
    %211 = tpu.matmul %208, %210, %cst_78 {dimension_numbers = #tpu.dot_dimension_numbers<[1], [0], [0], [1], [0, 0, 1, 1], [], []>} : vector<3x3xf32>, vector<3x64xf32>, vector<3x64xf32> -> vector<3x64xf32>
    %212 = arith.addf %193, %211 : vector<3x64xf32>
    %cst_79 = arith.constant 1.250000e-01 : f32
    %213 = vector.broadcast %cst_79 : f32 to vector<1x64xf32>
    %214 = arith.mulf %28, %213 : vector<1x64xf32>
    %215 = vector.broadcast %214 : vector<1x64xf32> to vector<3x64xf32>
    %216 = arith.mulf %144, %215 : vector<3x64xf32>
    %cst_80 = arith.constant dense<0.000000e+00> : vector<3x3xf32>
    %217 = tpu.matmul %216, %149, %cst_80 {dimension_numbers = #tpu.dot_dimension_numbers<[1], [1], [0], [0], [0, 0, 1, 0], [], []>} : vector<3x64xf32>, vector<3x64xf32>, vector<3x3xf32> -> vector<3x3xf32>
    %cst_81 = arith.constant dense<0xFF800000> : vector<3xf32>
    %218 = vector.multi_reduction <maximumf>, %217, %cst_81 [1] : vector<3x3xf32> to vector<3xf32>
    %219 = vector.shape_cast %218 : vector<3xf32> to vector<3x1xf32>
    %220 = vector.broadcast %219 : vector<3x1xf32> to vector<3x3xf32>
    %221 = arith.subf %217, %220 : vector<3x3xf32>
    %222 = math.exp %221 : vector<3x3xf32>
    %cst_82 = arith.constant dense<0.000000e+00> : vector<3xf32>
    %223 = vector.multi_reduction <add>, %222, %cst_82 [1] : vector<3x3xf32> to vector<3xf32>
    %224 = vector.shape_cast %223 : vector<3xf32> to vector<3x1xf32>
    %225 = tpu.reciprocal %224 {approx = true} : vector<3x1xf32> -> vector<3x1xf32>
    %226 = vector.broadcast %225 : vector<3x1xf32> to vector<3x3xf32>
    %227 = arith.mulf %222, %226 : vector<3x3xf32>
    %228 = vector.broadcast %28 : vector<1x64xf32> to vector<3x64xf32>
    %229 = arith.mulf %154, %228 : vector<3x64xf32>
    %cst_83 = arith.constant dense<0.000000e+00> : vector<3x64xf32>
    %230 = tpu.matmul %227, %229, %cst_83 {dimension_numbers = #tpu.dot_dimension_numbers<[1], [0], [0], [1], [0, 0, 1, 1], [], []>} : vector<3x3xf32>, vector<3x64xf32>, vector<3x64xf32> -> vector<3x64xf32>
    %231 = arith.addf %212, %230 : vector<3x64xf32>
    %232 = arith.addf %144, %231 : vector<3x64xf32>
    %c0_84 = arith.constant 0 : index
    %c0_85 = arith.constant 0 : index
    %233 = vector.load %arg13[%c0_84, %c0_85] : memref<64x64xf32, #tpu.memory_space<vmem>>, vector<64x64xf32>
    %cst_86 = arith.constant dense<0.000000e+00> : vector<3x64xf32>
    %234 = tpu.matmul %232, %233, %cst_86 {dimension_numbers = #tpu.dot_dimension_numbers<[1], [0], [0], [1], [0, 0, 1, 1], [], []>} : vector<3x64xf32>, vector<64x64xf32>, vector<3x64xf32> -> vector<3x64xf32>
    %c0_87 = arith.constant 0 : index
    %c0_88 = arith.constant 0 : index
    %235 = vector.load %arg14[%c0_87, %c0_88] : memref<1x64xf32, #tpu.memory_space<vmem>>, vector<1x64xf32>
    %236 = vector.broadcast %235 : vector<1x64xf32> to vector<3x64xf32>
    %237 = arith.addf %234, %236 : vector<3x64xf32>
    %cst_89 = arith.constant 0.000000e+00 : f32
    %238 = vector.broadcast %cst_89 : f32 to vector<3x64xf32>
    %239 = arith.maximumf %237, %238 : vector<3x64xf32>
    %240 = arith.addf %232, %239 : vector<3x64xf32>
    %c0_90 = arith.constant 0 : index
    %c0_91 = arith.constant 0 : index
    %241 = vector.load %arg18[%c0_90, %c0_91] : memref<64x64xf32, #tpu.memory_space<vmem>>, vector<64x64xf32>
    %cst_92 = arith.constant dense<0.000000e+00> : vector<3x64xf32>
    %242 = tpu.matmul %240, %241, %cst_92 {dimension_numbers = #tpu.dot_dimension_numbers<[1], [0], [0], [1], [0, 0, 1, 1], [], []>} : vector<3x64xf32>, vector<64x64xf32>, vector<3x64xf32> -> vector<3x64xf32>
    %c0_93 = arith.constant 0 : index
    %c0_94 = arith.constant 0 : index
    %243 = vector.load %arg19[%c0_93, %c0_94] : memref<1x64xf32, #tpu.memory_space<vmem>>, vector<1x64xf32>
    %244 = vector.broadcast %243 : vector<1x64xf32> to vector<3x64xf32>
    %245 = arith.addf %242, %244 : vector<3x64xf32>
    %c0_95 = arith.constant 0 : index
    %c0_96 = arith.constant 0 : index
    %246 = vector.load %arg20[%c0_95, %c0_96] : memref<64x64xf32, #tpu.memory_space<vmem>>, vector<64x64xf32>
    %cst_97 = arith.constant dense<0.000000e+00> : vector<3x64xf32>
    %247 = tpu.matmul %240, %246, %cst_97 {dimension_numbers = #tpu.dot_dimension_numbers<[1], [0], [0], [1], [0, 0, 1, 1], [], []>} : vector<3x64xf32>, vector<64x64xf32>, vector<3x64xf32> -> vector<3x64xf32>
    %c0_98 = arith.constant 0 : index
    %c0_99 = arith.constant 0 : index
    %248 = vector.load %arg21[%c0_98, %c0_99] : memref<1x64xf32, #tpu.memory_space<vmem>>, vector<1x64xf32>
    %249 = vector.broadcast %248 : vector<1x64xf32> to vector<3x64xf32>
    %250 = arith.addf %247, %249 : vector<3x64xf32>
    %cst_100 = arith.constant 0.000000e+00 : f32
    %251 = vector.broadcast %cst_100 : f32 to vector<1x64xf32>
    %cst_101 = arith.constant 1.250000e-01 : f32
    %252 = vector.broadcast %cst_101 : f32 to vector<1x64xf32>
    %253 = arith.mulf %7, %252 : vector<1x64xf32>
    %254 = arith.mulf %39, %253 : vector<1x64xf32>
    %cst_102 = arith.constant dense<0.000000e+00> : vector<1x3xf32>
    %255 = tpu.matmul %254, %245, %cst_102 {dimension_numbers = #tpu.dot_dimension_numbers<[1], [1], [0], [0], [0, 0, 1, 0], [], []>} : vector<1x64xf32>, vector<3x64xf32>, vector<1x3xf32> -> vector<1x3xf32>
    %cst_103 = arith.constant dense<0xFF800000> : vector<1xf32>
    %256 = vector.multi_reduction <maximumf>, %255, %cst_103 [1] : vector<1x3xf32> to vector<1xf32>
    %257 = vector.shape_cast %256 : vector<1xf32> to vector<1x1xf32>
    %258 = vector.broadcast %257 : vector<1x1xf32> to vector<1x3xf32>
    %259 = arith.subf %255, %258 : vector<1x3xf32>
    %260 = math.exp %259 : vector<1x3xf32>
    %cst_104 = arith.constant dense<0.000000e+00> : vector<1xf32>
    %261 = vector.multi_reduction <add>, %260, %cst_104 [1] : vector<1x3xf32> to vector<1xf32>
    %262 = vector.shape_cast %261 : vector<1xf32> to vector<1x1xf32>
    %263 = tpu.reciprocal %262 {approx = true} : vector<1x1xf32> -> vector<1x1xf32>
    %264 = vector.broadcast %263 : vector<1x1xf32> to vector<1x3xf32>
    %265 = arith.mulf %260, %264 : vector<1x3xf32>
    %266 = vector.broadcast %7 : vector<1x64xf32> to vector<3x64xf32>
    %267 = arith.mulf %250, %266 : vector<3x64xf32>
    %cst_105 = arith.constant dense<0.000000e+00> : vector<1x64xf32>
    %268 = tpu.matmul %265, %267, %cst_105 {dimension_numbers = #tpu.dot_dimension_numbers<[1], [0], [0], [1], [0, 0, 1, 1], [], []>} : vector<1x3xf32>, vector<3x64xf32>, vector<1x64xf32> -> vector<1x64xf32>
    %269 = arith.addf %251, %268 : vector<1x64xf32>
    %cst_106 = arith.constant 1.250000e-01 : f32
    %270 = vector.broadcast %cst_106 : f32 to vector<1x64xf32>
    %271 = arith.mulf %14, %270 : vector<1x64xf32>
    %272 = arith.mulf %39, %271 : vector<1x64xf32>
    %cst_107 = arith.constant dense<0.000000e+00> : vector<1x3xf32>
    %273 = tpu.matmul %272, %245, %cst_107 {dimension_numbers = #tpu.dot_dimension_numbers<[1], [1], [0], [0], [0, 0, 1, 0], [], []>} : vector<1x64xf32>, vector<3x64xf32>, vector<1x3xf32> -> vector<1x3xf32>
    %cst_108 = arith.constant dense<0xFF800000> : vector<1xf32>
    %274 = vector.multi_reduction <maximumf>, %273, %cst_108 [1] : vector<1x3xf32> to vector<1xf32>
    %275 = vector.shape_cast %274 : vector<1xf32> to vector<1x1xf32>
    %276 = vector.broadcast %275 : vector<1x1xf32> to vector<1x3xf32>
    %277 = arith.subf %273, %276 : vector<1x3xf32>
    %278 = math.exp %277 : vector<1x3xf32>
    %cst_109 = arith.constant dense<0.000000e+00> : vector<1xf32>
    %279 = vector.multi_reduction <add>, %278, %cst_109 [1] : vector<1x3xf32> to vector<1xf32>
    %280 = vector.shape_cast %279 : vector<1xf32> to vector<1x1xf32>
    %281 = tpu.reciprocal %280 {approx = true} : vector<1x1xf32> -> vector<1x1xf32>
    %282 = vector.broadcast %281 : vector<1x1xf32> to vector<1x3xf32>
    %283 = arith.mulf %278, %282 : vector<1x3xf32>
    %284 = vector.broadcast %14 : vector<1x64xf32> to vector<3x64xf32>
    %285 = arith.mulf %250, %284 : vector<3x64xf32>
    %cst_110 = arith.constant dense<0.000000e+00> : vector<1x64xf32>
    %286 = tpu.matmul %283, %285, %cst_110 {dimension_numbers = #tpu.dot_dimension_numbers<[1], [0], [0], [1], [0, 0, 1, 1], [], []>} : vector<1x3xf32>, vector<3x64xf32>, vector<1x64xf32> -> vector<1x64xf32>
    %287 = arith.addf %269, %286 : vector<1x64xf32>
    %cst_111 = arith.constant 1.250000e-01 : f32
    %288 = vector.broadcast %cst_111 : f32 to vector<1x64xf32>
    %289 = arith.mulf %21, %288 : vector<1x64xf32>
    %290 = arith.mulf %39, %289 : vector<1x64xf32>
    %cst_112 = arith.constant dense<0.000000e+00> : vector<1x3xf32>
    %291 = tpu.matmul %290, %245, %cst_112 {dimension_numbers = #tpu.dot_dimension_numbers<[1], [1], [0], [0], [0, 0, 1, 0], [], []>} : vector<1x64xf32>, vector<3x64xf32>, vector<1x3xf32> -> vector<1x3xf32>
    %cst_113 = arith.constant dense<0xFF800000> : vector<1xf32>
    %292 = vector.multi_reduction <maximumf>, %291, %cst_113 [1] : vector<1x3xf32> to vector<1xf32>
    %293 = vector.shape_cast %292 : vector<1xf32> to vector<1x1xf32>
    %294 = vector.broadcast %293 : vector<1x1xf32> to vector<1x3xf32>
    %295 = arith.subf %291, %294 : vector<1x3xf32>
    %296 = math.exp %295 : vector<1x3xf32>
    %cst_114 = arith.constant dense<0.000000e+00> : vector<1xf32>
    %297 = vector.multi_reduction <add>, %296, %cst_114 [1] : vector<1x3xf32> to vector<1xf32>
    %298 = vector.shape_cast %297 : vector<1xf32> to vector<1x1xf32>
    %299 = tpu.reciprocal %298 {approx = true} : vector<1x1xf32> -> vector<1x1xf32>
    %300 = vector.broadcast %299 : vector<1x1xf32> to vector<1x3xf32>
    %301 = arith.mulf %296, %300 : vector<1x3xf32>
    %302 = vector.broadcast %21 : vector<1x64xf32> to vector<3x64xf32>
    %303 = arith.mulf %250, %302 : vector<3x64xf32>
    %cst_115 = arith.constant dense<0.000000e+00> : vector<1x64xf32>
    %304 = tpu.matmul %301, %303, %cst_115 {dimension_numbers = #tpu.dot_dimension_numbers<[1], [0], [0], [1], [0, 0, 1, 1], [], []>} : vector<1x3xf32>, vector<3x64xf32>, vector<1x64xf32> -> vector<1x64xf32>
    %305 = arith.addf %287, %304 : vector<1x64xf32>
    %cst_116 = arith.constant 1.250000e-01 : f32
    %306 = vector.broadcast %cst_116 : f32 to vector<1x64xf32>
    %307 = arith.mulf %28, %306 : vector<1x64xf32>
    %308 = arith.mulf %39, %307 : vector<1x64xf32>
    %cst_117 = arith.constant dense<0.000000e+00> : vector<1x3xf32>
    %309 = tpu.matmul %308, %245, %cst_117 {dimension_numbers = #tpu.dot_dimension_numbers<[1], [1], [0], [0], [0, 0, 1, 0], [], []>} : vector<1x64xf32>, vector<3x64xf32>, vector<1x3xf32> -> vector<1x3xf32>
    %cst_118 = arith.constant dense<0xFF800000> : vector<1xf32>
    %310 = vector.multi_reduction <maximumf>, %309, %cst_118 [1] : vector<1x3xf32> to vector<1xf32>
    %311 = vector.shape_cast %310 : vector<1xf32> to vector<1x1xf32>
    %312 = vector.broadcast %311 : vector<1x1xf32> to vector<1x3xf32>
    %313 = arith.subf %309, %312 : vector<1x3xf32>
    %314 = math.exp %313 : vector<1x3xf32>
    %cst_119 = arith.constant dense<0.000000e+00> : vector<1xf32>
    %315 = vector.multi_reduction <add>, %314, %cst_119 [1] : vector<1x3xf32> to vector<1xf32>
    %316 = vector.shape_cast %315 : vector<1xf32> to vector<1x1xf32>
    %317 = tpu.reciprocal %316 {approx = true} : vector<1x1xf32> -> vector<1x1xf32>
    %318 = vector.broadcast %317 : vector<1x1xf32> to vector<1x3xf32>
    %319 = arith.mulf %314, %318 : vector<1x3xf32>
    %320 = vector.broadcast %28 : vector<1x64xf32> to vector<3x64xf32>
    %321 = arith.mulf %250, %320 : vector<3x64xf32>
    %cst_120 = arith.constant dense<0.000000e+00> : vector<1x64xf32>
    %322 = tpu.matmul %319, %321, %cst_120 {dimension_numbers = #tpu.dot_dimension_numbers<[1], [0], [0], [1], [0, 0, 1, 1], [], []>} : vector<1x3xf32>, vector<3x64xf32>, vector<1x64xf32> -> vector<1x64xf32>
    %323 = arith.addf %305, %322 : vector<1x64xf32>
    %324 = arith.addf %39, %323 : vector<1x64xf32>
    %c0_121 = arith.constant 0 : index
    %c0_122 = arith.constant 0 : index
    %325 = vector.load %arg22[%c0_121, %c0_122] : memref<64x64xf32, #tpu.memory_space<vmem>>, vector<64x64xf32>
    %cst_123 = arith.constant dense<0.000000e+00> : vector<1x64xf32>
    %326 = tpu.matmul %324, %325, %cst_123 {dimension_numbers = #tpu.dot_dimension_numbers<[1], [0], [0], [1], [0, 0, 1, 1], [], []>} : vector<1x64xf32>, vector<64x64xf32>, vector<1x64xf32> -> vector<1x64xf32>
    %c0_124 = arith.constant 0 : index
    %c0_125 = arith.constant 0 : index
    %327 = vector.load %arg23[%c0_124, %c0_125] : memref<1x64xf32, #tpu.memory_space<vmem>>, vector<1x64xf32>
    %328 = arith.addf %326, %327 : vector<1x64xf32>
    %cst_126 = arith.constant 0.000000e+00 : f32
    %329 = vector.broadcast %cst_126 : f32 to vector<1x64xf32>
    %330 = arith.maximumf %328, %329 : vector<1x64xf32>
    %331 = arith.addf %324, %330 : vector<1x64xf32>
    %c1 = arith.constant 1 : index
    %c0_127 = arith.constant 0 : index
    %c0_128 = arith.constant 0 : index
    %332 = vector.load %arg0[%c1, %c0_127, %c0_128] : memref<2x7x128xf32, #tpu.memory_space<vmem>>, vector<1x7x128xf32>
    %333 = vector.shape_cast %332 : vector<1x7x128xf32> to vector<7x128xf32>
    %334 = vector.extract_strided_slice %333 {offsets = [0, 0], sizes = [7, 64], strides = [1, 1]} : vector<7x128xf32> to vector<7x64xf32>
    %335 = vector.extract_strided_slice %333 {offsets = [0, 64], sizes = [7, 64], strides = [1, 1]} : vector<7x128xf32> to vector<7x64xf32>
    %c1_129 = arith.constant 1 : index
    %c0_130 = arith.constant 0 : index
    %c0_131 = arith.constant 0 : index
    %336 = vector.load %arg1[%c1_129, %c0_130, %c0_131] : memref<2x1x7xf32, #tpu.memory_space<vmem>>, vector<1x1x7xf32>
    %337 = vector.shape_cast %336 : vector<1x1x7xf32> to vector<1x7xf32>
    %cst_132 = arith.constant 0.000000e+00 : f32
    %338 = vector.broadcast %cst_132 : f32 to vector<3x64xf32>
    %cst_133 = arith.constant 1.250000e-01 : f32
    %339 = vector.broadcast %cst_133 : f32 to vector<1x64xf32>
    %340 = arith.mulf %7, %339 : vector<1x64xf32>
    %341 = vector.broadcast %340 : vector<1x64xf32> to vector<3x64xf32>
    %342 = arith.mulf %34, %341 : vector<3x64xf32>
    %cst_134 = arith.constant dense<0.000000e+00> : vector<3x7xf32>
    %343 = tpu.matmul %342, %334, %cst_134 {dimension_numbers = #tpu.dot_dimension_numbers<[1], [1], [0], [0], [0, 0, 1, 0], [], []>} : vector<3x64xf32>, vector<7x64xf32>, vector<3x7xf32> -> vector<3x7xf32>
    %344 = vector.broadcast %337 : vector<1x7xf32> to vector<3x7xf32>
    %345 = arith.addf %343, %344 : vector<3x7xf32>
    %cst_135 = arith.constant dense<0xFF800000> : vector<3xf32>
    %346 = vector.multi_reduction <maximumf>, %345, %cst_135 [1] : vector<3x7xf32> to vector<3xf32>
    %347 = vector.shape_cast %346 : vector<3xf32> to vector<3x1xf32>
    %348 = vector.broadcast %347 : vector<3x1xf32> to vector<3x7xf32>
    %349 = arith.subf %345, %348 : vector<3x7xf32>
    %350 = math.exp %349 : vector<3x7xf32>
    %cst_136 = arith.constant dense<0.000000e+00> : vector<3xf32>
    %351 = vector.multi_reduction <add>, %350, %cst_136 [1] : vector<3x7xf32> to vector<3xf32>
    %352 = vector.shape_cast %351 : vector<3xf32> to vector<3x1xf32>
    %353 = tpu.reciprocal %352 {approx = true} : vector<3x1xf32> -> vector<3x1xf32>
    %354 = vector.broadcast %353 : vector<3x1xf32> to vector<3x7xf32>
    %355 = arith.mulf %350, %354 : vector<3x7xf32>
    %356 = vector.broadcast %7 : vector<1x64xf32> to vector<7x64xf32>
    %357 = arith.mulf %335, %356 : vector<7x64xf32>
    %cst_137 = arith.constant dense<0.000000e+00> : vector<3x64xf32>
    %358 = tpu.matmul %355, %357, %cst_137 {dimension_numbers = #tpu.dot_dimension_numbers<[1], [0], [0], [1], [0, 0, 1, 1], [], []>} : vector<3x7xf32>, vector<7x64xf32>, vector<3x64xf32> -> vector<3x64xf32>
    %359 = arith.addf %338, %358 : vector<3x64xf32>
    %cst_138 = arith.constant 1.250000e-01 : f32
    %360 = vector.broadcast %cst_138 : f32 to vector<1x64xf32>
    %361 = arith.mulf %14, %360 : vector<1x64xf32>
    %362 = vector.broadcast %361 : vector<1x64xf32> to vector<3x64xf32>
    %363 = arith.mulf %34, %362 : vector<3x64xf32>
    %cst_139 = arith.constant dense<0.000000e+00> : vector<3x7xf32>
    %364 = tpu.matmul %363, %334, %cst_139 {dimension_numbers = #tpu.dot_dimension_numbers<[1], [1], [0], [0], [0, 0, 1, 0], [], []>} : vector<3x64xf32>, vector<7x64xf32>, vector<3x7xf32> -> vector<3x7xf32>
    %365 = vector.broadcast %337 : vector<1x7xf32> to vector<3x7xf32>
    %366 = arith.addf %364, %365 : vector<3x7xf32>
    %cst_140 = arith.constant dense<0xFF800000> : vector<3xf32>
    %367 = vector.multi_reduction <maximumf>, %366, %cst_140 [1] : vector<3x7xf32> to vector<3xf32>
    %368 = vector.shape_cast %367 : vector<3xf32> to vector<3x1xf32>
    %369 = vector.broadcast %368 : vector<3x1xf32> to vector<3x7xf32>
    %370 = arith.subf %366, %369 : vector<3x7xf32>
    %371 = math.exp %370 : vector<3x7xf32>
    %cst_141 = arith.constant dense<0.000000e+00> : vector<3xf32>
    %372 = vector.multi_reduction <add>, %371, %cst_141 [1] : vector<3x7xf32> to vector<3xf32>
    %373 = vector.shape_cast %372 : vector<3xf32> to vector<3x1xf32>
    %374 = tpu.reciprocal %373 {approx = true} : vector<3x1xf32> -> vector<3x1xf32>
    %375 = vector.broadcast %374 : vector<3x1xf32> to vector<3x7xf32>
    %376 = arith.mulf %371, %375 : vector<3x7xf32>
    %377 = vector.broadcast %14 : vector<1x64xf32> to vector<7x64xf32>
    %378 = arith.mulf %335, %377 : vector<7x64xf32>
    %cst_142 = arith.constant dense<0.000000e+00> : vector<3x64xf32>
    %379 = tpu.matmul %376, %378, %cst_142 {dimension_numbers = #tpu.dot_dimension_numbers<[1], [0], [0], [1], [0, 0, 1, 1], [], []>} : vector<3x7xf32>, vector<7x64xf32>, vector<3x64xf32> -> vector<3x64xf32>
    %380 = arith.addf %359, %379 : vector<3x64xf32>
    %cst_143 = arith.constant 1.250000e-01 : f32
    %381 = vector.broadcast %cst_143 : f32 to vector<1x64xf32>
    %382 = arith.mulf %21, %381 : vector<1x64xf32>
    %383 = vector.broadcast %382 : vector<1x64xf32> to vector<3x64xf32>
    %384 = arith.mulf %34, %383 : vector<3x64xf32>
    %cst_144 = arith.constant dense<0.000000e+00> : vector<3x7xf32>
    %385 = tpu.matmul %384, %334, %cst_144 {dimension_numbers = #tpu.dot_dimension_numbers<[1], [1], [0], [0], [0, 0, 1, 0], [], []>} : vector<3x64xf32>, vector<7x64xf32>, vector<3x7xf32> -> vector<3x7xf32>
    %386 = vector.broadcast %337 : vector<1x7xf32> to vector<3x7xf32>
    %387 = arith.addf %385, %386 : vector<3x7xf32>
    %cst_145 = arith.constant dense<0xFF800000> : vector<3xf32>
    %388 = vector.multi_reduction <maximumf>, %387, %cst_145 [1] : vector<3x7xf32> to vector<3xf32>
    %389 = vector.shape_cast %388 : vector<3xf32> to vector<3x1xf32>
    %390 = vector.broadcast %389 : vector<3x1xf32> to vector<3x7xf32>
    %391 = arith.subf %387, %390 : vector<3x7xf32>
    %392 = math.exp %391 : vector<3x7xf32>
    %cst_146 = arith.constant dense<0.000000e+00> : vector<3xf32>
    %393 = vector.multi_reduction <add>, %392, %cst_146 [1] : vector<3x7xf32> to vector<3xf32>
    %394 = vector.shape_cast %393 : vector<3xf32> to vector<3x1xf32>
    %395 = tpu.reciprocal %394 {approx = true} : vector<3x1xf32> -> vector<3x1xf32>
    %396 = vector.broadcast %395 : vector<3x1xf32> to vector<3x7xf32>
    %397 = arith.mulf %392, %396 : vector<3x7xf32>
    %398 = vector.broadcast %21 : vector<1x64xf32> to vector<7x64xf32>
    %399 = arith.mulf %335, %398 : vector<7x64xf32>
    %cst_147 = arith.constant dense<0.000000e+00> : vector<3x64xf32>
    %400 = tpu.matmul %397, %399, %cst_147 {dimension_numbers = #tpu.dot_dimension_numbers<[1], [0], [0], [1], [0, 0, 1, 1], [], []>} : vector<3x7xf32>, vector<7x64xf32>, vector<3x64xf32> -> vector<3x64xf32>
    %401 = arith.addf %380, %400 : vector<3x64xf32>
    %cst_148 = arith.constant 1.250000e-01 : f32
    %402 = vector.broadcast %cst_148 : f32 to vector<1x64xf32>
    %403 = arith.mulf %28, %402 : vector<1x64xf32>
    %404 = vector.broadcast %403 : vector<1x64xf32> to vector<3x64xf32>
    %405 = arith.mulf %34, %404 : vector<3x64xf32>
    %cst_149 = arith.constant dense<0.000000e+00> : vector<3x7xf32>
    %406 = tpu.matmul %405, %334, %cst_149 {dimension_numbers = #tpu.dot_dimension_numbers<[1], [1], [0], [0], [0, 0, 1, 0], [], []>} : vector<3x64xf32>, vector<7x64xf32>, vector<3x7xf32> -> vector<3x7xf32>
    %407 = vector.broadcast %337 : vector<1x7xf32> to vector<3x7xf32>
    %408 = arith.addf %406, %407 : vector<3x7xf32>
    %cst_150 = arith.constant dense<0xFF800000> : vector<3xf32>
    %409 = vector.multi_reduction <maximumf>, %408, %cst_150 [1] : vector<3x7xf32> to vector<3xf32>
    %410 = vector.shape_cast %409 : vector<3xf32> to vector<3x1xf32>
    %411 = vector.broadcast %410 : vector<3x1xf32> to vector<3x7xf32>
    %412 = arith.subf %408, %411 : vector<3x7xf32>
    %413 = math.exp %412 : vector<3x7xf32>
    %cst_151 = arith.constant dense<0.000000e+00> : vector<3xf32>
    %414 = vector.multi_reduction <add>, %413, %cst_151 [1] : vector<3x7xf32> to vector<3xf32>
    %415 = vector.shape_cast %414 : vector<3xf32> to vector<3x1xf32>
    %416 = tpu.reciprocal %415 {approx = true} : vector<3x1xf32> -> vector<3x1xf32>
    %417 = vector.broadcast %416 : vector<3x1xf32> to vector<3x7xf32>
    %418 = arith.mulf %413, %417 : vector<3x7xf32>
    %419 = vector.broadcast %28 : vector<1x64xf32> to vector<7x64xf32>
    %420 = arith.mulf %335, %419 : vector<7x64xf32>
    %cst_152 = arith.constant dense<0.000000e+00> : vector<3x64xf32>
    %421 = tpu.matmul %418, %420, %cst_152 {dimension_numbers = #tpu.dot_dimension_numbers<[1], [0], [0], [1], [0, 0, 1, 1], [], []>} : vector<3x7xf32>, vector<7x64xf32>, vector<3x64xf32> -> vector<3x64xf32>
    %422 = arith.addf %401, %421 : vector<3x64xf32>
    %423 = arith.addf %34, %422 : vector<3x64xf32>
    %c0_153 = arith.constant 0 : index
    %c0_154 = arith.constant 0 : index
    %424 = vector.load %arg5[%c0_153, %c0_154] : memref<64x64xf32, #tpu.memory_space<vmem>>, vector<64x64xf32>
    %cst_155 = arith.constant dense<0.000000e+00> : vector<3x64xf32>
    %425 = tpu.matmul %423, %424, %cst_155 {dimension_numbers = #tpu.dot_dimension_numbers<[1], [0], [0], [1], [0, 0, 1, 1], [], []>} : vector<3x64xf32>, vector<64x64xf32>, vector<3x64xf32> -> vector<3x64xf32>
    %c0_156 = arith.constant 0 : index
    %c0_157 = arith.constant 0 : index
    %426 = vector.load %arg6[%c0_156, %c0_157] : memref<1x64xf32, #tpu.memory_space<vmem>>, vector<1x64xf32>
    %427 = vector.broadcast %426 : vector<1x64xf32> to vector<3x64xf32>
    %428 = arith.addf %425, %427 : vector<3x64xf32>
    %cst_158 = arith.constant 0.000000e+00 : f32
    %429 = vector.broadcast %cst_158 : f32 to vector<3x64xf32>
    %430 = arith.maximumf %428, %429 : vector<3x64xf32>
    %431 = arith.addf %423, %430 : vector<3x64xf32>
    %c0_159 = arith.constant 0 : index
    %c0_160 = arith.constant 0 : index
    %432 = vector.load %arg7[%c0_159, %c0_160] : memref<64x64xf32, #tpu.memory_space<vmem>>, vector<64x64xf32>
    %cst_161 = arith.constant dense<0.000000e+00> : vector<3x64xf32>
    %433 = tpu.matmul %431, %432, %cst_161 {dimension_numbers = #tpu.dot_dimension_numbers<[1], [0], [0], [1], [0, 0, 1, 1], [], []>} : vector<3x64xf32>, vector<64x64xf32>, vector<3x64xf32> -> vector<3x64xf32>
    %c0_162 = arith.constant 0 : index
    %c0_163 = arith.constant 0 : index
    %434 = vector.load %arg8[%c0_162, %c0_163] : memref<1x64xf32, #tpu.memory_space<vmem>>, vector<1x64xf32>
    %435 = vector.broadcast %434 : vector<1x64xf32> to vector<3x64xf32>
    %436 = arith.addf %433, %435 : vector<3x64xf32>
    %c0_164 = arith.constant 0 : index
    %c0_165 = arith.constant 0 : index
    %437 = vector.load %arg9[%c0_164, %c0_165] : memref<64x64xf32, #tpu.memory_space<vmem>>, vector<64x64xf32>
    %cst_166 = arith.constant dense<0.000000e+00> : vector<3x64xf32>
    %438 = tpu.matmul %431, %437, %cst_166 {dimension_numbers = #tpu.dot_dimension_numbers<[1], [0], [0], [1], [0, 0, 1, 1], [], []>} : vector<3x64xf32>, vector<64x64xf32>, vector<3x64xf32> -> vector<3x64xf32>
    %c0_167 = arith.constant 0 : index
    %c0_168 = arith.constant 0 : index
    %439 = vector.load %arg10[%c0_167, %c0_168] : memref<1x64xf32, #tpu.memory_space<vmem>>, vector<1x64xf32>
    %440 = vector.broadcast %439 : vector<1x64xf32> to vector<3x64xf32>
    %441 = arith.addf %438, %440 : vector<3x64xf32>
    %c0_169 = arith.constant 0 : index
    %c0_170 = arith.constant 0 : index
    %442 = vector.load %arg11[%c0_169, %c0_170] : memref<64x64xf32, #tpu.memory_space<vmem>>, vector<64x64xf32>
    %cst_171 = arith.constant dense<0.000000e+00> : vector<3x64xf32>
    %443 = tpu.matmul %431, %442, %cst_171 {dimension_numbers = #tpu.dot_dimension_numbers<[1], [0], [0], [1], [0, 0, 1, 1], [], []>} : vector<3x64xf32>, vector<64x64xf32>, vector<3x64xf32> -> vector<3x64xf32>
    %c0_172 = arith.constant 0 : index
    %c0_173 = arith.constant 0 : index
    %444 = vector.load %arg12[%c0_172, %c0_173] : memref<1x64xf32, #tpu.memory_space<vmem>>, vector<1x64xf32>
    %445 = vector.broadcast %444 : vector<1x64xf32> to vector<3x64xf32>
    %446 = arith.addf %443, %445 : vector<3x64xf32>
    %cst_174 = arith.constant 0.000000e+00 : f32
    %447 = vector.broadcast %cst_174 : f32 to vector<3x64xf32>
    %cst_175 = arith.constant 1.250000e-01 : f32
    %448 = vector.broadcast %cst_175 : f32 to vector<1x64xf32>
    %449 = arith.mulf %7, %448 : vector<1x64xf32>
    %450 = vector.broadcast %449 : vector<1x64xf32> to vector<3x64xf32>
    %451 = arith.mulf %436, %450 : vector<3x64xf32>
    %cst_176 = arith.constant dense<0.000000e+00> : vector<3x3xf32>
    %452 = tpu.matmul %451, %441, %cst_176 {dimension_numbers = #tpu.dot_dimension_numbers<[1], [1], [0], [0], [0, 0, 1, 0], [], []>} : vector<3x64xf32>, vector<3x64xf32>, vector<3x3xf32> -> vector<3x3xf32>
    %cst_177 = arith.constant dense<0xFF800000> : vector<3xf32>
    %453 = vector.multi_reduction <maximumf>, %452, %cst_177 [1] : vector<3x3xf32> to vector<3xf32>
    %454 = vector.shape_cast %453 : vector<3xf32> to vector<3x1xf32>
    %455 = vector.broadcast %454 : vector<3x1xf32> to vector<3x3xf32>
    %456 = arith.subf %452, %455 : vector<3x3xf32>
    %457 = math.exp %456 : vector<3x3xf32>
    %cst_178 = arith.constant dense<0.000000e+00> : vector<3xf32>
    %458 = vector.multi_reduction <add>, %457, %cst_178 [1] : vector<3x3xf32> to vector<3xf32>
    %459 = vector.shape_cast %458 : vector<3xf32> to vector<3x1xf32>
    %460 = tpu.reciprocal %459 {approx = true} : vector<3x1xf32> -> vector<3x1xf32>
    %461 = vector.broadcast %460 : vector<3x1xf32> to vector<3x3xf32>
    %462 = arith.mulf %457, %461 : vector<3x3xf32>
    %463 = vector.broadcast %7 : vector<1x64xf32> to vector<3x64xf32>
    %464 = arith.mulf %446, %463 : vector<3x64xf32>
    %cst_179 = arith.constant dense<0.000000e+00> : vector<3x64xf32>
    %465 = tpu.matmul %462, %464, %cst_179 {dimension_numbers = #tpu.dot_dimension_numbers<[1], [0], [0], [1], [0, 0, 1, 1], [], []>} : vector<3x3xf32>, vector<3x64xf32>, vector<3x64xf32> -> vector<3x64xf32>
    %466 = arith.addf %447, %465 : vector<3x64xf32>
    %cst_180 = arith.constant 1.250000e-01 : f32
    %467 = vector.broadcast %cst_180 : f32 to vector<1x64xf32>
    %468 = arith.mulf %14, %467 : vector<1x64xf32>
    %469 = vector.broadcast %468 : vector<1x64xf32> to vector<3x64xf32>
    %470 = arith.mulf %436, %469 : vector<3x64xf32>
    %cst_181 = arith.constant dense<0.000000e+00> : vector<3x3xf32>
    %471 = tpu.matmul %470, %441, %cst_181 {dimension_numbers = #tpu.dot_dimension_numbers<[1], [1], [0], [0], [0, 0, 1, 0], [], []>} : vector<3x64xf32>, vector<3x64xf32>, vector<3x3xf32> -> vector<3x3xf32>
    %cst_182 = arith.constant dense<0xFF800000> : vector<3xf32>
    %472 = vector.multi_reduction <maximumf>, %471, %cst_182 [1] : vector<3x3xf32> to vector<3xf32>
    %473 = vector.shape_cast %472 : vector<3xf32> to vector<3x1xf32>
    %474 = vector.broadcast %473 : vector<3x1xf32> to vector<3x3xf32>
    %475 = arith.subf %471, %474 : vector<3x3xf32>
    %476 = math.exp %475 : vector<3x3xf32>
    %cst_183 = arith.constant dense<0.000000e+00> : vector<3xf32>
    %477 = vector.multi_reduction <add>, %476, %cst_183 [1] : vector<3x3xf32> to vector<3xf32>
    %478 = vector.shape_cast %477 : vector<3xf32> to vector<3x1xf32>
    %479 = tpu.reciprocal %478 {approx = true} : vector<3x1xf32> -> vector<3x1xf32>
    %480 = vector.broadcast %479 : vector<3x1xf32> to vector<3x3xf32>
    %481 = arith.mulf %476, %480 : vector<3x3xf32>
    %482 = vector.broadcast %14 : vector<1x64xf32> to vector<3x64xf32>
    %483 = arith.mulf %446, %482 : vector<3x64xf32>
    %cst_184 = arith.constant dense<0.000000e+00> : vector<3x64xf32>
    %484 = tpu.matmul %481, %483, %cst_184 {dimension_numbers = #tpu.dot_dimension_numbers<[1], [0], [0], [1], [0, 0, 1, 1], [], []>} : vector<3x3xf32>, vector<3x64xf32>, vector<3x64xf32> -> vector<3x64xf32>
    %485 = arith.addf %466, %484 : vector<3x64xf32>
    %cst_185 = arith.constant 1.250000e-01 : f32
    %486 = vector.broadcast %cst_185 : f32 to vector<1x64xf32>
    %487 = arith.mulf %21, %486 : vector<1x64xf32>
    %488 = vector.broadcast %487 : vector<1x64xf32> to vector<3x64xf32>
    %489 = arith.mulf %436, %488 : vector<3x64xf32>
    %cst_186 = arith.constant dense<0.000000e+00> : vector<3x3xf32>
    %490 = tpu.matmul %489, %441, %cst_186 {dimension_numbers = #tpu.dot_dimension_numbers<[1], [1], [0], [0], [0, 0, 1, 0], [], []>} : vector<3x64xf32>, vector<3x64xf32>, vector<3x3xf32> -> vector<3x3xf32>
    %cst_187 = arith.constant dense<0xFF800000> : vector<3xf32>
    %491 = vector.multi_reduction <maximumf>, %490, %cst_187 [1] : vector<3x3xf32> to vector<3xf32>
    %492 = vector.shape_cast %491 : vector<3xf32> to vector<3x1xf32>
    %493 = vector.broadcast %492 : vector<3x1xf32> to vector<3x3xf32>
    %494 = arith.subf %490, %493 : vector<3x3xf32>
    %495 = math.exp %494 : vector<3x3xf32>
    %cst_188 = arith.constant dense<0.000000e+00> : vector<3xf32>
    %496 = vector.multi_reduction <add>, %495, %cst_188 [1] : vector<3x3xf32> to vector<3xf32>
    %497 = vector.shape_cast %496 : vector<3xf32> to vector<3x1xf32>
    %498 = tpu.reciprocal %497 {approx = true} : vector<3x1xf32> -> vector<3x1xf32>
    %499 = vector.broadcast %498 : vector<3x1xf32> to vector<3x3xf32>
    %500 = arith.mulf %495, %499 : vector<3x3xf32>
    %501 = vector.broadcast %21 : vector<1x64xf32> to vector<3x64xf32>
    %502 = arith.mulf %446, %501 : vector<3x64xf32>
    %cst_189 = arith.constant dense<0.000000e+00> : vector<3x64xf32>
    %503 = tpu.matmul %500, %502, %cst_189 {dimension_numbers = #tpu.dot_dimension_numbers<[1], [0], [0], [1], [0, 0, 1, 1], [], []>} : vector<3x3xf32>, vector<3x64xf32>, vector<3x64xf32> -> vector<3x64xf32>
    %504 = arith.addf %485, %503 : vector<3x64xf32>
    %cst_190 = arith.constant 1.250000e-01 : f32
    %505 = vector.broadcast %cst_190 : f32 to vector<1x64xf32>
    %506 = arith.mulf %28, %505 : vector<1x64xf32>
    %507 = vector.broadcast %506 : vector<1x64xf32> to vector<3x64xf32>
    %508 = arith.mulf %436, %507 : vector<3x64xf32>
    %cst_191 = arith.constant dense<0.000000e+00> : vector<3x3xf32>
    %509 = tpu.matmul %508, %441, %cst_191 {dimension_numbers = #tpu.dot_dimension_numbers<[1], [1], [0], [0], [0, 0, 1, 0], [], []>} : vector<3x64xf32>, vector<3x64xf32>, vector<3x3xf32> -> vector<3x3xf32>
    %cst_192 = arith.constant dense<0xFF800000> : vector<3xf32>
    %510 = vector.multi_reduction <maximumf>, %509, %cst_192 [1] : vector<3x3xf32> to vector<3xf32>
    %511 = vector.shape_cast %510 : vector<3xf32> to vector<3x1xf32>
    %512 = vector.broadcast %511 : vector<3x1xf32> to vector<3x3xf32>
    %513 = arith.subf %509, %512 : vector<3x3xf32>
    %514 = math.exp %513 : vector<3x3xf32>
    %cst_193 = arith.constant dense<0.000000e+00> : vector<3xf32>
    %515 = vector.multi_reduction <add>, %514, %cst_193 [1] : vector<3x3xf32> to vector<3xf32>
    %516 = vector.shape_cast %515 : vector<3xf32> to vector<3x1xf32>
    %517 = tpu.reciprocal %516 {approx = true} : vector<3x1xf32> -> vector<3x1xf32>
    %518 = vector.broadcast %517 : vector<3x1xf32> to vector<3x3xf32>
    %519 = arith.mulf %514, %518 : vector<3x3xf32>
    %520 = vector.broadcast %28 : vector<1x64xf32> to vector<3x64xf32>
    %521 = arith.mulf %446, %520 : vector<3x64xf32>
    %cst_194 = arith.constant dense<0.000000e+00> : vector<3x64xf32>
    %522 = tpu.matmul %519, %521, %cst_194 {dimension_numbers = #tpu.dot_dimension_numbers<[1], [0], [0], [1], [0, 0, 1, 1], [], []>} : vector<3x3xf32>, vector<3x64xf32>, vector<3x64xf32> -> vector<3x64xf32>
    %523 = arith.addf %504, %522 : vector<3x64xf32>
    %524 = arith.addf %436, %523 : vector<3x64xf32>
    %c0_195 = arith.constant 0 : index
    %c0_196 = arith.constant 0 : index
    %525 = vector.load %arg13[%c0_195, %c0_196] : memref<64x64xf32, #tpu.memory_space<vmem>>, vector<64x64xf32>
    %cst_197 = arith.constant dense<0.000000e+00> : vector<3x64xf32>
    %526 = tpu.matmul %524, %525, %cst_197 {dimension_numbers = #tpu.dot_dimension_numbers<[1], [0], [0], [1], [0, 0, 1, 1], [], []>} : vector<3x64xf32>, vector<64x64xf32>, vector<3x64xf32> -> vector<3x64xf32>
    %c0_198 = arith.constant 0 : index
    %c0_199 = arith.constant 0 : index
    %527 = vector.load %arg14[%c0_198, %c0_199] : memref<1x64xf32, #tpu.memory_space<vmem>>, vector<1x64xf32>
    %528 = vector.broadcast %527 : vector<1x64xf32> to vector<3x64xf32>
    %529 = arith.addf %526, %528 : vector<3x64xf32>
    %cst_200 = arith.constant 0.000000e+00 : f32
    %530 = vector.broadcast %cst_200 : f32 to vector<3x64xf32>
    %531 = arith.maximumf %529, %530 : vector<3x64xf32>
    %532 = arith.addf %524, %531 : vector<3x64xf32>
    %c0_201 = arith.constant 0 : index
    %c0_202 = arith.constant 0 : index
    %533 = vector.load %arg18[%c0_201, %c0_202] : memref<64x64xf32, #tpu.memory_space<vmem>>, vector<64x64xf32>
    %cst_203 = arith.constant dense<0.000000e+00> : vector<3x64xf32>
    %534 = tpu.matmul %532, %533, %cst_203 {dimension_numbers = #tpu.dot_dimension_numbers<[1], [0], [0], [1], [0, 0, 1, 1], [], []>} : vector<3x64xf32>, vector<64x64xf32>, vector<3x64xf32> -> vector<3x64xf32>
    %c0_204 = arith.constant 0 : index
    %c0_205 = arith.constant 0 : index
    %535 = vector.load %arg19[%c0_204, %c0_205] : memref<1x64xf32, #tpu.memory_space<vmem>>, vector<1x64xf32>
    %536 = vector.broadcast %535 : vector<1x64xf32> to vector<3x64xf32>
    %537 = arith.addf %534, %536 : vector<3x64xf32>
    %c0_206 = arith.constant 0 : index
    %c0_207 = arith.constant 0 : index
    %538 = vector.load %arg20[%c0_206, %c0_207] : memref<64x64xf32, #tpu.memory_space<vmem>>, vector<64x64xf32>
    %cst_208 = arith.constant dense<0.000000e+00> : vector<3x64xf32>
    %539 = tpu.matmul %532, %538, %cst_208 {dimension_numbers = #tpu.dot_dimension_numbers<[1], [0], [0], [1], [0, 0, 1, 1], [], []>} : vector<3x64xf32>, vector<64x64xf32>, vector<3x64xf32> -> vector<3x64xf32>
    %c0_209 = arith.constant 0 : index
    %c0_210 = arith.constant 0 : index
    %540 = vector.load %arg21[%c0_209, %c0_210] : memref<1x64xf32, #tpu.memory_space<vmem>>, vector<1x64xf32>
    %541 = vector.broadcast %540 : vector<1x64xf32> to vector<3x64xf32>
    %542 = arith.addf %539, %541 : vector<3x64xf32>
    %cst_211 = arith.constant 0.000000e+00 : f32
    %543 = vector.broadcast %cst_211 : f32 to vector<1x64xf32>
    %cst_212 = arith.constant 1.250000e-01 : f32
    %544 = vector.broadcast %cst_212 : f32 to vector<1x64xf32>
    %545 = arith.mulf %7, %544 : vector<1x64xf32>
    %546 = arith.mulf %39, %545 : vector<1x64xf32>
    %cst_213 = arith.constant dense<0.000000e+00> : vector<1x3xf32>
    %547 = tpu.matmul %546, %537, %cst_213 {dimension_numbers = #tpu.dot_dimension_numbers<[1], [1], [0], [0], [0, 0, 1, 0], [], []>} : vector<1x64xf32>, vector<3x64xf32>, vector<1x3xf32> -> vector<1x3xf32>
    %cst_214 = arith.constant dense<0xFF800000> : vector<1xf32>
    %548 = vector.multi_reduction <maximumf>, %547, %cst_214 [1] : vector<1x3xf32> to vector<1xf32>
    %549 = vector.shape_cast %548 : vector<1xf32> to vector<1x1xf32>
    %550 = vector.broadcast %549 : vector<1x1xf32> to vector<1x3xf32>
    %551 = arith.subf %547, %550 : vector<1x3xf32>
    %552 = math.exp %551 : vector<1x3xf32>
    %cst_215 = arith.constant dense<0.000000e+00> : vector<1xf32>
    %553 = vector.multi_reduction <add>, %552, %cst_215 [1] : vector<1x3xf32> to vector<1xf32>
    %554 = vector.shape_cast %553 : vector<1xf32> to vector<1x1xf32>
    %555 = tpu.reciprocal %554 {approx = true} : vector<1x1xf32> -> vector<1x1xf32>
    %556 = vector.broadcast %555 : vector<1x1xf32> to vector<1x3xf32>
    %557 = arith.mulf %552, %556 : vector<1x3xf32>
    %558 = vector.broadcast %7 : vector<1x64xf32> to vector<3x64xf32>
    %559 = arith.mulf %542, %558 : vector<3x64xf32>
    %cst_216 = arith.constant dense<0.000000e+00> : vector<1x64xf32>
    %560 = tpu.matmul %557, %559, %cst_216 {dimension_numbers = #tpu.dot_dimension_numbers<[1], [0], [0], [1], [0, 0, 1, 1], [], []>} : vector<1x3xf32>, vector<3x64xf32>, vector<1x64xf32> -> vector<1x64xf32>
    %561 = arith.addf %543, %560 : vector<1x64xf32>
    %cst_217 = arith.constant 1.250000e-01 : f32
    %562 = vector.broadcast %cst_217 : f32 to vector<1x64xf32>
    %563 = arith.mulf %14, %562 : vector<1x64xf32>
    %564 = arith.mulf %39, %563 : vector<1x64xf32>
    %cst_218 = arith.constant dense<0.000000e+00> : vector<1x3xf32>
    %565 = tpu.matmul %564, %537, %cst_218 {dimension_numbers = #tpu.dot_dimension_numbers<[1], [1], [0], [0], [0, 0, 1, 0], [], []>} : vector<1x64xf32>, vector<3x64xf32>, vector<1x3xf32> -> vector<1x3xf32>
    %cst_219 = arith.constant dense<0xFF800000> : vector<1xf32>
    %566 = vector.multi_reduction <maximumf>, %565, %cst_219 [1] : vector<1x3xf32> to vector<1xf32>
    %567 = vector.shape_cast %566 : vector<1xf32> to vector<1x1xf32>
    %568 = vector.broadcast %567 : vector<1x1xf32> to vector<1x3xf32>
    %569 = arith.subf %565, %568 : vector<1x3xf32>
    %570 = math.exp %569 : vector<1x3xf32>
    %cst_220 = arith.constant dense<0.000000e+00> : vector<1xf32>
    %571 = vector.multi_reduction <add>, %570, %cst_220 [1] : vector<1x3xf32> to vector<1xf32>
    %572 = vector.shape_cast %571 : vector<1xf32> to vector<1x1xf32>
    %573 = tpu.reciprocal %572 {approx = true} : vector<1x1xf32> -> vector<1x1xf32>
    %574 = vector.broadcast %573 : vector<1x1xf32> to vector<1x3xf32>
    %575 = arith.mulf %570, %574 : vector<1x3xf32>
    %576 = vector.broadcast %14 : vector<1x64xf32> to vector<3x64xf32>
    %577 = arith.mulf %542, %576 : vector<3x64xf32>
    %cst_221 = arith.constant dense<0.000000e+00> : vector<1x64xf32>
    %578 = tpu.matmul %575, %577, %cst_221 {dimension_numbers = #tpu.dot_dimension_numbers<[1], [0], [0], [1], [0, 0, 1, 1], [], []>} : vector<1x3xf32>, vector<3x64xf32>, vector<1x64xf32> -> vector<1x64xf32>
    %579 = arith.addf %561, %578 : vector<1x64xf32>
    %cst_222 = arith.constant 1.250000e-01 : f32
    %580 = vector.broadcast %cst_222 : f32 to vector<1x64xf32>
    %581 = arith.mulf %21, %580 : vector<1x64xf32>
    %582 = arith.mulf %39, %581 : vector<1x64xf32>
    %cst_223 = arith.constant dense<0.000000e+00> : vector<1x3xf32>
    %583 = tpu.matmul %582, %537, %cst_223 {dimension_numbers = #tpu.dot_dimension_numbers<[1], [1], [0], [0], [0, 0, 1, 0], [], []>} : vector<1x64xf32>, vector<3x64xf32>, vector<1x3xf32> -> vector<1x3xf32>
    %cst_224 = arith.constant dense<0xFF800000> : vector<1xf32>
    %584 = vector.multi_reduction <maximumf>, %583, %cst_224 [1] : vector<1x3xf32> to vector<1xf32>
    %585 = vector.shape_cast %584 : vector<1xf32> to vector<1x1xf32>
    %586 = vector.broadcast %585 : vector<1x1xf32> to vector<1x3xf32>
    %587 = arith.subf %583, %586 : vector<1x3xf32>
    %588 = math.exp %587 : vector<1x3xf32>
    %cst_225 = arith.constant dense<0.000000e+00> : vector<1xf32>
    %589 = vector.multi_reduction <add>, %588, %cst_225 [1] : vector<1x3xf32> to vector<1xf32>
    %590 = vector.shape_cast %589 : vector<1xf32> to vector<1x1xf32>
    %591 = tpu.reciprocal %590 {approx = true} : vector<1x1xf32> -> vector<1x1xf32>
    %592 = vector.broadcast %591 : vector<1x1xf32> to vector<1x3xf32>
    %593 = arith.mulf %588, %592 : vector<1x3xf32>
    %594 = vector.broadcast %21 : vector<1x64xf32> to vector<3x64xf32>
    %595 = arith.mulf %542, %594 : vector<3x64xf32>
    %cst_226 = arith.constant dense<0.000000e+00> : vector<1x64xf32>
    %596 = tpu.matmul %593, %595, %cst_226 {dimension_numbers = #tpu.dot_dimension_numbers<[1], [0], [0], [1], [0, 0, 1, 1], [], []>} : vector<1x3xf32>, vector<3x64xf32>, vector<1x64xf32> -> vector<1x64xf32>
    %597 = arith.addf %579, %596 : vector<1x64xf32>
    %cst_227 = arith.constant 1.250000e-01 : f32
    %598 = vector.broadcast %cst_227 : f32 to vector<1x64xf32>
    %599 = arith.mulf %28, %598 : vector<1x64xf32>
    %600 = arith.mulf %39, %599 : vector<1x64xf32>
    %cst_228 = arith.constant dense<0.000000e+00> : vector<1x3xf32>
    %601 = tpu.matmul %600, %537, %cst_228 {dimension_numbers = #tpu.dot_dimension_numbers<[1], [1], [0], [0], [0, 0, 1, 0], [], []>} : vector<1x64xf32>, vector<3x64xf32>, vector<1x3xf32> -> vector<1x3xf32>
    %cst_229 = arith.constant dense<0xFF800000> : vector<1xf32>
    %602 = vector.multi_reduction <maximumf>, %601, %cst_229 [1] : vector<1x3xf32> to vector<1xf32>
    %603 = vector.shape_cast %602 : vector<1xf32> to vector<1x1xf32>
    %604 = vector.broadcast %603 : vector<1x1xf32> to vector<1x3xf32>
    %605 = arith.subf %601, %604 : vector<1x3xf32>
    %606 = math.exp %605 : vector<1x3xf32>
    %cst_230 = arith.constant dense<0.000000e+00> : vector<1xf32>
    %607 = vector.multi_reduction <add>, %606, %cst_230 [1] : vector<1x3xf32> to vector<1xf32>
    %608 = vector.shape_cast %607 : vector<1xf32> to vector<1x1xf32>
    %609 = tpu.reciprocal %608 {approx = true} : vector<1x1xf32> -> vector<1x1xf32>
    %610 = vector.broadcast %609 : vector<1x1xf32> to vector<1x3xf32>
    %611 = arith.mulf %606, %610 : vector<1x3xf32>
    %612 = vector.broadcast %28 : vector<1x64xf32> to vector<3x64xf32>
    %613 = arith.mulf %542, %612 : vector<3x64xf32>
    %cst_231 = arith.constant dense<0.000000e+00> : vector<1x64xf32>
    %614 = tpu.matmul %611, %613, %cst_231 {dimension_numbers = #tpu.dot_dimension_numbers<[1], [0], [0], [1], [0, 0, 1, 1], [], []>} : vector<1x3xf32>, vector<3x64xf32>, vector<1x64xf32> -> vector<1x64xf32>
    %615 = arith.addf %597, %614 : vector<1x64xf32>
    %616 = arith.addf %39, %615 : vector<1x64xf32>
    %c0_232 = arith.constant 0 : index
    %c0_233 = arith.constant 0 : index
    %617 = vector.load %arg22[%c0_232, %c0_233] : memref<64x64xf32, #tpu.memory_space<vmem>>, vector<64x64xf32>
    %cst_234 = arith.constant dense<0.000000e+00> : vector<1x64xf32>
    %618 = tpu.matmul %616, %617, %cst_234 {dimension_numbers = #tpu.dot_dimension_numbers<[1], [0], [0], [1], [0, 0, 1, 1], [], []>} : vector<1x64xf32>, vector<64x64xf32>, vector<1x64xf32> -> vector<1x64xf32>
    %c0_235 = arith.constant 0 : index
    %c0_236 = arith.constant 0 : index
    %619 = vector.load %arg23[%c0_235, %c0_236] : memref<1x64xf32, #tpu.memory_space<vmem>>, vector<1x64xf32>
    %620 = arith.addf %618, %619 : vector<1x64xf32>
    %cst_237 = arith.constant 0.000000e+00 : f32
    %621 = vector.broadcast %cst_237 : f32 to vector<1x64xf32>
    %622 = arith.maximumf %620, %621 : vector<1x64xf32>
    %623 = arith.addf %616, %622 : vector<1x64xf32>
    %624 = tpu.concatenate %331, %623 in 0 : vector<1x64xf32>, vector<1x64xf32> -> vector<2x64xf32>
    %c0_238 = arith.constant 0 : index
    %c0_239 = arith.constant 0 : index
    %625 = vector.load %arg24[%c0_238, %c0_239] : memref<64x32xf32, #tpu.memory_space<vmem>>, vector<64x32xf32>
    %cst_240 = arith.constant dense<0.000000e+00> : vector<2x32xf32>
    %626 = tpu.matmul %624, %625, %cst_240 {dimension_numbers = #tpu.dot_dimension_numbers<[1], [0], [0], [1], [0, 0, 1, 1], [], []>} : vector<2x64xf32>, vector<64x32xf32>, vector<2x32xf32> -> vector<2x32xf32>
    %c0_241 = arith.constant 0 : index
    %c0_242 = arith.constant 0 : index
    %627 = vector.load %arg25[%c0_241, %c0_242] : memref<1x32xf32, #tpu.memory_space<vmem>>, vector<1x32xf32>
    %628 = vector.broadcast %627 : vector<1x32xf32> to vector<2x32xf32>
    %629 = arith.addf %626, %628 : vector<2x32xf32>
    %c0_243 = arith.constant 0 : index
    %c0_244 = arith.constant 0 : index
    %630 = vector.load %arg26[%c0_243, %c0_244] : memref<32x16xf32, #tpu.memory_space<vmem>>, vector<32x16xf32>
    %cst_245 = arith.constant dense<0.000000e+00> : vector<2x16xf32>
    %631 = tpu.matmul %629, %630, %cst_245 {dimension_numbers = #tpu.dot_dimension_numbers<[1], [0], [0], [1], [0, 0, 1, 1], [], []>} : vector<2x32xf32>, vector<32x16xf32>, vector<2x16xf32> -> vector<2x16xf32>
    %c0_246 = arith.constant 0 : index
    %c0_247 = arith.constant 0 : index
    %632 = vector.load %arg27[%c0_246, %c0_247] : memref<1x16xf32, #tpu.memory_space<vmem>>, vector<1x16xf32>
    %633 = vector.broadcast %632 : vector<1x16xf32> to vector<2x16xf32>
    %634 = arith.addf %631, %633 : vector<2x16xf32>
    %cst_248 = arith.constant 0.000000e+00 : f32
    %635 = vector.broadcast %cst_248 : f32 to vector<2x16xf32>
    %636 = arith.maximumf %634, %635 : vector<2x16xf32>
    %c0_249 = arith.constant 0 : index
    %c0_250 = arith.constant 0 : index
    %637 = vector.load %arg28[%c0_249, %c0_250] : memref<16x2xf32, #tpu.memory_space<vmem>>, vector<16x2xf32>
    %cst_251 = arith.constant dense<0.000000e+00> : vector<2x2xf32>
    %638 = tpu.matmul %636, %637, %cst_251 {dimension_numbers = #tpu.dot_dimension_numbers<[1], [0], [0], [1], [0, 0, 1, 1], [], []>} : vector<2x16xf32>, vector<16x2xf32>, vector<2x2xf32> -> vector<2x2xf32>
    %c0_252 = arith.constant 0 : index
    %c0_253 = arith.constant 0 : index
    %639 = vector.load %arg29[%c0_252, %c0_253] : memref<1x2xf32, #tpu.memory_space<vmem>>, vector<1x2xf32>
    %640 = vector.broadcast %639 : vector<1x2xf32> to vector<2x2xf32>
    %641 = arith.addf %638, %640 : vector<2x2xf32>
    %cst_254 = arith.constant dense<0xFF800000> : vector<2xf32>
    %642 = vector.multi_reduction <maximumf>, %641, %cst_254 [1] : vector<2x2xf32> to vector<2xf32>
    %643 = vector.shape_cast %642 : vector<2xf32> to vector<2x1xf32>
    %644 = vector.broadcast %643 : vector<2x1xf32> to vector<2x2xf32>
    %645 = arith.subf %641, %644 : vector<2x2xf32>
    %646 = math.exp %645 : vector<2x2xf32>
    %cst_255 = arith.constant dense<0.000000e+00> : vector<2xf32>
    %647 = vector.multi_reduction <add>, %646, %cst_255 [1] : vector<2x2xf32> to vector<2xf32>
    %648 = vector.shape_cast %647 : vector<2xf32> to vector<2x1xf32>
    %649 = math.log %648 : vector<2x1xf32>
    %650 = vector.broadcast %649 : vector<2x1xf32> to vector<2x2xf32>
    %651 = arith.subf %645, %650 : vector<2x2xf32>
    %c0_256 = arith.constant 0 : index
    %c0_257 = arith.constant 0 : index
    %652 = vector.load %arg30[%c0_256, %c0_257] : memref<2x2xf32, #tpu.memory_space<vmem>>, vector<2x2xf32>
    tpu.vector_store %arg30[%c0_256, %c0_257], %651 {strides = array<i32>} : memref<2x2xf32, #tpu.memory_space<vmem>>, vector<2x2xf32>,
    return
  }
}

</mosaic_0001>

<bundles_post_ra>
// kernel: net_forward.2
= control target key start
LH: loop header
LB: loop body
LE: loop exit
PB: predicated region body
PF: predicated region fallthrough
CT: control target
= control target key end

     0   :  { %vm59_vm0 = vcmask 1042432   ;;  %vm52_vm1 = vcmask 23552   ;;  %vm145_vm2 = vcmask 97280   ;;  %vm152_vm3 = vcmask 1043456   ;;  %s1556_s2 = inlined_call_operand.vmem [shape: f32[3,32], index: 2, kind: input, shape index: {}]   ;;  %s1557_s1 = inlined_call_operand.vmem [shape: f32[12,3], index: 1, kind: input, shape index: {}]   ;;  %s1558_s0 = inlined_call_operand.vmem [shape: f32[12,12], index: 0, kind: input, shape index: {}]   ;;  %s1559_s4 = inlined_call_operand.vmem [shape: f32[32,32], index: 4, kind: input, shape index: {}]   ;;  %s1560_s3 = inlined_call_operand.vmem [shape: f32[1,32], index: 3, kind: input, shape index: {}]   ;;  %s1561_s6 = inlined_call_operand.vmem [shape: f32[32,32], index: 6, kind: input, shape index: {}]   ;;  %s1562_s5 = inlined_call_operand.vmem [shape: f32[1,32], index: 5, kind: input, shape index: {}]   ;;  %s1563_s9 = inlined_call_operand.vmem [shape: f32[32,64], index: 9, kind: input, shape index: {}]   ;;  %s1564_s8 = inlined_call_operand.vmem [shape: f32[32,64], index: 8, kind: input, shape index: {}]   ;;  %s1565_s10 = inlined_call_operand.vmem [shape: f32[32,64], index: 10, kind: input, shape index: {}]   ;;  %s1566_s12 = inlined_call_operand.vmem [shape: f32[64,128], index: 12, kind: input, shape index: {}]   ;;  %s1567_s7 = inlined_call_operand.vmem [shape: f32[1,32], index: 7, kind: input, shape index: {}]   ;;  %s1568_s11 = inlined_call_operand.vmem [shape: f32[1,64], index: 11, kind: input, shape index: {}]   ;;  %s1569_s13 = inlined_call_operand.vmem [shape: f32[1,128], index: 13, kind: input, shape index: {}]   ;;  %s1570_s14 = inlined_call_operand.vmem [shape: f32[12,128], index: 14, kind: output, shape index: {}]  }
   0x1   :  { %v51_v0 = vld [vmem:[%s1556_s2] sm:$0x7]  ;;  %v50_v2 = vld [vmem:[%s1557_s1 + $0x8] sm:$0xf]  ;;  %vm1296_vm4 = vmmov 1   ;;  %v235_v12 = vld [vmem:[%s1559_s4 + $0x10] sm:$0xff] }
   0x2   :  { %v49_v1 = vld [vmem:[%s1557_s1] sm:$0xff]  ;;  %1104 = vmatprep.subr.msk.mxu0 %vm59_vm0, %v51_v0  ;;  %v234_v5 = vld [vmem:[%s1559_s4 + $0x8] sm:$0xff]  ;;  %vm1394_vm5 = vmpackc.low %vm152_vm3, %vm1296_vm4  ;;  %vm237_vm6 = vcmask 261120   ;;  %vm840_vm7 = vcmask 523264  }
   0x3   :  { %1106 = vmatprep.mubr.msk.f32.mxu0 %vm52_vm1, %v49_v1  ;;  %1105 = vmatpush3.msk.msra.mxu0 %vm59_vm0, %v51_v0  ;;  %v1384_v3 = vld [vmem:[%s1558_s0] sm:$0xff]  ;;  %v1405_v11 = vld [vmem:[%s1558_s0 + $0x8] sm:$0xf]  ;;  %v236_v13 = vld [vmem:[%s1559_s4 + $0x18] sm:$0xff] }
   0x4   :  { %1107 = vmatmul.mubr.msk.f32.vlgmr.msra.gmra.mrb[0].mxu0 %vm52_vm1, %v50_v2  ;;  %1113 = vmatprep.mubr.msk.f32.mxu1 %vm145_vm2, %v1384_v3  ;;  %v233_v4 = vld [vmem:[%s1559_s4] sm:$0xff]  ;;  %v1221_v14 = vpack.c.bf16 %v236_v13, %v235_v12  ;;  %v407_v23 = vld [vmem:[%s1561_s6 + $0x8] sm:$0xff]  ;;  %v408_v28 = vld [vmem:[%s1561_s6 + $0x10] sm:$0xff] }
   0x5   :  { %v1217_v6 = vpack.c.bf16 %v234_v5, %v233_v4  ;;  %v1016_v15 = vld [vmem:[%s1560_s3] ss:$0 sm:$0xff]  ;;  %v409_v29 = vld [vmem:[%s1561_s6 + $0x18] sm:$0xff]  ;;  %v583_v39 = vld [vmem:[%s1563_s9 + $0x8] sm:$0xff] }
   0x6   :  { %v406_v22 = vld [vmem:[%s1561_s6] sm:$0xff]  ;;  %v1235_v30 = vpack.c.bf16 %v409_v29, %v408_v28  ;;  %v584_v44 = vld [vmem:[%s1563_s9 + $0x10] sm:$0xff]  ;;  %v585_v45 = vld [vmem:[%s1563_s9 + $0x18] sm:$0xff] }
   0x7   :  { %1218 = vmatprep.subr.bf16.mxu0 %v1217_v6  ;;  %v1231_v27 = vpack.c.bf16 %v407_v23, %v406_v22  ;;  %v1022_v31 = vld [vmem:[%s1562_s5] ss:$0 sm:$0xff]  ;;  %v1249_v46 = vpack.c.bf16 %v585_v45, %v584_v44  ;;  %v579_v48 = vld [vmem:[%s1564_s8 + $0x8] sm:$0xff]  ;;  %v580_v50 = vld [vmem:[%s1564_s8 + $0x10] sm:$0xff] }
   0x8   :  { %1220 = vmatpush3.bf16.msra.mxu0 %v1217_v6  ;;  %v582_v38 = vld [vmem:[%s1563_s9] sm:$0xff]  ;;  %v581_v51 = vld [vmem:[%s1564_s8 + $0x18] sm:$0xff]  ;;  %v737_v54 = vld [vmem:[%s1565_s10 + $0x8] sm:$0xff] }
   0x9   :  { %1222 = vmatprep.subr.bf16.mxu0 %v1221_v14  ;;  %v1245_v43 = vpack.c.bf16 %v583_v39, %v582_v38  ;;  %v578_v47 = vld [vmem:[%s1564_s8] sm:$0xff]  ;;  %v1257_v52 = vpack.c.bf16 %v581_v51, %v580_v50  ;;  %v738_v56 = vld [vmem:[%s1565_s10 + $0x10] sm:$0xff]  ;;  %v739_v57 = vld [vmem:[%s1565_s10 + $0x18] sm:$0xff] }
   0xa   :  { %v1253_v49 = vpack.c.bf16 %v579_v48, %v578_v47  ;;  %v736_v53 = vld [vmem:[%s1565_s10] sm:$0xff]  ;;  %v1265_v58 = vpack.c.bf16 %v739_v57, %v738_v56  ;;  %v833_v60 = vld [vmem:[%s1566_s12 + $0x8] sm:$0xff]  ;;  %v834_v61 = vld [vmem:[%s1566_s12 + $0x10] sm:$0xff] }
   0xb   :  { %v1261_v55 = vpack.c.bf16 %v737_v54, %v736_v53  ;;  %v832_v59 = vld [vmem:[%s1566_s12] sm:$0xff]  ;;  %v835_v63 = vld [vmem:[%s1566_s12 + $0x18] sm:$0xff]  ;;  %v837_v2 = vld [vmem:[%s1566_s12 + $0x28] sm:$0xff] }
   0xc   :  { %1224 = vmatpush3.bf16.msra.mxu0 %v1221_v14  ;;  %v1269_v62 = vpack.c.bf16 %v833_v60, %v832_v59  ;;  %v1273_v0 = vpack.c.bf16 %v835_v63, %v834_v61  ;;  %v836_v1 = vld [vmem:[%s1566_s12 + $0x20] sm:$0xff]  ;;  %v838_v14 = vld [vmem:[%s1566_s12 + $0x30] sm:$0xff] }
   0xd   :  { %v1277_v4 = vpack.c.bf16 %v837_v2, %v836_v1  ;;  %v1028_v5 = vld [vmem:[%s1567_s7] ss:$0 sm:$0xff] }
  0xd7   :  { %v1108_v7 = vpop.f32.mrb[0].mxu0 }
  0xd8   :  { %v129_v8 = vpop.f32.mrb[1].mxu0 }
  0xd9   :  { %v1211_v10 = vpack.c.bf16 %v1108_v7, %v129_v8 }
  0xdb   :  { %1213 = vmatprep.subr.msk.bf16.mxu1 %vm1394_vm5, %v1211_v10 }
  0xdc   :  { %1216 = vmatpush3.bf16.msk.msra.mxu1 %vm1394_vm5, %v1211_v10 }
  0xdf   :  { %1114 = vmatmul.mubr.msk.f32.vlgmr.msra.gmra.mrb[0].mxu1 %vm145_vm2, %v1405_v11 }
  0xe0   :  { %1131 = vmatprep.mubr.msk.f32.mxu1 %vm145_vm2, %v1384_v3 }
 0x1b2   :  { %v1115_v16 = vpop.f32.mrb[0].mxu1 }
 0x1b3   :  { %v1420_v17 = vadd.f32 %v1115_v16, %v1016_v15  ;;  %v222_v18 = vpop.f32.mrb[1].mxu1 }
 0x1b4   :  { %v1422_v19 = vadd.f32 %v1016_v15, %v222_v18  ;;  %v839_v15 = vld [vmem:[%s1566_s12 + $0x38] sm:$0xff] }
 0x1b5   :  { %v232_v21 = vmax.f32 %v1420_v17, 0.0  ;;  %v1281_v16 = vpack.c.bf16 %v839_v15, %v838_v14  ;;  %v1038_v17 = vld [vmem:[%s1568_s11] ss:$0 sm:$0xff] }
 0x1b6   :  { %v231_v20 = vmax.f32 %v1422_v19, 0.0 }
 0x1b8   :  { %1124 = vmatprep.mubr.msk.f32.mxu0 %vm237_vm6, %v231_v20 }
 0x1b9   :  { %1125 = vmatmul.mubr.msk.f32.vlgmr.msra.gmra.mrb[2].mxu0 %vm237_vm6, %v232_v21 }
 0x1ba   :  { %1149 = vmatprep.mubr.msk.f32.mxu0 %vm145_vm2, %v1384_v3 }
 0x28c   :  { %v1126_v24 = vpop.f32.mrb[2].mxu0 }
 0x28d   :  { %v310_v25 = vpop.f32.mrb[3].mxu0 }
 0x28e   :  { %v1225_v26 = vpack.c.bf16 %v1126_v24, %v310_v25  ;;  %v1041_v25 = vld [vmem:[%s1569_s13] ss:$0 sm:$0xff] }
 0x290   :  { %1227 = vmatprep.subr.msk.bf16.mxu1 %vm1394_vm5, %v1225_v26 }
 0x291   :  { %1230 = vmatpush3.bf16.msk.msra.mxu1 %vm1394_vm5, %v1225_v26 }
 0x292   :  { %1232 = vmatprep.subr.bf16.mxu1 %v1231_v27 }
 0x294   :  { %1132 = vmatmul.mubr.msk.f32.vlgmr.msra.gmra.mrb[2].mxu1 %vm145_vm2, %v1405_v11 }
 0x295   :  { %1234 = vmatpush3.bf16.msra.mxu1 %v1231_v27 }
 0x296   :  { %1236 = vmatprep.subr.bf16.mxu1 %v1235_v30 }
 0x299   :  { %1238 = vmatpush3.bf16.msra.mxu1 %v1235_v30 }
 0x29a   :  { %1270 = vmatprep.subr.bf16.mxu1 %v1269_v62 }
 0x367   :  { %v1133_v32 = vpop.f32.mrb[2].mxu1 }
 0x368   :  { %v401_v33 = vadd.f32 %v1133_v32, %v1022_v31  ;;  %v395_v34 = vpop.f32.mrb[3].mxu1 }
 0x369   :  { %v396_v35 = vadd.f32 %v1022_v31, %v395_v34 }
 0x36a   :  { %v405_v37 = vmax.f32 %v401_v33, 0.0 }
 0x36b   :  { %v404_v36 = vmax.f32 %v396_v35, 0.0 }
 0x36d   :  { %1142 = vmatprep.mubr.msk.f32.mxu1 %vm237_vm6, %v404_v36 }
 0x36e   :  { %1143 = vmatmul.mubr.msk.f32.vlgmr.msra.gmra.mrb[4].mxu1 %vm237_vm6, %v405_v37 }
 0x36f   :  { %1272 = vmatpush3.bf16.msra.mxu1 %v1269_v62 }
 0x370   :  { %1274 = vmatprep.subr.bf16.mxu1 %v1273_v0 }
 0x373   :  { %1276 = vmatpush3.bf16.msra.mxu1 %v1273_v0 }
 0x374   :  { %1278 = vmatprep.subr.bf16.mxu1 %v1277_v4 }
 0x377   :  { %1280 = vmatpush3.bf16.msra.mxu1 %v1277_v4 }
 0x378   :  { %1282 = vmatprep.subr.bf16.mxu1 %v1281_v16 }
 0x37b   :  { %1284 = vmatpush3.bf16.msra.mxu1 %v1281_v16 }
 0x441   :  { %v1144_v40 = vpop.f32.mrb[4].mxu1 }
 0x442   :  { %v482_v41 = vpop.f32.mrb[5].mxu1 }
 0x443   :  { %v1239_v42 = vpack.c.bf16 %v1144_v40, %v482_v41 }
 0x445   :  { %1241 = vmatprep.subr.msk.bf16.mxu0 %vm1394_vm5, %v1239_v42 }
 0x446   :  { %1244 = vmatpush3.bf16.msk.msra.mxu0 %vm1394_vm5, %v1239_v42 }
 0x447   :  { %1246 = vmatprep.subr.bf16.mxu0 %v1245_v43 }
 0x449   :  { %1150 = vmatmul.mubr.msk.f32.vlgmr.msra.gmra.mrb[4].mxu0 %vm145_vm2, %v1405_v11 }
 0x44a   :  { %1248 = vmatpush3.bf16.msra.mxu0 %v1245_v43  ;;  %1160 = vmatprep.mubr.msk.f32.mxu0 %vm237_vm6, %v404_v36 }
 0x44b   :  { %1250 = vmatprep.subr.bf16.mxu0 %v1249_v46 }
 0x44e   :  { %1252 = vmatpush3.bf16.msra.mxu0 %v1249_v46 }
 0x44f   :  { %1254 = vmatprep.subr.bf16.mxu0 %v1253_v49 }
 0x451   :  { %1161 = vmatmul.mubr.msk.f32.vlgmr.msra.gmra.mrb[6].mxu0 %vm237_vm6, %v405_v37 }
 0x452   :  { %1256 = vmatpush3.bf16.msra.mxu0 %v1253_v49  ;;  %1171 = vmatprep.mubr.msk.f32.mxu0 %vm237_vm6, %v231_v20 }
 0x453   :  { %1258 = vmatprep.subr.bf16.mxu0 %v1257_v52 }
 0x456   :  { %1260 = vmatpush3.bf16.msra.mxu0 %v1257_v52 }
 0x457   :  { %1262 = vmatprep.subr.bf16.mxu0 %v1261_v55 }
 0x459   :  { %1172 = vmatmul.mubr.msk.f32.vlgmr.msra.gmra.mrb[6].mxu0 %vm237_vm6, %v232_v21 }
 0x45a   :  { %1264 = vmatpush3.bf16.msra.mxu0 %v1261_v55 }
 0x45b   :  { %1266 = vmatprep.subr.bf16.mxu0 %v1265_v58 }
 0x45e   :  { %1268 = vmatpush3.bf16.msra.mxu0 %v1265_v58 }
 0x51c   :  { %v1151_v6 = vpop.f32.mrb[4].mxu0 }
 0x51d   :  { %v573_v7 = vadd.f32 %v1151_v6, %v1028_v5  ;;  %v567_v8 = vpop.f32.mrb[5].mxu0 }
 0x51e   :  { %v568_v10 = vadd.f32 %v1028_v5, %v567_v8 }
 0x51f   :  { %v577_v13 = vmax.f32 %v573_v7, 0.0 }
 0x520   :  { %v576_v12 = vmax.f32 %v568_v10, 0.0 }
 0x522   :  { %1182 = vmatprep.mubr.msk.f32.mxu0 %vm237_vm6, %v576_v12 }
 0x523   :  { %1183 = vmatmul.mubr.msk.f32.vlgmr.msra.gmra.mrb[6].mxu0 %vm237_vm6, %v577_v13 }
 0x5f6   :  { %v1184_v18 = vpop.f32.mrb[6].mxu0 }
 0x5f7   :  { %v812_v19 = vpop.f32.mrb[7].mxu0  ;;  %v831_v21 = vadd.f32 %v1184_v18, %v1038_v17 }
 0x5f8   :  { %v830_v20 = vadd.f32 %v1038_v17, %v812_v19 }
 0x5fa   :  { %1201 = vmatprep.mubr.msk.f32.mxu1 %vm840_vm7, %v830_v20 }
 0x5fb   :  { %1202 = vmatmul.mubr.msk.f32.vlgmr.msra.gmra.mrb[6].mxu1 %vm840_vm7, %v831_v21 }
 0x5fc   :  { %1208 = vmatprep.mubr.msk.f32.mxu1 %vm145_vm2, %v1384_v3 }
 0x6ce   :  { %v1203_v22 = vpop.f32.mrb[6].mxu1 }
 0x6cf   :  { %v913_v23 = vpop.f32.mrb[7].mxu1 }
 0x6d0   :  { %v1285_v24 = vpack.c.bf16 %v1203_v22, %v913_v23 }
 0x6d2   :  { %1287 = vmatprep.subr.msk.bf16.mxu1 %vm1394_vm5, %v1285_v24 }
 0x6d3   :  { %1290 = vmatpush3.bf16.msk.msra.mxu1 %vm1394_vm5, %v1285_v24 }
 0x6d6   :  { %1209 = vmatmul.mubr.msk.f32.vlgmr.msra.gmra.mrb[8].mxu1 %vm145_vm2, %v1405_v11 }
 0x7a9   :  { %v1210_v26 = vpop.f32.mrb[8].mxu1 }
 0x7aa   :  { %v1004_v27 = vadd.f32 %v1210_v26, %v1041_v25  ;;  %v998_v28 = vpop.f32.mrb[9].mxu1 }
 0x7ab   :  { %v999_v3 = vadd.f32 %v1041_v25, %v998_v28 }
 0x7ac   :  { %1008 = vst [vmem:[%s1570_s14 + $0x8] sm:$0xf] %v1004_v27 }
 0x7ad   :  { %1007 = vst [vmem:[%s1570_s14] sm:$0xff] %v999_v3 }

// kernel: net_forward.3
= control target key start
LH: loop header
LB: loop body
LE: loop exit
PB: predicated region body
PF: predicated region fallthrough
CT: control target
= control target key end

     0   :  { %s7339_s6 = smov 1   ;;  %s7340_s10 = smov 2   ;;  %s8434_s0 = inlined_call_operand.smem [shape: u32[31], index: -1, kind: input, shape index: {}] }
   0x1   :  { %s7383_s5 = sld [smem:[%s8434_s0]]   ;;  %s7341_s14 = smov 3  }
   0x2   :  { %s7388_s9 = sld [smem:[%s8434_s0 + %s7339_s6]]   ;;  %s7342_s18 = smov 4  }
   0x3   :  { %s7393_s13 = sld [smem:[%s8434_s0 + %s7340_s10]]   ;;  %s7343_s22 = smov 5  }
   0x4   :  { %s7398_s17 = sld [smem:[%s8434_s0 + %s7341_s14]]   ;;  %s7344_s26 = smov 6  }
   0x5   :  { %s7403_s21 = sld [smem:[%s8434_s0 + %s7342_s18]]   ;;  %s7345_s30 = smov 7  }
   0x6   :  { %s7408_s25 = sld [smem:[%s8434_s0 + %s7343_s22]]   ;;  %s7346_s4 = smov 8  }
   0x7   :  { %s7413_s29 = sld [smem:[%s8434_s0 + %s7344_s26]]   ;;  %s7347_s10 = smov 9  }
   0x8   :  { %s7418_s3 = sld [smem:[%s8434_s0 + %s7345_s30]]   ;;  %s7348_s15 = smov 10  }
   0x9   :  { %s7423_s8 = sld [smem:[%s8434_s0 + %s7346_s4]]   ;;  %s7349_s20 = smov 11  }
   0xa   :  { %s7428_s14 = sld [smem:[%s8434_s0 + %s7347_s10]]   ;;  %s7350_s26 = smov 12  }
   0xb   :  { %s7433_s19 = sld [smem:[%s8434_s0 + %s7348_s15]]   ;;  %s7351_s1 = smov 13  }
   0xc   :  { %s7438_s24 = sld [smem:[%s8434_s0 + %s7349_s20]]   ;;  %s7352_s7 = smov 14  }
   0xd   :  { %s7443_s30 = sld [smem:[%s8434_s0 + %s7350_s26]]   ;;  %s7353_s15 = smov 15  }
   0xe   :  { %s7448_s6 = sld [smem:[%s8434_s0 + %s7351_s1]]   ;;  %s7354_s22 = smov 16  }
   0xf   :  { %s7453_s12 = sld [smem:[%s8434_s0 + %s7352_s7]]   ;;  %s7355_s28 = smov 17  }
  0x10   :  { %s7458_s20 = sld [smem:[%s8434_s0 + %s7353_s15]]   ;;  %s7356_s7 = smov 18  }
  0x11   :  { %s7463_s27 = sld [smem:[%s8434_s0 + %s7354_s22]]   ;;  %s7357_s15 = smov 19  }
  0x12   :  { %s7468_s4 = sld [smem:[%s8434_s0 + %s7355_s28]]   ;;  %s7358_s22 = smov 20  }
  0x13   :  { %8454 = sst [smem:[#allocation8_spill]] %s7443_s30  ;;  %s7359_s28 = smov 21  }
  0x14   :  { %8455 = sst [smem:[#allocation9_spill]] %s7448_s6  ;;  %s7368_s10 = smov 30  }
  0x15   :  { %8456 = sst [smem:[#allocation10_spill]] %s7453_s12 }
  0x16   :  { %s7473_s12 = sld [smem:[%s8434_s0 + %s7356_s7]]   ;;  %s7360_s7 = smov 22  }
  0x17   :  { %s7478_s6 = sld [smem:[%s8434_s0 + %s7357_s15]]   ;;  %s7361_s15 = smov 23  }
  0x18   :  { %8457 = sst [smem:[#allocation11_spill]] %s7468_s4 }
  0x19   :  { %s7483_s30 = sld [smem:[%s8434_s0 + %s7358_s22]]   ;;  %s7362_s22 = smov 24  }
  0x1a   :  { %s7488_s4 = sld [smem:[%s8434_s0 + %s7359_s28]]   ;;  %s7363_s28 = smov 25  }
  0x1c   :  { %8458 = sst [smem:[#allocation12_spill]] %s7473_s12 }
  0x1d   :  { %8459 = sst [smem:[#allocation13_spill]] %s7478_s6 }
  0x1e   :  { %s7493_s12 = sld [smem:[%s8434_s0 + %s7360_s7]]   ;;  %s7364_s7 = smov 26  }
  0x1f   :  { %8460 = sst [smem:[#allocation14_spill]] %s7483_s30 }
  0x20   :  { %8461 = sst [smem:[#allocation15_spill]] %s7488_s4 }
  0x21   :  { %s7498_s6 = sld [smem:[%s8434_s0 + %s7361_s15]]   ;;  %s7365_s15 = smov 27  }
  0x22   :  { %s7503_s30 = sld [smem:[%s8434_s0 + %s7362_s22]]   ;;  %s7366_s22 = smov 28  }
  0x23   :  { %s7508_s4 = sld [smem:[%s8434_s0 + %s7363_s28]]   ;;  %s7367_s28 = smov 29  }
  0x24   :  { %8462 = sst [smem:[#allocation16_spill]] %s7493_s12 }
  0x25   :  { %s7513_s12 = sld [smem:[%s8434_s0 + %s7364_s7]]  }
  0x27   :  { %8463 = sst [smem:[#allocation17_spill]] %s7498_s6 }
  0x28   :  { %8464 = sst [smem:[#allocation18_spill]] %s7503_s30 }
  0x29   :  { %8465 = sst [smem:[#allocation19_spill]] %s7508_s4 }
  0x2a   :  { %s7518_s6 = sld [smem:[%s8434_s0 + %s7365_s15]]  }
  0x2b   :  { %8466 = sst [smem:[#allocation20_spill]] %s7513_s12 }
  0x2c   :  { %s7523_s30 = sld [smem:[%s8434_s0 + %s7366_s22]]  }
  0x2d   :  { %s5882_s4 = sld [smem:[%s8434_s0 + %s7367_s28]]  }
  0x2e   :  { %s7531_s12 = sld [smem:[%s8434_s0 + %s7368_s10]]  }
  0x2f   :  { %66 = vsyncpa [#allocation3], 0 }
  0x30   :  { %67 = vsyncpa [#allocation4], 0  ;;  %s7369_s15 = smov [#allocation2]  }
  0x31   :  { %s132_s16 = sshll.u32 %s7369_s15, 4  ;;  %s133_s16 = int_to_ptr.vmem [resolvable:$true] %s132_s16 }
  0x33   :  { %s7291_s18 = scalar_lea.hbm %s5882_s4, 16 }
  0x34   :  { %p7292_p0 = scmp.ne.s32.totalorder %s5882_s4, %s7291_s18  ;;  %p7295_p1 = scmp.lt.u32.totalorder %s7291_s18, %s5882_s4 }
  0x36   :  { %p7297_p2 = pnand %p7295_p1, %p7292_p0 }
  0x38   :  { %7300 = shalt.err (!%p7297_p2)
}
  0x39   :  { %s7301_s22 = scalar_lea.vmem %s133_s16, 16  ;;  %s7305_s23 = scalar_lea.vmem %s133_s16, 32 }
  0x3a   :  { %p7302_p3 = scmp.ne.s32.totalorder %s133_s16, %s7301_s22  ;;  %p7306_p4 = scmp.lt.s32.totalorder %s133_s16, %s133_s16 }
  0x3b   :  { %p7307_p5 = scmp.lt.s32.totalorder %s7305_s23, %s7301_s22 }
  0x3d   :  { %p7308_p6 = por %p7307_p5, %p7306_p4 }
  0x3f   :  { %p7309_p7 = pnand %p7308_p6, %p7302_p3 }
  0x41   :  { %7312 = shalt.err (!%p7309_p7)
}
  0x42   :  { %135 = dma.hbm_to_vmem [thread:$0]  %s5882_s4, 16, %s133_s16, [#allocation3]  }
  0x43   :  { %7335 = dma.done.wait [#allocation3], 16  }
  0x44   :  { %7336 = vsyncadd [#allocation3], 4294967280  ;;  %v8442_v0 = vmov 0.0|0.0   ;;  %vm7371_vm0 = vmmov 0   ;;  %v8446_v1 = vmov 0.0   ;;  %v162_v2 = vld [vmem:[%s7398_s17] sm:$0xff]  ;;  %v139_v29 = vlaneseq }
  0x45   :  { %6914 = vmatprep.subr.bf16.mxu0 %v8442_v0  ;;  %6311 = vmatprep.mubr.msk.f32.mxu0 %vm7371_vm0, %v8446_v1  ;;  %v163_v3 = vld [vmem:[%s7398_s17 + $0x8] sm:$0xff]  ;;  %v164_v4 = vld [vmem:[%s7398_s17 + $0x10] sm:$0xff]  ;;  %v165_v6 = vld [vmem:[%s7398_s17 + $0x18] sm:$0xff]  ;;  %vm177_vm1 = vcmask 523264   ;;  %vm420_vm6 = vcmask 51200   ;;  %s7373_s0 = smov 64  }
  0x46   :  { %6926 = vmatprep.subr.bf16.mxu1 %v8442_v0  ;;  %6330 = vmatprep.mubr.msk.f32.mxu1 %vm7371_vm0, %v8446_v1  ;;  %v6915_v5 = vpack.c.bf16 %v163_v3, %v162_v2  ;;  %v6918_v7 = vpack.c.bf16 %v165_v6, %v164_v4  ;;  %v252_v8 = vld [vmem:[%s7463_s27] sm:$0xff]  ;;  %v253_v9 = vld [vmem:[%s7463_s27 + $0x8] sm:$0xff]  ;;  %v254_v10 = vld [vmem:[%s7463_s27 + $0x10] sm:$0xff]  ;;  %v140_v30 = vand.u32 127, %v139_v29  ;;  %vm535_vm10 = vcmask 1046528  }
  0x47   :  { %v166_v11 = vld [vmem:[%s7398_s17 + $0x20] sm:$0xff]  ;;  %v167_v12 = vld [vmem:[%s7398_s17 + $0x28] sm:$0xff]  ;;  %v6927_v13 = vpack.c.bf16 %v253_v9, %v252_v8  ;;  %v255_v14 = vld [vmem:[%s7463_s27 + $0x18] sm:$0xff]  ;;  %vm531_vm14 = vcmask 56320   ;;  %vm1555_vm15 = vcmask 1042432  }
  0x48   :  { %6916 = vmatpush3.bf16.msra.mxu0 %v6915_v5  ;;  %v6930_v15 = vpack.c.bf16 %v255_v14, %v254_v10  ;;  %v6921_v16 = vpack.c.bf16 %v167_v12, %v166_v11  ;;  %v256_v17 = vld [vmem:[%s7463_s27 + $0x20] sm:$0xff]  ;;  %v257_v18 = vld [vmem:[%s7463_s27 + $0x28] sm:$0xff]  ;;  %v168_v19 = vld [vmem:[%s7398_s17 + $0x30] sm:$0xff]  ;;  %vm146_vm2 = vcmp.ge.s32.totalorder %v140_v30, 16  ;;  %vm147_vm3 = vcmp.lt.s32.totalorder %v140_v30, 32 }
  0x49   :  { %6917 = vmatprep.subr.bf16.mxu0 %v8442_v0  ;;  %6928 = vmatpush3.bf16.msra.mxu1 %v6927_v13  ;;  %v169_v20 = vld [vmem:[%s7398_s17 + $0x38] sm:$0xff]  ;;  %v6933_v21 = vpack.c.bf16 %v257_v18, %v256_v17  ;;  %v258_v23 = vld [vmem:[%s7463_s27 + $0x30] sm:$0xff]  ;;  %v161_v26 = vld [vmem:[%s7393_s13] sm:$0x7]  ;;  %vm142_vm4 = vcmp.lt.s32.totalorder %v140_v30, 16  ;;  %vm156_vm7 = vcmp.ge.s32.totalorder %v140_v30, 48 }
  0x4a   :  { %6929 = vmatprep.subr.bf16.mxu1 %v8442_v0  ;;  %v6924_v22 = vpack.c.bf16 %v169_v20, %v168_v19  ;;  %v259_v24 = vld [vmem:[%s7463_s27 + $0x38] sm:$0xff]  ;;  %v251_v27 = vld [vmem:[%s7458_s20] sm:$0x1]  ;;  %vm148_vm5 = vmand %vm146_vm2, %vm147_vm3  ;;  %v7581_v31 = vsel %vm142_vm4, 1.0, %v8446_v1  ;;  %vm157_vm8 = vcmp.lt.s32.totalorder %v140_v30, 64  ;;  %vm151_vm11 = vcmp.ge.s32.totalorder %v140_v30, 32 }
  0x4b   :  { %v6936_v25 = vpack.c.bf16 %v259_v24, %v258_v23  ;;  %v7570_v28 = vld [vmem:[%s7383_s5] sm:$0x7f]  ;;  %v7584_v32 = vsel %vm148_vm5, 1.0, %v8446_v1  ;;  %v7588_v34 = vmul.f32 0.125, %v7581_v31  ;;  %vm158_vm9 = vmand %vm156_vm7, %vm157_vm8  ;;  %vm152_vm12 = vcmp.lt.s32.totalorder %v140_v30, 48  ;;  %s8467_s13 = sld [smem:[#allocation8_spill]] }
  0x4c   :  { %6919 = vmatpush3.bf16.msra.mxu0 %v6918_v7  ;;  %v5888_v33 = vld [vmem:[%s7403_s21] ss:$0 sm:$0xff]  ;;  %v7591_v35 = vmul.f32 0.125, %v7584_v32  ;;  %v7631_v59 = vsel %vm158_vm9, 1.0, %v8446_v1  ;;  %vm153_vm13 = vmand %vm151_vm11, %vm152_vm12  ;;  %vm1452_vm2 = vcmask 18432   ;;  %vm1551_vm3 = vcmask 23552  }
  0x4d   :  { %6920 = vmatprep.subr.bf16.mxu0 %v8442_v0  ;;  %6931 = vmatpush3.bf16.msra.mxu1 %v6930_v15  ;;  %v7614_v43 = vld [vmem:[%s7388_s9] ss:$0 sm:$0xff]  ;;  %v7638_v62 = vsel %vm153_vm13, 1.0, %v8446_v1  ;;  %v7654_v5 = vmul.f32 0.125, %v7631_v59  ;;  %s8468_s17 = sld [smem:[#allocation9_spill]]  ;;  %s8469_s21 = sld [smem:[#allocation12_spill]] }
  0x4e   :  { %6932 = vmatprep.subr.bf16.mxu1 %v8442_v0  ;;  %v7641_v3 = vmul.f32 0.125, %v7638_v62  ;;  %s8476_s20 = sld [smem:[#allocation15_spill]]  ;;  %vm2372_vm4 = vcmask 16384   ;;  %s8483_s27 = sld [smem:[#allocation16_spill]]  ;;  %vm5566_vm5 = vcmask 1040384  }
  0x50   :  { %6922 = vmatpush3.bf16.msra.mxu0 %v6921_v16 }
  0x51   :  { %6923 = vmatprep.subr.bf16.mxu0 %v8442_v0  ;;  %6934 = vmatpush3.bf16.msra.mxu1 %v6933_v21 }
  0x52   :  { %6935 = vmatprep.subr.bf16.mxu1 %v8442_v0 }
  0x54   :  { %6925 = vmatpush3.bf16.msra.mxu0 %v6924_v22 }
  0x55   :  { %6333 = vmatprep.subr.mxu0 %v8446_v1  ;;  %6937 = vmatpush3.bf16.msra.mxu1 %v6936_v25 }
  0x56   :  { %6338 = vmatprep.subr.mxu1 %v8446_v1 }
  0x57   :  { %6312 = vmatmul.mubr.msk.f32.vlgmr.msra.gmra.mrb[0].mxu0 %vm177_vm1, %v161_v26 }
  0x58   :  { %6335 = vmatprep.mubr.msk.f32.mxu0 %vm7371_vm0, %v8446_v1  ;;  %6331 = vmatmul.mubr.msk.f32.vlgmr.msra.gmra.mrb[0].mxu1 %vm177_vm1, %v251_v27 }
  0x59   :  { %6340 = vmatprep.mubr.msk.f32.mxu1 %vm7371_vm0, %v8446_v1 }
  0x5d   :  { %6334 = vmatpush3.xpose.msk.msra.mxu0 %vm177_vm1, %v7570_v28 }
  0x5e   :  { %6339 = vmatpush3.xpose.msk.msra.mxu1 %vm177_vm1, %v7570_v28  ;;  %6343 = vmatprep.subr.mxu0 %v8446_v1 }
  0x5f   :  { %6348 = vmatprep.subr.mxu1 %v8446_v1 }
 0x12a   :  { %v247_v36 = vpop.f32.mrb[0].mxu0 }
 0x12b   :  { %v7593_v37 = vadd.f32 %v5888_v33, %v247_v36  ;;  %v6313_v38 = vpop.f32.mrb[1].mxu0  ;;  %v7611_v41 = vpop.f32.mrb[0].mxu1 }
 0x12c   :  { %v6332_v42 = vpop.f32.mrb[1].mxu1 }
 0x12d   :  { %v7597_v39 = vmul.f32 %v7588_v34, %v7593_v37  ;;  %v7601_v40 = vmul.f32 %v7591_v35, %v7593_v37  ;;  %v7650_v4 = vmul.f32 %v7641_v3, %v7593_v37  ;;  %v7664_v6 = vmul.f32 %v7654_v5, %v7593_v37 }
 0x12f   :  { %6336 = vmatmul.mubr.msk.f32.vlgmr.msra.gmra.mrb[2].mxu0 %vm177_vm1, %v7597_v39  ;;  %6341 = vmatmul.mubr.msk.f32.vlgmr.msra.gmra.mrb[2].mxu1 %vm177_vm1, %v7601_v40 }
 0x130   :  { %6345 = vmatprep.mubr.msk.f32.mxu0 %vm7371_vm0, %v8446_v1  ;;  %6350 = vmatprep.mubr.msk.f32.mxu1 %vm7371_vm0, %v8446_v1 }
 0x202   :  { %v416_v44 = vpop.f32.mrb[2].mxu0  ;;  %v508_v45 = vpop.f32.mrb[2].mxu1 }
 0x203   :  { %v509_v46 = vadd.f32 %v7614_v43, %v508_v45  ;;  %v6337_v47 = vpop.f32.mrb[3].mxu0  ;;  %v6342_v48 = vpop.f32.mrb[3].mxu1  ;;  %v417_v57 = vadd.f32 %v7614_v43, %v416_v44 }
 0x205   :  { %v512_v49 = vsel %vm420_vm6, %v509_v46, -inf  ;;  %v421_v58 = vsel %vm420_vm6, %v417_v57, -inf }
 0x206   :  { %513 = vmax.xlane.f32.xlu0 %v512_v49 }
 0x21c   :  { %524 = vrot.lane.b32.xlu0 %v7584_v32, %s7373_s0 }
 0x293   :  { %v514_v50 = vpop.xlane.xlu0 %513 }
 0x294   :  { %v515_v51 = vsub.f32 %v509_v46, %v514_v50 }
 0x296   :  { %v516_v52 = vmul.f32 1.442695, %v515_v51  ;;  %v1027_v51 = vld [vmem:[%s7408_s25] sm:$0xff] }
 0x297   :  { %v7621_v55 = vpop.permute.xlu0 %524 }
 0x298   :  { %7187 = vpow2.f32 %v516_v52  ;;  %v527_v56 = vmul.f32 %v7621_v55, %v7570_v28  ;;  %v1028_v52 = vld [vmem:[%s7408_s25 + $0x8] sm:$0xff] }
 0x2a2   :  { %v7188_v53 = vpop.eup %7187 }
 0x2a3   :  { %v518_v54 = vsel %vm420_vm6, %v7188_v53, 0.0 }
 0x2a4   :  { %519 = vadd.xlane.f32.xlu1 %v518_v54  ;;  %v7703_v54 = vpack.c.bf16 %v1028_v52, %v1027_v51  ;;  %v1209_v52 = vld [vmem:[%s7428_s14 + $0x20] sm:$0xff] }
 0x2b5   :  { %529 = vrot.lane.b32.xlu1 %v527_v56, %s7373_s0  ;;  %v1030_v56 = vld [vmem:[%s7408_s25 + $0x18] sm:$0xff] }
 0x2d9   :  { %422 = vmax.xlane.f32.xlu1 %v421_v58 }
 0x2ea   :  { %433 = vrot.lane.b32.xlu1 %v7581_v31, %s7373_s0 }
 0x2ee   :  { %943 = vrot.lane.b32.xlu1 %v7631_v59, %s7373_s0 }
 0x331   :  { %v520_v60 = vpop.xlane.xlu1 %519 }
 0x332   :  { %7189 = vrcp.f32 %v520_v60 }
 0x335   :  { %v530_v61 = vpop.permute.xlu1 %529 }
 0x336   :  { %6344 = vmatpush3.msk.msra.mxu0 %vm535_vm10, %v530_v61 }
 0x337   :  { %6353 = vmatprep.subr.mxu0 %v8446_v1 }
 0x33c   :  { %v7190_v63 = vpop.eup %7189 }
 0x33d   :  { %v522_v2 = vmul.f32 %v7190_v63, %v7188_v53  ;;  %v1029_v53 = vld [vmem:[%s7408_s25 + $0x10] sm:$0xff] }
 0x33f   :  { %6346 = vmatmul.mubr.msk.f32.vlgmr.msra.gmra.mrb[4].mxu0 %vm531_vm14, %v522_v2 }
 0x340   :  { %6354 = vmatpush3.xpose.msk.msra.mxu0 %vm177_vm1, %v7570_v28  ;;  %6355 = vmatprep.mubr.msk.f32.mxu0 %vm7371_vm0, %v8446_v1 }
 0x341   :  { %6363 = vmatprep.subr.mxu0 %v8446_v1 }
 0x343   :  { %6356 = vmatmul.mubr.msk.f32.vlgmr.msra.gmra.mrb[6].mxu0 %vm177_vm1, %v7650_v4 }
 0x344   :  { %6364 = vmatpush3.xpose.msk.msra.mxu0 %vm177_vm1, %v7570_v28  ;;  %6365 = vmatprep.mubr.msk.f32.mxu0 %vm7371_vm0, %v8446_v1 }
 0x345   :  { %6938 = vmatprep.subr.bf16.mxu0 %v8442_v0 }
 0x347   :  { %6366 = vmatmul.mubr.msk.f32.vlgmr.msra.gmra.mrb[8].mxu0 %vm177_vm1, %v7664_v6 }
 0x348   :  { %6389 = vmatprep.mubr.msk.f32.mxu0 %vm7371_vm0, %v8446_v1  ;;  %6940 = vmatpush3.bf16.msra.mxu0 %v7703_v54 }
 0x349   :  { %6941 = vmatprep.subr.bf16.mxu0 %v8442_v0 }
 0x366   :  { %v423_v7 = vpop.xlane.xlu1 %422 }
 0x367   :  { %v424_v8 = vsub.f32 %v417_v57, %v423_v7  ;;  %v7707_v57 = vpack.c.bf16 %v1030_v56, %v1029_v53  ;;  %v1210_v53 = vld [vmem:[%s7428_s14 + $0x28] sm:$0xff] }
 0x368   :  { %v7770_v56 = vpack.c.bf16 %v1210_v53, %v1209_v52 }
 0x369   :  { %v425_v9 = vmul.f32 1.442695, %v424_v8  ;;  %6943 = vmatpush3.bf16.msra.mxu0 %v7707_v57 }
 0x36a   :  { %v7672_v12 = vpop.permute.xlu1 %433  ;;  %6944 = vmatprep.subr.bf16.mxu0 %v8442_v0 }
 0x36b   :  { %7191 = vpow2.f32 %v425_v9  ;;  %v436_v13 = vmul.f32 %v7672_v12, %v7570_v28 }
 0x36e   :  { %v7676_v14 = vpop.permute.xlu1 %943 }
 0x36f   :  { %v946_v15 = vmul.f32 %v7676_v14, %v7570_v28 }
 0x375   :  { %v7192_v10 = vpop.eup %7191 }
 0x376   :  { %v427_v11 = vsel %vm420_vm6, %v7192_v10, 0.0 }
 0x377   :  { %428 = vadd.xlane.f32.xlu1 %v427_v11 }
 0x388   :  { %609 = vrot.lane.b32.xlu1 %v436_v13, %s7373_s0  ;;  %v1031_v13 = vld [vmem:[%s7408_s25 + $0x20] sm:$0xff] }
 0x38c   :  { %948 = vrot.lane.b32.xlu1 %v946_v15, %s7373_s0  ;;  %v1032_v15 = vld [vmem:[%s7408_s25 + $0x28] sm:$0xff] }
 0x404   :  { %v429_v16 = vpop.xlane.xlu1 %428 }
 0x405   :  { %7193 = vrcp.f32 %v429_v16  ;;  %v7724_v16 = vpack.c.bf16 %v1032_v15, %v1031_v13  ;;  %v1291_v13 = vld [vmem:[%s7438_s24 + $0x8] sm:$0xff] }
 0x407   :  { %6946 = vmatpush3.bf16.msra.mxu0 %v7724_v16 }
 0x408   :  { %v610_v17 = vpop.permute.xlu1 %609  ;;  %6947 = vmatprep.subr.bf16.mxu0 %v8442_v0 }
 0x409   :  { %6349 = vmatpush3.msk.msra.mxu1 %vm535_vm10, %v610_v17  ;;  %v1033_v17 = vld [vmem:[%s7408_s25 + $0x30] sm:$0xff] }
 0x40a   :  { %6358 = vmatprep.subr.mxu1 %v8446_v1 }
 0x40c   :  { %v949_v9 = vpop.permute.xlu1 %948 }
 0x40f   :  { %v7194_v18 = vpop.eup %7193 }
 0x410   :  { %v431_v19 = vmul.f32 %v7194_v18, %v7192_v10  ;;  %v1034_v18 = vld [vmem:[%s7408_s25 + $0x38] sm:$0xff]  ;;  %s8470_s25 = sld [smem:[#allocation14_spill]] }
 0x412   :  { %v604_v20 = vpop.f32.mrb[4].mxu0  ;;  %6351 = vmatmul.mubr.msk.f32.vlgmr.msra.gmra.mrb[4].mxu1 %vm531_vm14, %v431_v19  ;;  %v7730_v19 = vpack.c.bf16 %v1034_v18, %v1033_v17 }
 0x413   :  { %v6347_v21 = vpop.f32.mrb[5].mxu0  ;;  %6360 = vmatprep.mubr.msk.f32.mxu1 %vm7371_vm0, %v8446_v1 }
 0x414   :  { %6949 = vmatpush3.bf16.msra.mxu0 %v7730_v19  ;;  %v1118_v21 = vld [vmem:[%s7418_s3 + $0x8] sm:$0xff] }
 0x415   :  { %6962 = vmatprep.subr.bf16.mxu0 %v8442_v0 }
 0x416   :  { %v757_v22 = vpop.f32.mrb[6].mxu0 }
 0x417   :  { %v758_v23 = vadd.f32 %v7614_v43, %v757_v22  ;;  %v6357_v24 = vpop.f32.mrb[7].mxu0 }
 0x418   :  { %v1120_v24 = vld [vmem:[%s7418_s3 + $0x18] sm:$0xff] }
 0x419   :  { %v761_v25 = vsel %vm420_vm6, %v758_v23, -inf }
 0x41a   :  { %762 = vmax.xlane.f32.xlu0 %v761_v25  ;;  %v927_v26 = vpop.f32.mrb[8].mxu0 }
 0x41b   :  { %v928_v27 = vadd.f32 %v7614_v43, %v927_v26  ;;  %v6367_v29 = vpop.f32.mrb[9].mxu0  ;;  %v1121_v26 = vld [vmem:[%s7418_s3 + $0x20] sm:$0xff] }
 0x41d   :  { %v931_v30 = vsel %vm420_vm6, %v928_v27, -inf }
 0x41e   :  { %932 = vmax.xlane.f32.xlu0 %v931_v30 }
 0x434   :  { %773 = vrot.lane.b32.xlu0 %v7638_v62, %s7373_s0 }
 0x4a7   :  { %v763_v33 = vpop.xlane.xlu0 %762 }
 0x4a8   :  { %v764_v36 = vsub.f32 %v758_v23, %v763_v33  ;;  %v1119_v23 = vld [vmem:[%s7418_s3 + $0x10] sm:$0xff] }
 0x4a9   :  { %v7741_v25 = vpack.c.bf16 %v1120_v24, %v1119_v23  ;;  %v1294_v24 = vld [vmem:[%s7438_s24 + $0x20] sm:$0xff] }
 0x4aa   :  { %v765_v38 = vmul.f32 1.442695, %v764_v36 }
 0x4ab   :  { %v933_v42 = vpop.xlane.xlu0 %932 }
 0x4ac   :  { %7195 = vpow2.f32 %v765_v38  ;;  %v934_v44 = vsub.f32 %v928_v27, %v933_v42  ;;  %v1122_v27 = vld [vmem:[%s7418_s3 + $0x28] sm:$0xff]  ;;  %v1205_v38 = vld [vmem:[%s7428_s14] sm:$0xff] }
 0x4ad   :  { %v7747_v29 = vpack.c.bf16 %v1122_v27, %v1121_v26  ;;  %v1206_v42 = vld [vmem:[%s7428_s14 + $0x8] sm:$0xff] }
 0x4ae   :  { %v935_v45 = vmul.f32 1.442695, %v934_v44  ;;  %v1295_v26 = vld [vmem:[%s7438_s24 + $0x28] sm:$0xff] }
 0x4af   :  { %v7695_v49 = vpop.permute.xlu0 %773  ;;  %v7806_v27 = vpack.c.bf16 %v1295_v26, %v1294_v24 }
 0x4b0   :  { %7197 = vpow2.f32 %v935_v45  ;;  %v776_v50 = vmul.f32 %v7695_v49, %v7570_v28 }
 0x4b6   :  { %v7196_v43 = vpop.eup %7195 }
 0x4b7   :  { %v767_v46 = vsel %vm420_vm6, %v7196_v43, 0.0 }
 0x4b8   :  { %768 = vadd.xlane.f32.xlu0 %v767_v46  ;;  %v7754_v46 = vpack.c.bf16 %v1206_v42, %v1205_v38  ;;  %v5910_v38 = vld [vmem:[%s7423_s8] ss:$0 sm:$0xff] }
 0x4b9   :  { %v5912_v42 = vld [vmem:[%s7433_s19] ss:$0 sm:$0xff] }
 0x4ba   :  { %v7198_v47 = vpop.eup %7197 }
 0x4bb   :  { %v937_v48 = vsel %vm420_vm6, %v7198_v47, 0.0 }
 0x4bc   :  { %938 = vadd.xlane.f32.xlu0 %v937_v48  ;;  %v1207_v48 = vld [vmem:[%s7428_s14 + $0x10] sm:$0xff] }
 0x4d2   :  { %778 = vrot.lane.b32.xlu0 %v776_v50, %s7373_s0  ;;  %v1208_v50 = vld [vmem:[%s7428_s14 + $0x18] sm:$0xff] }
 0x4d3   :  { %v7761_v51 = vpack.c.bf16 %v1208_v50, %v1207_v48 }
 0x4e5   :  { %v682_v58 = vpop.f32.mrb[4].mxu1 }
 0x4e6   :  { %v683_v28 = vadd.f32 %v682_v58, %v604_v20  ;;  %v6352_v60 = vpop.f32.mrb[5].mxu1  ;;  %v1117_v20 = vld [vmem:[%s7418_s3] sm:$0xff]  ;;  %v1123_v58 = vld [vmem:[%s7418_s3 + $0x30] sm:$0xff] }
 0x4e7   :  { %v7736_v22 = vpack.c.bf16 %v1118_v21, %v1117_v20  ;;  %v1292_v20 = vld [vmem:[%s7438_s24 + $0x10] sm:$0xff]  ;;  %v1293_v21 = vld [vmem:[%s7438_s24 + $0x18] sm:$0xff] }
 0x4e8   :  { %v7796_v23 = vpack.c.bf16 %v1293_v21, %v1292_v20 }
 0x545   :  { %v769_v61 = vpop.xlane.xlu0 %768 }
 0x546   :  { %7199 = vrcp.f32 %v769_v61  ;;  %v1211_v61 = vld [vmem:[%s7428_s14 + $0x30] sm:$0xff] }
 0x549   :  { %v939_v63 = vpop.xlane.xlu0 %938 }
 0x54a   :  { %7201 = vrcp.f32 %v939_v63  ;;  %v1212_v63 = vld [vmem:[%s7428_s14 + $0x38] sm:$0xff]  ;;  %s8472_s14 = sld [smem:[#allocation11_spill]] }
 0x54d   :  { %v779_v2 = vpop.permute.xlu0 %778 }
 0x54e   :  { %6359 = vmatpush3.msk.msra.mxu1 %vm535_vm10, %v779_v2  ;;  %v7780_v2 = vpack.c.bf16 %v1212_v63, %v1211_v61 }
 0x54f   :  { %6368 = vmatprep.subr.mxu1 %v8446_v1 }
 0x550   :  { %v7200_v7 = vpop.eup %7199 }
 0x551   :  { %v771_v8 = vmul.f32 %v7200_v7, %v7196_v43  ;;  %v5908_v7 = vld [vmem:[%s7413_s29] ss:$0 sm:$0xff] }
 0x553   :  { %6361 = vmatmul.mubr.msk.f32.vlgmr.msra.gmra.mrb[6].mxu1 %vm531_vm14, %v771_v8 }
 0x554   :  { %v7202_v10 = vpop.eup %7201  ;;  %6369 = vmatpush3.msk.msra.mxu1 %vm535_vm10, %v949_v9  ;;  %6370 = vmatprep.mubr.msk.f32.mxu1 %vm7371_vm0, %v8446_v1 }
 0x555   :  { %v941_v11 = vmul.f32 %v7202_v10, %v7198_v47  ;;  %6950 = vmatprep.subr.bf16.mxu1 %v8442_v0 }
 0x557   :  { %6371 = vmatmul.mubr.msk.f32.vlgmr.msra.gmra.mrb[8].mxu1 %vm531_vm14, %v941_v11  ;;  %v1290_v11 = vld [vmem:[%s7438_s24] sm:$0xff] }
 0x558   :  { %6408 = vmatprep.mubr.msk.f32.mxu1 %vm7371_vm0, %v8446_v1  ;;  %6952 = vmatpush3.bf16.msra.mxu1 %v7736_v22  ;;  %v7789_v17 = vpack.c.bf16 %v1291_v13, %v1290_v11 }
 0x559   :  { %6953 = vmatprep.subr.bf16.mxu1 %v8442_v0 }
 0x55c   :  { %6955 = vmatpush3.bf16.msra.mxu1 %v7741_v25 }
 0x55d   :  { %6956 = vmatprep.subr.bf16.mxu1 %v8442_v0 }
 0x560   :  { %6958 = vmatpush3.bf16.msra.mxu1 %v7747_v29 }
 0x561   :  { %6959 = vmatprep.subr.bf16.mxu1 %v8442_v0 }
 0x626   :  { %v851_v30 = vpop.f32.mrb[6].mxu1 }
 0x627   :  { %v855_v33 = vadd.f32 %v851_v30, %v683_v28  ;;  %v6362_v36 = vpop.f32.mrb[7].mxu1  ;;  %v1124_v28 = vld [vmem:[%s7418_s3 + $0x38] sm:$0xff]  ;;  %v1296_v30 = vld [vmem:[%s7438_s24 + $0x30] sm:$0xff]  ;;  %s8471_s3 = sld [smem:[#allocation10_spill]] }
 0x628   :  { %v7775_v60 = vpack.c.bf16 %v1124_v28, %v1123_v58  ;;  %v5914_v58 = vld [vmem:[%s8467_s13] ss:$0 sm:$0xff] }
 0x62a   :  { %v1021_v44 = vpop.f32.mrb[8].mxu1  ;;  %6961 = vmatpush3.bf16.msra.mxu1 %v7775_v60 }
 0x62b   :  { %v1025_v45 = vadd.f32 %v1021_v44, %v855_v33  ;;  %v6372_v43 = vpop.f32.mrb[9].mxu1  ;;  %6974 = vmatprep.subr.bf16.mxu1 %v8442_v0  ;;  %v1297_v33 = vld [vmem:[%s7438_s24 + $0x38] sm:$0xff]  ;;  %s8474_s24 = sld [smem:[#allocation13_spill]] }
 0x62c   :  { %v7812_v36 = vpack.c.bf16 %v1297_v33, %v1296_v30 }
 0x62d   :  { %v1026_v47 = vadd.f32 %v1025_v45, %v7593_v37 }
 0x62f   :  { %6390 = vmatmul.mubr.msk.f32.vlgmr.msra.gmra.mrb[10].mxu0 %vm177_vm1, %v1026_v47 }
 0x630   :  { %6964 = vmatpush3.bf16.msra.mxu0 %v7754_v46  ;;  %6427 = vmatprep.mubr.msk.f32.mxu0 %vm7371_vm0, %v8446_v1 }
 0x631   :  { %6965 = vmatprep.subr.bf16.mxu0 %v8442_v0 }
 0x634   :  { %6967 = vmatpush3.bf16.msra.mxu0 %v7761_v51 }
 0x635   :  { %6968 = vmatprep.subr.bf16.mxu0 %v8442_v0 }
 0x638   :  { %6970 = vmatpush3.bf16.msra.mxu0 %v7770_v56 }
 0x639   :  { %6971 = vmatprep.subr.bf16.mxu0 %v8442_v0 }
 0x63c   :  { %6973 = vmatpush3.bf16.msra.mxu0 %v7780_v2 }
 0x63d   :  { %6449 = vmatprep.subr.mxu0 %v8446_v1 }
 0x702   :  { %v1111_v8 = vpop.f32.mrb[10].mxu0 }
 0x703   :  { %v1112_v9 = vadd.f32 %v5908_v7, %v1111_v8  ;;  %v6391_v10 = vpop.f32.mrb[11].mxu0 }
 0x705   :  { %v1115_v15 = vmax.f32 %v1112_v9, 0.0 }
 0x707   :  { %v1116_v18 = vadd.f32 %v1115_v15, %v1026_v47 }
 0x709   :  { %6409 = vmatmul.mubr.msk.f32.vlgmr.msra.gmra.mrb[10].mxu1 %vm177_vm1, %v1116_v18  ;;  %6428 = vmatmul.mubr.msk.f32.vlgmr.msra.gmra.mrb[12].mxu0 %vm177_vm1, %v1116_v18 }
 0x70a   :  { %6976 = vmatpush3.bf16.msra.mxu1 %v7789_v17  ;;  %6446 = vmatprep.mubr.msk.f32.mxu1 %vm7371_vm0, %v8446_v1 }
 0x70b   :  { %6977 = vmatprep.subr.bf16.mxu1 %v8442_v0  ;;  %6451 = vmatprep.mubr.msk.f32.mxu0 %vm7371_vm0, %v8446_v1 }
 0x70e   :  { %6979 = vmatpush3.bf16.msra.mxu1 %v7796_v23 }
 0x70f   :  { %6980 = vmatprep.subr.bf16.mxu1 %v8442_v0 }
 0x712   :  { %6982 = vmatpush3.bf16.msra.mxu1 %v7806_v27 }
 0x713   :  { %6983 = vmatprep.subr.bf16.mxu1 %v8442_v0 }
 0x716   :  { %6985 = vmatpush3.bf16.msra.mxu1 %v7812_v36 }
 0x717   :  { %6454 = vmatprep.subr.mxu1 %v8446_v1 }
 0x719   :  { %6447 = vmatmul.mubr.msk.f32.vlgmr.msra.gmra.mrb[12].mxu1 %vm177_vm1, %v1116_v18 }
 0x71a   :  { %6456 = vmatprep.mubr.msk.f32.mxu1 %vm7371_vm0, %v8446_v1 }
 0x7dc   :  { %v1201_v44 = vpop.f32.mrb[10].mxu1  ;;  %v1286_v45 = vpop.f32.mrb[12].mxu0 }
 0x7dd   :  { %v7822_v43 = vadd.f32 %v5910_v38, %v1201_v44  ;;  %v1287_v47 = vadd.f32 %v5912_v42, %v1286_v45  ;;  %v6410_v48 = vpop.f32.mrb[11].mxu1  ;;  %v6429_v50 = vpop.f32.mrb[13].mxu0 }
 0x7df   :  { %6450 = vmatpush3.xpose.msk.msra.mxu0 %vm177_vm1, %v1287_v47  ;;  %6455 = vmatpush3.xpose.msk.msra.mxu1 %vm177_vm1, %v1287_v47  ;;  %v1375_v52 = vmul.f32 %v7822_v43, %v7588_v34  ;;  %v1465_v53 = vmul.f32 %v7822_v43, %v7591_v35  ;;  %v1705_v44 = vmul.f32 %v7822_v43, %v7641_v3 }
 0x7e0   :  { %6459 = vmatprep.subr.mxu0 %v8446_v1  ;;  %6464 = vmatprep.subr.mxu1 %v8446_v1  ;;  %v1868_v45 = vmul.f32 %v7822_v43, %v7654_v5 }
 0x7e2   :  { %6452 = vmatmul.mubr.msk.f32.vlgmr.msra.gmra.mrb[14].mxu0 %vm177_vm1, %v1375_v52  ;;  %6457 = vmatmul.mubr.msk.f32.vlgmr.msra.gmra.mrb[14].mxu1 %vm177_vm1, %v1465_v53 }
 0x7e3   :  { %6461 = vmatprep.mubr.msk.f32.mxu0 %vm7371_vm0, %v8446_v1  ;;  %6466 = vmatprep.mubr.msk.f32.mxu1 %vm7371_vm0, %v8446_v1 }
 0x7ec   :  { %v1371_v28 = vpop.f32.mrb[12].mxu1 }
 0x7ed   :  { %v7839_v61 = vadd.f32 %v5914_v58, %v1371_v28  ;;  %v6448_v63 = vpop.f32.mrb[13].mxu1 }
 0x7ef   :  { %v1464_v7 = vmul.f32 %v7581_v31, %v7839_v61  ;;  %v1550_v8 = vmul.f32 %v7584_v32, %v7839_v61 }
 0x7f1   :  { %6460 = vmatpush3.msk.msra.mxu0 %vm1555_vm15, %v1550_v8  ;;  %6465 = vmatpush3.msk.msra.mxu1 %vm1555_vm15, %v1464_v7 }
 0x7f2   :  { %6469 = vmatprep.subr.mxu0 %v8446_v1  ;;  %6474 = vmatprep.subr.mxu1 %v8446_v1 }
 0x8b5   :  { %v1448_v9 = vpop.f32.mrb[14].mxu0  ;;  %v1535_v10 = vpop.f32.mrb[14].mxu1 }
 0x8b6   :  { %v6453_v11 = vpop.f32.mrb[15].mxu0  ;;  %v6458_v13 = vpop.f32.mrb[15].mxu1  ;;  %v1539_v15 = vsel %vm1452_vm2, %v1535_v10, -inf  ;;  %v1453_v30 = vsel %vm1452_vm2, %v1448_v9, -inf }
 0x8b7   :  { %1540 = vmax.xlane.f32.xlu1 %v1539_v15 }
 0x944   :  { %v1541_v18 = vpop.xlane.xlu1 %1540 }
 0x945   :  { %v1542_v20 = vsub.f32 %v1535_v10, %v1541_v18 }
 0x947   :  { %v1543_v21 = vmul.f32 1.442695, %v1542_v20 }
 0x949   :  { %7203 = vpow2.f32 %v1543_v21 }
 0x953   :  { %v7204_v24 = vpop.eup %7203 }
 0x954   :  { %v1545_v26 = vsel %vm1452_vm2, %v7204_v24, 0.0 }
 0x955   :  { %1546 = vadd.xlane.f32.xlu0 %v1545_v26 }
 0x959   :  { %1454 = vmax.xlane.f32.xlu0 %v1453_v30 }
 0x9e2   :  { %v1547_v33 = vpop.xlane.xlu0 %1546 }
 0x9e3   :  { %7205 = vrcp.f32 %v1547_v33 }
 0x9e6   :  { %v1455_v48 = vpop.xlane.xlu0 %1454 }
 0x9e7   :  { %v1456_v50 = vsub.f32 %v1448_v9, %v1455_v48 }
 0x9e9   :  { %v1457_v52 = vmul.f32 1.442695, %v1456_v50  ;;  %v2032_v50 = vld [vmem:[%s8468_s17] sm:$0xff] }
 0x9eb   :  { %7207 = vpow2.f32 %v1457_v52  ;;  %v2033_v52 = vld [vmem:[%s8468_s17 + $0x8] sm:$0xff] }
 0x9ed   :  { %v7206_v38 = vpop.eup %7205 }
 0x9ee   :  { %v1549_v42 = vmul.f32 %v7206_v38, %v7204_v24 }
 0x9f0   :  { %6462 = vmatmul.mubr.msk.f32.vlgmr.msra.gmra.mrb[16].mxu0 %vm1551_vm3, %v1549_v42 }
 0x9f1   :  { %6470 = vmatpush3.xpose.msk.msra.mxu0 %vm177_vm1, %v1287_v47  ;;  %6471 = vmatprep.mubr.msk.f32.mxu0 %vm7371_vm0, %v8446_v1 }
 0x9f2   :  { %6479 = vmatprep.subr.mxu0 %v8446_v1 }
 0x9f4   :  { %6472 = vmatmul.mubr.msk.f32.vlgmr.msra.gmra.mrb[18].mxu0 %vm177_vm1, %v1705_v44  ;;  %v1790_v44 = vmul.f32 %v7638_v62, %v7839_v61 }
 0x9f5   :  { %6480 = vmatpush3.xpose.msk.msra.mxu0 %vm177_vm1, %v1287_v47  ;;  %6481 = vmatprep.mubr.msk.f32.mxu0 %vm7371_vm0, %v8446_v1  ;;  %v7208_v7 = vpop.eup %7207 }
 0x9f6   :  { %6986 = vmatprep.subr.bf16.mxu0 %v8442_v0  ;;  %v1459_v11 = vsel %vm1452_vm2, %v7208_v7, 0.0 }
 0x9f8   :  { %6482 = vmatmul.mubr.msk.f32.vlgmr.msra.gmra.mrb[20].mxu0 %vm177_vm1, %v1868_v45 }
 0x9f9   :  { %6505 = vmatprep.mubr.msk.f32.mxu0 %vm7371_vm0, %v8446_v1 }
 0xac3   :  { %v1625_v53 = vpop.f32.mrb[16].mxu0 }
 0xac4   :  { %v6463_v58 = vpop.f32.mrb[17].mxu0 }
 0xac5   :  { %v2034_v58 = vld [vmem:[%s8468_s17 + $0x10] sm:$0xff] }
 0xac7   :  { %v1775_v47 = vpop.f32.mrb[18].mxu0 }
 0xac8   :  { %v6473_v28 = vpop.f32.mrb[19].mxu0  ;;  %v1779_v63 = vsel %vm1452_vm2, %v1775_v47, -inf }
 0xac9   :  { %1780 = vmax.xlane.f32.xlu1 %v1779_v63  ;;  %v2035_v28 = vld [vmem:[%s8468_s17 + $0x18] sm:$0xff] }
 0xaca   :  { %v7888_v63 = vpack.c.bf16 %v2035_v28, %v2034_v58 }
 0xacb   :  { %v1938_v8 = vpop.f32.mrb[20].mxu0 }
 0xacc   :  { %v6483_v10 = vpop.f32.mrb[21].mxu0  ;;  %v1942_v13 = vsel %vm1452_vm2, %v1938_v8, -inf }
 0xacd   :  { %1460 = vadd.xlane.f32.xlu1 %v1459_v11  ;;  %1943 = vmax.xlane.f32.xlu0 %v1942_v13  ;;  %v1953_v13 = vmul.f32 %v7631_v59, %v7839_v61 }
 0xb56   :  { %v1781_v15 = vpop.xlane.xlu1 %1780 }
 0xb57   :  { %v1782_v9 = vsub.f32 %v1775_v47, %v1781_v15  ;;  %v7884_v47 = vpack.c.bf16 %v2033_v52, %v2032_v50 }
 0xb59   :  { %v1783_v18 = vmul.f32 1.442695, %v1782_v9  ;;  %6988 = vmatpush3.bf16.msra.mxu0 %v7884_v47 }
 0xb5a   :  { %v1461_v20 = vpop.xlane.xlu1 %1460  ;;  %v1944_v21 = vpop.xlane.xlu0 %1943  ;;  %6989 = vmatprep.subr.bf16.mxu0 %v8442_v0 }
 0xb5b   :  { %7209 = vpow2.f32 %v1783_v18  ;;  %v1945_v24 = vsub.f32 %v1938_v8, %v1944_v21  ;;  %v2036_v21 = vld [vmem:[%s8468_s17 + $0x20] sm:$0xff] }
 0xb5c   :  { %7211 = vrcp.f32 %v1461_v20 }
 0xb5d   :  { %v1946_v26 = vmul.f32 1.442695, %v1945_v24  ;;  %6991 = vmatpush3.bf16.msra.mxu0 %v7888_v63  ;;  %v2037_v24 = vld [vmem:[%s8468_s17 + $0x28] sm:$0xff] }
 0xb5e   :  { %6992 = vmatprep.subr.bf16.mxu0 %v8442_v0 }
 0xb5f   :  { %7213 = vpow2.f32 %v1946_v26  ;;  %v7905_v26 = vpack.c.bf16 %v2037_v24, %v2036_v21  ;;  %v2127_v21 = vld [vmem:[%s8469_s21 + $0x28] sm:$0xff]  ;;  %v2214_v24 = vld [vmem:[%s8470_s25 + $0x20] sm:$0xff] }
 0xb61   :  { %6994 = vmatpush3.bf16.msra.mxu0 %v7905_v26 }
 0xb62   :  { %6995 = vmatprep.subr.bf16.mxu0 %v8442_v0 }
 0xb65   :  { %v7210_v30 = vpop.eup %7209 }
 0xb66   :  { %v7212_v33 = vpop.eup %7211  ;;  %v1785_v38 = vsel %vm1452_vm2, %v7210_v30, 0.0 }
 0xb67   :  { %v1463_v42 = vmul.f32 %v7212_v33, %v7208_v7  ;;  %1786 = vadd.xlane.f32.xlu0 %v1785_v38  ;;  %v2039_v33 = vld [vmem:[%s8468_s17 + $0x38] sm:$0xff] }
 0xb69   :  { %v7214_v45 = vpop.eup %7213  ;;  %6467 = vmatmul.mubr.msk.f32.vlgmr.msra.gmra.mrb[16].mxu1 %vm1551_vm3, %v1463_v42  ;;  %v2123_v42 = vld [vmem:[%s8469_s21 + $0x8] sm:$0xff] }
 0xb6a   :  { %6475 = vmatpush3.msk.msra.mxu1 %vm1555_vm15, %v1790_v44  ;;  %v1948_v48 = vsel %vm1452_vm2, %v7214_v45, 0.0  ;;  %6476 = vmatprep.mubr.msk.f32.mxu1 %vm7371_vm0, %v8446_v1 }
 0xb6b   :  { %1949 = vadd.xlane.f32.xlu1 %v1948_v48  ;;  %6484 = vmatprep.subr.mxu1 %v8446_v1  ;;  %v2125_v48 = vld [vmem:[%s8469_s21 + $0x18] sm:$0xff] }
 0xbf4   :  { %v1787_v7 = vpop.xlane.xlu0 %1786 }
 0xbf5   :  { %7215 = vrcp.f32 %v1787_v7  ;;  %v2210_v7 = vld [vmem:[%s8470_s25] sm:$0xff] }
 0xbf8   :  { %v1950_v8 = vpop.xlane.xlu1 %1949 }
 0xbf9   :  { %7217 = vrcp.f32 %v1950_v8  ;;  %v2211_v8 = vld [vmem:[%s8470_s25 + $0x8] sm:$0xff] }
 0xbff   :  { %v7216_v10 = vpop.eup %7215 }
 0xc00   :  { %v1789_v11 = vmul.f32 %v7216_v10, %v7210_v30  ;;  %v2038_v30 = vld [vmem:[%s8468_s17 + $0x30] sm:$0xff] }
 0xc01   :  { %v7911_v38 = vpack.c.bf16 %v2039_v33, %v2038_v30  ;;  %v2215_v33 = vld [vmem:[%s8470_s25 + $0x28] sm:$0xff] }
 0xc02   :  { %6477 = vmatmul.mubr.msk.f32.vlgmr.msra.gmra.mrb[18].mxu1 %vm1551_vm3, %v1789_v11 }
 0xc03   :  { %v7218_v15 = vpop.eup %7217  ;;  %6485 = vmatpush3.msk.msra.mxu1 %vm1555_vm15, %v1953_v13  ;;  %6486 = vmatprep.mubr.msk.f32.mxu1 %vm7371_vm0, %v8446_v1 }
 0xc04   :  { %v1952_v9 = vmul.f32 %v7218_v15, %v7214_v45  ;;  %6998 = vmatprep.subr.bf16.mxu1 %v8442_v0  ;;  %6997 = vmatpush3.bf16.msra.mxu0 %v7911_v38  ;;  %v2124_v45 = vld [vmem:[%s8469_s21 + $0x10] sm:$0xff]  ;;  %v7929_v15 = vpack.c.bf16 %v2211_v8, %v2210_v7  ;;  %v7968_v7 = vld [vmem:[%s8471_s3] ss:$0 sm:$0xff] }
 0xc05   :  { %7010 = vmatprep.subr.bf16.mxu0 %v8442_v0  ;;  %v7922_v50 = vpack.c.bf16 %v2125_v48, %v2124_v45  ;;  %v2129_v45 = vld [vmem:[%s8469_s21 + $0x38] sm:$0xff]  ;;  %v2216_v48 = vld [vmem:[%s8470_s25 + $0x30] sm:$0xff]  ;;  %8475 = vst [vmem:[#allocation22_spill] sm:$0xff] %v7968_v7 }
 0xc06   :  { %6487 = vmatmul.mubr.msk.f32.vlgmr.msra.gmra.mrb[20].mxu1 %vm1551_vm3, %v1952_v9 }
 0xc07   :  { %6524 = vmatprep.mubr.msk.f32.mxu1 %vm7371_vm0, %v8446_v1 }
 0xc3c   :  { %v1701_v61 = vpop.f32.mrb[16].mxu1 }
 0xc3d   :  { %v1702_v18 = vadd.f32 %v1701_v61, %v1625_v53  ;;  %v6468_v20 = vpop.f32.mrb[17].mxu1  ;;  %v2122_v53 = vld [vmem:[%s8469_s21] sm:$0xff]  ;;  %v2212_v61 = vld [vmem:[%s8470_s25 + $0x10] sm:$0xff] }
 0xc3e   :  { %v7917_v44 = vpack.c.bf16 %v2123_v42, %v2122_v53  ;;  %v2213_v20 = vld [vmem:[%s8470_s25 + $0x18] sm:$0xff]  ;;  %v7949_v53 = vpack.c.bf16 %v2215_v33, %v2214_v24  ;;  %v2128_v42 = vld [vmem:[%s8469_s21 + $0x30] sm:$0xff] }
 0xc40   :  { %7000 = vmatpush3.bf16.msra.mxu1 %v7917_v44 }
 0xc41   :  { %7001 = vmatprep.subr.bf16.mxu1 %v8442_v0 }
 0xc44   :  { %7003 = vmatpush3.bf16.msra.mxu1 %v7922_v50 }
 0xc45   :  { %7004 = vmatprep.subr.bf16.mxu1 %v8442_v0 }
 0xcd5   :  { %v1863_v52 = vpop.f32.mrb[18].mxu1 }
 0xcd6   :  { %v1867_v58 = vadd.f32 %v1863_v52, %v1702_v18  ;;  %v6478_v28 = vpop.f32.mrb[19].mxu1  ;;  %v7936_v18 = vpack.c.bf16 %v2213_v20, %v2212_v61  ;;  %v7958_v52 = vpack.c.bf16 %v2129_v45, %v2128_v42  ;;  %v260_v20 = vld [vmem:[%s8472_s14] sm:$0x1] }
 0xcd9   :  { %v2026_v10 = vpop.f32.mrb[20].mxu1 }
 0xcda   :  { %v2030_v11 = vadd.f32 %v2026_v10, %v1867_v58  ;;  %v6488_v13 = vpop.f32.mrb[21].mxu1  ;;  %v2217_v58 = vld [vmem:[%s8470_s25 + $0x38] sm:$0xff] }
 0xcdb   :  { %v7961_v28 = vpack.c.bf16 %v2217_v58, %v2216_v48  ;;  %v7986_v48 = vld [vmem:[%s8476_s20] ss:$0 sm:$0xff] }
 0xcdc   :  { %v2031_v9 = vadd.f32 %v2030_v11, %v7822_v43  ;;  %v2126_v43 = vld [vmem:[%s8469_s21 + $0x20] sm:$0xff]  ;;  %8478 = vst [vmem:[#allocation24_spill] sm:$0xff] %v7986_v48 }
 0xcdd   :  { %v7946_v30 = vpack.c.bf16 %v2127_v21, %v2126_v43  ;;  %8473 = vst [vmem:[#allocation21_spill] sm:$0xff] %v7961_v28  ;;  %v7979_v43 = vld [vmem:[%s8474_s24] ss:$0 sm:$0xff]  ;;  %v7982_v21 = vadd.f32 %v7611_v41, %v260_v20 }
 0xcde   :  { %6506 = vmatmul.mubr.msk.f32.vlgmr.msra.gmra.mrb[22].mxu0 %vm177_vm1, %v2031_v9  ;;  %8477 = vst [vmem:[#allocation23_spill] sm:$0xff] %v7979_v43 }
 0xcdf   :  { %7012 = vmatpush3.bf16.msra.mxu0 %v7929_v15  ;;  %6543 = vmatprep.mubr.msk.f32.mxu0 %vm7371_vm0, %v8446_v1  ;;  %v7992_v58 = vmul.f32 %v7588_v34, %v7982_v21 }
 0xce0   :  { %7013 = vmatprep.subr.bf16.mxu0 %v8442_v0  ;;  %7006 = vmatpush3.bf16.msra.mxu1 %v7946_v30 }
 0xce1   :  { %7007 = vmatprep.subr.bf16.mxu1 %v8442_v0  ;;  %8479 = vst [vmem:[#allocation25_spill] sm:$0xff] %v7992_v58 }
 0xce3   :  { %7015 = vmatpush3.bf16.msra.mxu0 %v7936_v18 }
 0xce4   :  { %7016 = vmatprep.subr.bf16.mxu0 %v8442_v0  ;;  %7009 = vmatpush3.bf16.msra.mxu1 %v7958_v52 }
 0xce5   :  { %6546 = vmatprep.subr.mxu1 %v8446_v1 }
 0xce7   :  { %7018 = vmatpush3.bf16.msra.mxu0 %v7949_v53 }
 0xce8   :  { %7019 = vmatprep.subr.bf16.mxu0 %v8442_v0 }
 0xceb   :  { %7021 = vmatpush3.bf16.msra.mxu0 %v7961_v28 }
 0xcec   :  { %6566 = vmatprep.subr.mxu0 %v8446_v1 }
 0xdb1   :  { %v2116_v8 = vpop.f32.mrb[22].mxu0 }
 0xdb2   :  { %v2117_v10 = vadd.f32 %v7968_v7, %v2116_v8  ;;  %v6507_v11 = vpop.f32.mrb[23].mxu0  ;;  %v8000_v8 = vmul.f32 %v7641_v3, %v7982_v21 }
 0xdb4   :  { %v2120_v13 = vmax.f32 %v2117_v10, 0.0  ;;  %8480 = vst [vmem:[#allocation26_spill] sm:$0xff] %v8000_v8  ;;  %v8013_v10 = vmul.f32 %v7591_v35, %v7982_v21 }
 0xdb6   :  { %v2121_v61 = vadd.f32 %v2120_v13, %v2031_v9  ;;  %8481 = vst [vmem:[#allocation27_spill] sm:$0xff] %v8013_v10  ;;  %v8022_v13 = vmul.f32 %v7654_v5, %v7982_v21 }
 0xdb8   :  { %6525 = vmatmul.mubr.msk.f32.vlgmr.msra.gmra.mrb[22].mxu1 %vm177_vm1, %v2121_v61  ;;  %6544 = vmatmul.mubr.msk.f32.vlgmr.msra.gmra.mrb[24].mxu0 %vm177_vm1, %v2121_v61  ;;  %8482 = vst [vmem:[#allocation28_spill] sm:$0xff] %v8022_v13 }
 0xdb9   :  { %6548 = vmatprep.mubr.msk.f32.mxu1 %vm7371_vm0, %v8446_v1  ;;  %6568 = vmatprep.mubr.msk.f32.mxu0 %vm7371_vm0, %v8446_v1 }
 0xe8b   :  { %v2206_v24 = vpop.f32.mrb[22].mxu1  ;;  %v2291_v33 = vpop.f32.mrb[24].mxu0 }
 0xe8c   :  { %v2207_v9 = vadd.f32 %v7979_v43, %v2206_v24  ;;  %v6526_v42 = vpop.f32.mrb[23].mxu1  ;;  %v6545_v45 = vpop.f32.mrb[25].mxu0  ;;  %v7996_v41 = vadd.f32 %v7986_v48, %v2291_v33 }
 0xe8e   :  { %6547 = vmatpush3.xpose.msk.msra.mxu1 %vm177_vm1, %v2207_v9  ;;  %6567 = vmatpush3.xpose.msk.msra.mxu0 %vm177_vm1, %v2207_v9  ;;  %v2470_v11 = vmul.f32 %v7584_v32, %v7996_v41 }
 0xe8f   :  { %6551 = vmatprep.subr.mxu1 %v8446_v1  ;;  %6576 = vmatprep.subr.mxu0 %v8446_v1 }
 0xe91   :  { %6549 = vmatmul.mubr.msk.f32.vlgmr.msra.gmra.mrb[24].mxu1 %vm177_vm1, %v7992_v58  ;;  %6569 = vmatmul.mubr.msk.f32.vlgmr.msra.gmra.mrb[26].mxu0 %vm177_vm1, %v8000_v8 }
 0xe92   :  { %6552 = vmatpush3.xpose.msk.msra.mxu1 %vm177_vm1, %v2207_v9  ;;  %6577 = vmatpush3.xpose.msk.msra.mxu0 %vm177_vm1, %v2207_v9 }
 0xe93   :  { %6553 = vmatprep.mubr.msk.f32.mxu1 %vm7371_vm0, %v8446_v1  ;;  %6578 = vmatprep.mubr.msk.f32.mxu0 %vm7371_vm0, %v8446_v1 }
 0xe94   :  { %6556 = vmatprep.subr.mxu1 %v8446_v1  ;;  %7022 = vmatprep.subr.bf16.mxu0 %v8442_v0 }
 0xe95   :  { %6554 = vmatmul.mubr.msk.f32.vlgmr.msra.gmra.mrb[26].mxu1 %vm177_vm1, %v8013_v10  ;;  %6579 = vmatmul.mubr.msk.f32.vlgmr.msra.gmra.mrb[28].mxu0 %vm177_vm1, %v8022_v13 }
 0xe96   :  { %6557 = vmatpush3.msk.msra.mxu1 %vm1555_vm15, %v2470_v11  ;;  %6558 = vmatprep.mubr.msk.f32.mxu1 %vm7371_vm0, %v8446_v1 }
 0xe97   :  { %6561 = vmatprep.subr.mxu1 %v8446_v1  ;;  %6602 = vmatprep.mubr.msk.f32.mxu0 %vm7371_vm0, %v8446_v1 }
 0xf64   :  { %v2368_v61 = vpop.f32.mrb[24].mxu1  ;;  %v2693_v20 = vpop.f32.mrb[26].mxu0 }
 0xf65   :  { %v6550_v24 = vpop.f32.mrb[25].mxu1  ;;  %v2373_v33 = vsel %vm2372_vm4, %v2368_v61, -inf  ;;  %v6570_v9 = vpop.f32.mrb[27].mxu0  ;;  %v2697_v1 = vsel %vm2372_vm4, %v2693_v20, -inf }
 0xf66   :  { %2374 = vmax.xlane.f32.xlu1 %v2373_v33 }
 0xf68   :  { %v2455_v42 = vpop.f32.mrb[26].mxu1  ;;  %v2856_v45 = vpop.f32.mrb[28].mxu0 }
 0xf69   :  { %v6555_v0 = vpop.f32.mrb[27].mxu1  ;;  %v2459_v11 = vsel %vm2372_vm4, %v2455_v42, -inf  ;;  %v6580_v13 = vpop.f32.mrb[29].mxu0  ;;  %v2860_v10 = vsel %vm2372_vm4, %v2856_v45, -inf }
 0xf6a   :  { %2460 = vmax.xlane.f32.xlu0 %v2459_v11  ;;  %2861 = vmax.xlane.f32.xlu1 %v2860_v10 }
 0xf6e   :  { %2698 = vmax.xlane.f32.xlu0 %v2697_v1 }
 0xff3   :  { %v2375_v8 = vpop.xlane.xlu1 %2374 }
 0xff4   :  { %v2376_v58 = vsub.f32 %v2368_v61, %v2375_v8 }
 0xff6   :  { %v2377_v24 = vmul.f32 1.442695, %v2376_v58 }
 0xff7   :  { %v2461_v48 = vpop.xlane.xlu0 %2460  ;;  %v2862_v33 = vpop.xlane.xlu1 %2861 }
 0xff8   :  { %7219 = vpow2.f32 %v2377_v24  ;;  %v2462_v9 = vsub.f32 %v2455_v42, %v2461_v48  ;;  %v2863_v43 = vsub.f32 %v2856_v45, %v2862_v33  ;;  %v8484_v45 = vmov 0.0|0.0  }
 0xffa   :  { %v2463_v7 = vmul.f32 1.442695, %v2462_v9  ;;  %v2864_v0 = vmul.f32 1.442695, %v2863_v43 }
 0xffb   :  { %v2699_v28 = vpop.xlane.xlu0 %2698 }
 0xffc   :  { %7221 = vpow2.f32 %v2463_v7  ;;  %v2700_v13 = vsub.f32 %v2693_v20, %v2699_v28  ;;  %v2950_v7 = vld [vmem:[%s8483_s27] sm:$0xff]  ;;  %v2951_v20 = vld [vmem:[%s8483_s27 + $0x8] sm:$0xff] }
 0xffd   :  { %7223 = vpow2.f32 %v2864_v0  ;;  %v8045_v42 = vpack.c.bf16 %v2951_v20, %v2950_v7  ;;  %v2708_v20 = vmul.f32 %v7638_v62, %v7996_v41 }
 0xffe   :  { %v2701_v10 = vmul.f32 1.442695, %v2700_v13 }
 0xfff   :  { %7024 = vmatpush3.bf16.msra.mxu0 %v8045_v42 }
0x1000   :  { %7225 = vpow2.f32 %v2701_v10  ;;  %7025 = vmatprep.subr.bf16.mxu0 %v8484_v45 }
0x1002   :  { %v7220_v11 = vpop.eup %7219 }
0x1003   :  { %v2379_v1 = vsel %vm2372_vm4, %v7220_v11, 0.0 }
0x1004   :  { %2380 = vadd.xlane.f32.xlu1 %v2379_v1 }
0x1006   :  { %v7222_v58 = vpop.eup %7221 }
0x1007   :  { %v7224_v8 = vpop.eup %7223  ;;  %v2465_v48 = vsel %vm2372_vm4, %v7222_v58, 0.0 }
0x1008   :  { %2466 = vadd.xlane.f32.xlu0 %v2465_v48  ;;  %v2866_v61 = vsel %vm2372_vm4, %v7224_v8, 0.0  ;;  %v2384_v48 = vmul.f32 %v7581_v31, %v7996_v41 }
0x1009   :  { %2867 = vadd.xlane.f32.xlu1 %v2866_v61  ;;  %v8485_v61 = vmov 0.0  }
0x100a   :  { %v7226_v43 = vpop.eup %7225 }
0x100b   :  { %v2703_v28 = vsel %vm2372_vm4, %v7226_v43, 0.0 }
0x100c   :  { %2704 = vadd.xlane.f32.xlu0 %v2703_v28 }
0x1091   :  { %v2381_v24 = vpop.xlane.xlu1 %2380 }
0x1095   :  { %v2467_v9 = vpop.xlane.xlu0 %2466 }
0x1096   :  { %7227 = vrcp.f32 %v2467_v9  ;;  %v2868_v0 = vpop.xlane.xlu1 %2867 }
0x1097   :  { %7229 = vrcp.f32 %v2381_v24 }
0x1099   :  { %v2705_v33 = vpop.xlane.xlu0 %2704 }
0x109a   :  { %7231 = vrcp.f32 %v2705_v33 }
0x109b   :  { %7233 = vrcp.f32 %v2868_v0  ;;  %v2955_v0 = vld [vmem:[%s8483_s27 + $0x28] sm:$0xff] }
0x10a0   :  { %v7228_v13 = vpop.eup %7227 }
0x10a1   :  { %v2469_v10 = vmul.f32 %v7228_v13, %v7222_v58  ;;  %v7230_v1 = vpop.eup %7229 }
0x10a2   :  { %v2383_v28 = vmul.f32 %v7230_v1, %v7220_v11  ;;  %v2871_v11 = vmul.f32 %v7631_v59, %v7996_v41  ;;  %v8074_v41 = vld [vmem:[%s7383_s5 + $0x8] sm:$0x7f]  ;;  %s8494_s5 = sld [smem:[#allocation18_spill]] }
0x10a3   :  { %6559 = vmatmul.mubr.msk.f32.vlgmr.msra.gmra.mrb[28].mxu1 %vm1551_vm3, %v2469_v10  ;;  %v2957_v10 = vld [vmem:[%s8483_s27 + $0x38] sm:$0xff] }
0x10a4   :  { %6562 = vmatpush3.msk.msra.mxu1 %vm1555_vm15, %v2384_v48  ;;  %6563 = vmatprep.mubr.msk.f32.mxu1 %vm7371_vm0, %v8485_v61  ;;  %v7232_v7 = vpop.eup %7231 }
0x10a5   :  { %6571 = vmatprep.subr.mxu1 %v8485_v61  ;;  %v2707_v58 = vmul.f32 %v7232_v7, %v7226_v43  ;;  %v7234_v24 = vpop.eup %7233  ;;  %v2953_v43 = vld [vmem:[%s8483_s27 + $0x18] sm:$0xff] }
0x10a6   :  { %v2870_v9 = vmul.f32 %v7234_v24, %v7224_v8  ;;  %v2952_v8 = vld [vmem:[%s8483_s27 + $0x10] sm:$0xff] }
0x10a7   :  { %6564 = vmatmul.mubr.msk.f32.vlgmr.msra.gmra.mrb[30].mxu1 %vm1551_vm3, %v2383_v28  ;;  %v8092_v33 = vpack.c.bf16 %v2953_v43, %v2952_v8 }
0x10a8   :  { %6572 = vmatpush3.msk.msra.mxu1 %vm1555_vm15, %v2708_v20  ;;  %6573 = vmatprep.mubr.msk.f32.mxu1 %vm7371_vm0, %v8485_v61 }
0x10a9   :  { %6581 = vmatprep.subr.mxu1 %v8485_v61  ;;  %7027 = vmatpush3.bf16.msra.mxu0 %v8092_v33 }
0x10aa   :  { %7028 = vmatprep.subr.bf16.mxu0 %v8484_v45 }
0x10ab   :  { %6574 = vmatmul.mubr.msk.f32.vlgmr.msra.gmra.mrb[32].mxu1 %vm1551_vm3, %v2707_v58 }
0x10ac   :  { %6582 = vmatpush3.msk.msra.mxu1 %vm1555_vm15, %v2871_v11  ;;  %6583 = vmatprep.mubr.msk.f32.mxu1 %vm7371_vm0, %v8485_v61 }
0x10ad   :  { %6605 = vmatprep.subr.mxu1 %v8485_v61 }
0x10af   :  { %6584 = vmatmul.mubr.msk.f32.vlgmr.msra.gmra.mrb[34].mxu1 %vm1551_vm3, %v2870_v9 }
0x10b0   :  { %6607 = vmatprep.mubr.msk.f32.mxu1 %vm7371_vm0, %v8485_v61 }
0x10b3   :  { %6606 = vmatpush3.xpose.msk.msra.mxu1 %vm177_vm1, %v8074_v41 }
0x10b4   :  { %6610 = vmatprep.subr.mxu1 %v8485_v61 }
0x10b6   :  { %6608 = vmatmul.mubr.msk.f32.vlgmr.msra.gmra.mrb[36].mxu1 %vm177_vm1, %v7597_v39  ;;  %v2954_v39 = vld [vmem:[%s8483_s27 + $0x20] sm:$0xff] }
0x10b7   :  { %6611 = vmatpush3.xpose.msk.msra.mxu1 %vm177_vm1, %v8074_v41  ;;  %6612 = vmatprep.mubr.msk.f32.mxu1 %vm7371_vm0, %v8485_v61  ;;  %v8098_v13 = vpack.c.bf16 %v2955_v0, %v2954_v39 }
0x10b8   :  { %6615 = vmatprep.subr.mxu1 %v8485_v61 }
0x10b9   :  { %7030 = vmatpush3.bf16.msra.mxu0 %v8098_v13 }
0x10ba   :  { %6613 = vmatmul.mubr.msk.f32.vlgmr.msra.gmra.mrb[38].mxu1 %vm177_vm1, %v7601_v40  ;;  %7031 = vmatprep.subr.bf16.mxu0 %v8484_v45  ;;  %v2956_v40 = vld [vmem:[%s8483_s27 + $0x30] sm:$0xff] }
0x10bb   :  { %6617 = vmatprep.mubr.msk.f32.mxu1 %vm7371_vm0, %v8485_v61  ;;  %v8104_v1 = vpack.c.bf16 %v2957_v10, %v2956_v40  ;;  %v5957_v40 = vld [vmem:[%s7388_s9 + $0x1] ss:$0 sm:$0xff]  ;;  %s8495_s9 = sld [smem:[#allocation20_spill]] }
0x10bd   :  { %7033 = vmatpush3.bf16.msra.mxu0 %v8104_v1 }
0x10be   :  { %6625 = vmatprep.subr.mxu0 %v8485_v61 }
0x1176   :  { %v2543_v48 = vpop.f32.mrb[28].mxu1 }
0x1177   :  { %v6560_v28 = vpop.f32.mrb[29].mxu1 }
0x117a   :  { %v2619_v7 = vpop.f32.mrb[30].mxu1 }
0x117b   :  { %v2620_v20 = vadd.f32 %v2619_v7, %v2543_v48  ;;  %v6565_v58 = vpop.f32.mrb[31].mxu1 }
0x117e   :  { %v2781_v24 = vpop.f32.mrb[32].mxu1 }
0x117f   :  { %v2785_v11 = vadd.f32 %v2781_v24, %v2620_v20  ;;  %v6575_v9 = vpop.f32.mrb[33].mxu1 }
0x1182   :  { %v2944_v8 = vpop.f32.mrb[34].mxu1 }
0x1183   :  { %v2948_v43 = vadd.f32 %v2944_v8, %v2785_v11  ;;  %v6585_v39 = vpop.f32.mrb[35].mxu1 }
0x1185   :  { %v8109_v0 = vadd.f32 %v2948_v43, %v7982_v21 }
0x1187   :  { %6603 = vmatmul.mubr.msk.f32.vlgmr.msra.gmra.mrb[30].mxu0 %vm177_vm1, %v8109_v0 }
0x1188   :  { %6626 = vmatpush3.xpose.msk.msra.mxu0 %vm177_vm1, %v8074_v41  ;;  %6627 = vmatprep.mubr.msk.f32.mxu0 %vm7371_vm0, %v8485_v61 }
0x1189   :  { %v3113_v10 = vpop.f32.mrb[36].mxu1  ;;  %6635 = vmatprep.subr.mxu0 %v8485_v61 }
0x118a   :  { %v3114_v48 = vadd.f32 %v5957_v40, %v3113_v10  ;;  %v6609_v28 = vpop.f32.mrb[37].mxu1 }
0x118b   :  { %6628 = vmatmul.mubr.msk.f32.vlgmr.msra.gmra.mrb[32].mxu0 %vm177_vm1, %v7650_v4 }
0x118c   :  { %6636 = vmatpush3.xpose.msk.msra.mxu0 %vm177_vm1, %v8074_v41  ;;  %v3117_v7 = vsel %vm420_vm6, %v3114_v48, -inf  ;;  %6637 = vmatprep.mubr.msk.f32.mxu0 %vm7371_vm0, %v8485_v61 }
0x118d   :  { %3118 = vmax.xlane.f32.xlu1 %v3117_v7  ;;  %v3195_v20 = vpop.f32.mrb[38].mxu1  ;;  %7034 = vmatprep.subr.bf16.mxu0 %v8484_v45 }
0x118e   :  { %v3196_v58 = vadd.f32 %v5957_v40, %v3195_v20  ;;  %v6614_v24 = vpop.f32.mrb[39].mxu1 }
0x118f   :  { %6638 = vmatmul.mubr.msk.f32.vlgmr.msra.gmra.mrb[34].mxu0 %vm177_vm1, %v7664_v6 }
0x1190   :  { %v3199_v11 = vsel %vm420_vm6, %v3196_v58, -inf  ;;  %7036 = vmatpush3.bf16.msra.mxu0 %v7703_v54  ;;  %6661 = vmatprep.mubr.msk.f32.mxu0 %vm7371_vm0, %v8485_v61 }
0x1191   :  { %3200 = vmax.xlane.f32.xlu0 %v3199_v11  ;;  %7037 = vmatprep.subr.bf16.mxu0 %v8484_v45 }
0x1194   :  { %7039 = vmatpush3.bf16.msra.mxu0 %v7707_v57 }
0x1195   :  { %7040 = vmatprep.subr.bf16.mxu0 %v8484_v45 }
0x1198   :  { %7042 = vmatpush3.bf16.msra.mxu0 %v7724_v16 }
0x1199   :  { %7043 = vmatprep.subr.bf16.mxu0 %v8484_v45 }
0x119c   :  { %7045 = vmatpush3.bf16.msra.mxu0 %v7730_v19 }
0x119d   :  { %7058 = vmatprep.subr.bf16.mxu0 %v8484_v45 }
0x121a   :  { %v3119_v54 = vpop.xlane.xlu1 %3118 }
0x121b   :  { %v3120_v9 = vsub.f32 %v3114_v48, %v3119_v54  ;;  %v3128_v54 = vmul.f32 %v8074_v41, %v7672_v12 }
0x121d   :  { %v3121_v43 = vmul.f32 1.442695, %v3120_v9  ;;  %v3448_v9 = vmul.f32 %v8074_v41, %v7695_v49  ;;  %v3609_v49 = vmul.f32 %v8074_v41, %v7676_v14 }
0x121e   :  { %v3201_v4 = vpop.xlane.xlu0 %3200 }
0x121f   :  { %v3202_v6 = vsub.f32 %v3196_v58, %v3201_v4 }
0x1221   :  { %v3203_v8 = vmul.f32 1.442695, %v3202_v6 }
0x1223   :  { %7235 = vpow2.f32 %v3203_v8 }
0x1224   :  { %7237 = vpow2.f32 %v3121_v43 }
0x122d   :  { %v7236_v20 = vpop.eup %7235 }
0x122e   :  { %v3205_v58 = vsel %vm420_vm6, %v7236_v20, 0.0  ;;  %v7238_v4 = vpop.eup %7237 }
0x122f   :  { %v3123_v6 = vsel %vm420_vm6, %v7238_v4, 0.0 }
0x125a   :  { %v8140_v39 = vpop.f32.mrb[30].mxu0 }
0x125b   :  { %v6604_v57 = vpop.f32.mrb[31].mxu0 }
0x125e   :  { %v3433_v10 = vpop.f32.mrb[32].mxu0 }
0x125f   :  { %v3434_v28 = vadd.f32 %v5957_v40, %v3433_v10  ;;  %v6629_v16 = vpop.f32.mrb[33].mxu0 }
0x1261   :  { %v3437_v7 = vsel %vm420_vm6, %v3434_v28, -inf }
0x1262   :  { %3438 = vmax.xlane.f32.xlu0 %v3437_v7  ;;  %v3594_v19 = vpop.f32.mrb[34].mxu0 }
0x1263   :  { %v3595_v24 = vadd.f32 %v5957_v40, %v3594_v19  ;;  %v6639_v11 = vpop.f32.mrb[35].mxu0 }
0x1265   :  { %v3598_v48 = vsel %vm420_vm6, %v3595_v24, -inf }
0x1266   :  { %3206 = vadd.xlane.f32.xlu0 %v3205_v58  ;;  %3599 = vmax.xlane.f32.xlu1 %v3598_v48 }
0x126a   :  { %3124 = vadd.xlane.f32.xlu1 %v3123_v6 }
0x127b   :  { %3290 = vrot.lane.b32.xlu1 %v3128_v54, %s7373_s0 }
0x127f   :  { %3450 = vrot.lane.b32.xlu1 %v3448_v9, %s7373_s0 }
0x12ef   :  { %v3439_v40 = vpop.xlane.xlu0 %3438 }
0x12f0   :  { %v3440_v8 = vsub.f32 %v3434_v28, %v3439_v40  ;;  %v3210_v28 = vmul.f32 %v8074_v41, %v7621_v55 }
0x12f2   :  { %v3441_v43 = vmul.f32 1.442695, %v3440_v8 }
0x12f3   :  { %v3600_v57 = vpop.xlane.xlu1 %3599 }
0x12f4   :  { %7239 = vpow2.f32 %v3441_v43  ;;  %v3601_v10 = vsub.f32 %v3595_v24, %v3600_v57  ;;  %v3207_v24 = vpop.xlane.xlu0 %3206 }
0x12f6   :  { %v3602_v16 = vmul.f32 1.442695, %v3601_v10 }
0x12f7   :  { %v3125_v58 = vpop.xlane.xlu1 %3124 }
0x12f8   :  { %7241 = vpow2.f32 %v3602_v16 }
0x12f9   :  { %7243 = vrcp.f32 %v3207_v24 }
0x12fa   :  { %7245 = vrcp.f32 %v3125_v58 }
0x12fb   :  { %v3291_v48 = vpop.permute.xlu1 %3290 }
0x12fe   :  { %v7240_v7 = vpop.eup %7239 }
0x12ff   :  { %v3443_v19 = vsel %vm420_vm6, %v7240_v7, 0.0  ;;  %v3451_v6 = vpop.permute.xlu1 %3450 }
0x1300   :  { %3444 = vadd.xlane.f32.xlu0 %v3443_v19 }
0x1302   :  { %v7242_v12 = vpop.eup %7241 }
0x1303   :  { %v3604_v11 = vsel %vm420_vm6, %v7242_v12, 0.0  ;;  %v7244_v9 = vpop.eup %7243  ;;  %vm5667_vm6 = vcmask 261120  }
0x1304   :  { %3605 = vadd.xlane.f32.xlu1 %v3604_v11  ;;  %v3209_v40 = vmul.f32 %v7244_v9, %v7236_v20  ;;  %v7246_v14 = vpop.eup %7245 }
0x1305   :  { %v3127_v55 = vmul.f32 %v7246_v14, %v7238_v4  ;;  %v7290_v14 = vld [vmem:[%s8467_s13] ss:$0 sm:$0xff] }
0x1315   :  { %3611 = vrot.lane.b32.xlu1 %v3609_v49, %s7373_s0 }
0x1316   :  { %3212 = vrot.lane.b32.xlu0 %v3210_v28, %s7373_s0 }
0x138d   :  { %v3445_v54 = vpop.xlane.xlu0 %3444 }
0x138e   :  { %7247 = vrcp.f32 %v3445_v54 }
0x1391   :  { %v3213_v8 = vpop.permute.xlu0 %3212  ;;  %v3606_v43 = vpop.xlane.xlu1 %3605 }
0x1392   :  { %7249 = vrcp.f32 %v3606_v43  ;;  %6616 = vmatpush3.msk.msra.mxu1 %vm535_vm10, %v3213_v8 }
0x1393   :  { %6618 = vmatmul.mubr.msk.f32.vlgmr.msra.gmra.mrb[40].mxu1 %vm531_vm14, %v3209_v40  ;;  %6620 = vmatprep.subr.mxu1 %v8485_v61 }
0x1394   :  { %6621 = vmatpush3.msk.msra.mxu1 %vm535_vm10, %v3291_v48  ;;  %6622 = vmatprep.mubr.msk.f32.mxu1 %vm7371_vm0, %v8485_v61 }
0x1395   :  { %6630 = vmatprep.subr.mxu1 %v8485_v61  ;;  %v3612_v57 = vpop.permute.xlu1 %3611 }
0x1397   :  { %6623 = vmatmul.mubr.msk.f32.vlgmr.msra.gmra.mrb[42].mxu1 %vm531_vm14, %v3127_v55 }
0x1398   :  { %v7248_v41 = vpop.eup %7247  ;;  %6631 = vmatpush3.msk.msra.mxu1 %vm535_vm10, %v3451_v6  ;;  %6632 = vmatprep.mubr.msk.f32.mxu1 %vm7371_vm0, %v8485_v61 }
0x1399   :  { %v3447_v20 = vmul.f32 %v7248_v41, %v7240_v7  ;;  %6640 = vmatprep.subr.mxu1 %v8485_v61 }
0x139b   :  { %6633 = vmatmul.mubr.msk.f32.vlgmr.msra.gmra.mrb[44].mxu1 %vm531_vm14, %v3447_v20 }
0x139c   :  { %v7250_v10 = vpop.eup %7249  ;;  %6641 = vmatpush3.msk.msra.mxu1 %vm535_vm10, %v3612_v57  ;;  %6642 = vmatprep.mubr.msk.f32.mxu1 %vm7371_vm0, %v8485_v61 }
0x139d   :  { %v3608_v4 = vmul.f32 %v7250_v10, %v7242_v12  ;;  %7046 = vmatprep.subr.bf16.mxu1 %v8484_v45 }
0x139f   :  { %6643 = vmatmul.mubr.msk.f32.vlgmr.msra.gmra.mrb[46].mxu1 %vm531_vm14, %v3608_v4 }
0x13a0   :  { %7048 = vmatpush3.bf16.msra.mxu1 %v7736_v22  ;;  %6680 = vmatprep.mubr.msk.f32.mxu1 %vm7371_vm0, %v8485_v61 }
0x13a1   :  { %7049 = vmatprep.subr.bf16.mxu1 %v8484_v45 }
0x13a4   :  { %7051 = vmatpush3.bf16.msra.mxu1 %v7741_v25 }
0x13a5   :  { %7052 = vmatprep.subr.bf16.mxu1 %v8484_v45 }
0x13a8   :  { %7054 = vmatpush3.bf16.msra.mxu1 %v7747_v29 }
0x13a9   :  { %7055 = vmatprep.subr.bf16.mxu1 %v8484_v45 }
0x13ac   :  { %7057 = vmatpush3.bf16.msra.mxu1 %v7775_v60  ;;  %v7287_v60 = vld [vmem:[%s7413_s29] ss:$0 sm:$0xff]  ;;  %s8496_s29 = sld [smem:[#allocation17_spill]] }
0x13ad   :  { %7070 = vmatprep.subr.bf16.mxu1 %v8484_v45 }
0x1466   :  { %v3285_v16 = vpop.f32.mrb[40].mxu1 }
0x1467   :  { %v6619_v7 = vpop.f32.mrb[41].mxu1 }
0x146a   :  { %v3363_v22 = vpop.f32.mrb[42].mxu1 }
0x146b   :  { %v3364_v19 = vadd.f32 %v3363_v22, %v3285_v16  ;;  %v6624_v12 = vpop.f32.mrb[43].mxu1 }
0x146e   :  { %v3523_v11 = vpop.f32.mrb[44].mxu1 }
0x146f   :  { %v3527_v49 = vadd.f32 %v3523_v11, %v3364_v19  ;;  %v6634_v28 = vpop.f32.mrb[45].mxu1 }
0x1472   :  { %v3684_v25 = vpop.f32.mrb[46].mxu1 }
0x1473   :  { %v3688_v24 = vadd.f32 %v3684_v25, %v3527_v49  ;;  %v6644_v58 = vpop.f32.mrb[47].mxu1 }
0x1475   :  { %v3689_v29 = vadd.f32 %v3688_v24, %v7593_v37 }
0x1477   :  { %6662 = vmatmul.mubr.msk.f32.vlgmr.msra.gmra.mrb[36].mxu0 %vm177_vm1, %v3689_v29 }
0x1478   :  { %7060 = vmatpush3.bf16.msra.mxu0 %v7754_v46  ;;  %6699 = vmatprep.mubr.msk.f32.mxu0 %vm7371_vm0, %v8485_v61 }
0x1479   :  { %7061 = vmatprep.subr.bf16.mxu0 %v8484_v45 }
0x147c   :  { %7063 = vmatpush3.bf16.msra.mxu0 %v7761_v51 }
0x147d   :  { %7064 = vmatprep.subr.bf16.mxu0 %v8484_v45 }
0x1480   :  { %7066 = vmatpush3.bf16.msra.mxu0 %v7770_v56 }
0x1481   :  { %7067 = vmatprep.subr.bf16.mxu0 %v8484_v45 }
0x1484   :  { %7069 = vmatpush3.bf16.msra.mxu0 %v7780_v2  ;;  %v7288_v2 = vld [vmem:[%s7423_s8] ss:$0 sm:$0xff]  ;;  %s8497_s8 = sld [smem:[#allocation19_spill]] }
0x1485   :  { %6721 = vmatprep.subr.mxu0 %v8485_v61 }
0x154a   :  { %v3759_v37 = vpop.f32.mrb[36].mxu0 }
0x154b   :  { %v3760_v46 = vadd.f32 %v7287_v60, %v3759_v37  ;;  %v6663_v48 = vpop.f32.mrb[37].mxu0 }
0x154d   :  { %v3763_v6 = vmax.f32 %v3760_v46, 0.0 }
0x154f   :  { %v3764_v54 = vadd.f32 %v3763_v6, %v3689_v29 }
0x1551   :  { %6681 = vmatmul.mubr.msk.f32.vlgmr.msra.gmra.mrb[48].mxu1 %vm177_vm1, %v3764_v54  ;;  %6700 = vmatmul.mubr.msk.f32.vlgmr.msra.gmra.mrb[38].mxu0 %vm177_vm1, %v3764_v54 }
0x1552   :  { %7072 = vmatpush3.bf16.msra.mxu1 %v7789_v17  ;;  %6718 = vmatprep.mubr.msk.f32.mxu1 %vm7371_vm0, %v8485_v61 }
0x1553   :  { %7073 = vmatprep.subr.bf16.mxu1 %v8484_v45  ;;  %6723 = vmatprep.mubr.msk.f32.mxu0 %vm7371_vm0, %v8485_v61 }
0x1556   :  { %7075 = vmatpush3.bf16.msra.mxu1 %v7796_v23  ;;  %v7289_v23 = vld [vmem:[%s7433_s19] ss:$0 sm:$0xff]  ;;  %s7374_s19 = smov [#allocation5]  }
0x1557   :  { %7076 = vmatprep.subr.bf16.mxu1 %v8484_v45 }
0x155a   :  { %7078 = vmatpush3.bf16.msra.mxu1 %v7806_v27 }
0x155b   :  { %7079 = vmatprep.subr.bf16.mxu1 %v8484_v45 }
0x155e   :  { %7081 = vmatpush3.bf16.msra.mxu1 %v7812_v36 }
0x155f   :  { %6726 = vmatprep.subr.mxu1 %v8485_v61 }
0x1561   :  { %6719 = vmatmul.mubr.msk.f32.vlgmr.msra.gmra.mrb[50].mxu1 %vm177_vm1, %v3764_v54 }
0x1562   :  { %6728 = vmatprep.mubr.msk.f32.mxu1 %vm7371_vm0, %v8485_v61 }
0x1624   :  { %v3834_v51 = vpop.f32.mrb[48].mxu1  ;;  %v3904_v56 = vpop.f32.mrb[38].mxu0 }
0x1625   :  { %v8219_v17 = vadd.f32 %v7288_v2, %v3834_v51  ;;  %v3905_v9 = vadd.f32 %v7289_v23, %v3904_v56  ;;  %v6682_v27 = vpop.f32.mrb[49].mxu1  ;;  %v6701_v40 = vpop.f32.mrb[39].mxu0 }
0x1627   :  { %6722 = vmatpush3.xpose.msk.msra.mxu0 %vm177_vm1, %v3905_v9  ;;  %6727 = vmatpush3.xpose.msk.msra.mxu1 %vm177_vm1, %v3905_v9  ;;  %v3978_v36 = vmul.f32 %v8219_v17, %v7588_v34  ;;  %v4067_v8 = vmul.f32 %v8219_v17, %v7591_v35  ;;  %v4305_v51 = vmul.f32 %v8219_v17, %v7641_v3 }
0x1628   :  { %6731 = vmatprep.subr.mxu0 %v8485_v61  ;;  %6736 = vmatprep.subr.mxu1 %v8485_v61  ;;  %v4468_v2 = vmul.f32 %v8219_v17, %v7654_v5 }
0x162a   :  { %6724 = vmatmul.mubr.msk.f32.vlgmr.msra.gmra.mrb[40].mxu0 %vm177_vm1, %v3978_v36  ;;  %6729 = vmatmul.mubr.msk.f32.vlgmr.msra.gmra.mrb[52].mxu1 %vm177_vm1, %v4067_v8 }
0x162b   :  { %6733 = vmatprep.mubr.msk.f32.mxu0 %vm7371_vm0, %v8485_v61  ;;  %6738 = vmatprep.mubr.msk.f32.mxu1 %vm7371_vm0, %v8485_v61 }
0x1634   :  { %v3974_v43 = vpop.f32.mrb[50].mxu1 }
0x1635   :  { %v8237_v34 = vadd.f32 %v7290_v14, %v3974_v43  ;;  %v6720_v55 = vpop.f32.mrb[51].mxu1 }
0x1637   :  { %v4066_v35 = vmul.f32 %v7581_v31, %v8237_v34  ;;  %v4152_v41 = vmul.f32 %v7584_v32, %v8237_v34  ;;  %v4390_v56 = vmul.f32 %v7638_v62, %v8237_v34 }
0x1639   :  { %6732 = vmatpush3.msk.msra.mxu0 %vm1555_vm15, %v4152_v41  ;;  %6737 = vmatpush3.msk.msra.mxu1 %vm1555_vm15, %v4066_v35 }
0x163a   :  { %6741 = vmatprep.subr.mxu0 %v8485_v61  ;;  %6746 = vmatprep.subr.mxu1 %v8485_v61 }
0x16fd   :  { %v4051_v20 = vpop.f32.mrb[40].mxu0  ;;  %v4137_v57 = vpop.f32.mrb[52].mxu1 }
0x16fe   :  { %v6725_v10 = vpop.f32.mrb[41].mxu0  ;;  %v6730_v4 = vpop.f32.mrb[53].mxu1  ;;  %v4141_v16 = vsel %vm1452_vm2, %v4137_v57, -inf  ;;  %v4055_v7 = vsel %vm1452_vm2, %v4051_v20, -inf }
0x16ff   :  { %4142 = vmax.xlane.f32.xlu0 %v4141_v16 }
0x1703   :  { %4056 = vmax.xlane.f32.xlu0 %v4055_v7 }
0x178c   :  { %v4143_v22 = vpop.xlane.xlu0 %4142 }
0x178d   :  { %v4144_v19 = vsub.f32 %v4137_v57, %v4143_v22 }
0x178f   :  { %v4145_v12 = vmul.f32 1.442695, %v4144_v19 }
0x1790   :  { %v4057_v11 = vpop.xlane.xlu0 %4056 }
0x1791   :  { %7251 = vpow2.f32 %v4145_v12  ;;  %v4058_v49 = vsub.f32 %v4051_v20, %v4057_v11  ;;  %v4553_v12 = vmul.f32 %v7631_v59, %v8237_v34 }
0x1793   :  { %v4059_v28 = vmul.f32 1.442695, %v4058_v49 }
0x1795   :  { %7253 = vpow2.f32 %v4059_v28 }
0x179b   :  { %v7252_v25 = vpop.eup %7251 }
0x179c   :  { %v4147_v24 = vsel %vm1452_vm2, %v7252_v25, 0.0 }
0x179d   :  { %4148 = vadd.xlane.f32.xlu1 %v4147_v24 }
0x179f   :  { %v7254_v58 = vpop.eup %7253 }
0x17a0   :  { %v4061_v29 = vsel %vm1452_vm2, %v7254_v58, 0.0 }
0x17a1   :  { %4062 = vadd.xlane.f32.xlu1 %v4061_v29 }
0x182a   :  { %v4149_v37 = vpop.xlane.xlu1 %4148 }
0x182b   :  { %7255 = vrcp.f32 %v4149_v37 }
0x182e   :  { %v4063_v60 = vpop.xlane.xlu1 %4062 }
0x182f   :  { %7257 = vrcp.f32 %v4063_v60 }
0x1835   :  { %v7256_v46 = vpop.eup %7255 }
0x1836   :  { %v4151_v48 = vmul.f32 %v7256_v46, %v7252_v25  ;;  %v8488_v46 = vld [vmem:[#allocation23_spill] sm:$0xff] }
0x1838   :  { %6734 = vmatmul.mubr.msk.f32.vlgmr.msra.gmra.mrb[42].mxu0 %vm1551_vm3, %v4151_v48 }
0x1839   :  { %v7258_v6 = vpop.eup %7257  ;;  %6742 = vmatpush3.xpose.msk.msra.mxu0 %vm177_vm1, %v3905_v9  ;;  %6743 = vmatprep.mubr.msk.f32.mxu0 %vm7371_vm0, %v8485_v61 }
0x183a   :  { %v4065_v54 = vmul.f32 %v7258_v6, %v7254_v58  ;;  %6751 = vmatprep.subr.mxu0 %v8485_v61 }
0x183c   :  { %6739 = vmatmul.mubr.msk.f32.vlgmr.msra.gmra.mrb[54].mxu1 %vm1551_vm3, %v4065_v54  ;;  %6744 = vmatmul.mubr.msk.f32.vlgmr.msra.gmra.mrb[44].mxu0 %vm177_vm1, %v4305_v51  ;;  %v8489_v51 = vld [vmem:[#allocation24_spill] sm:$0xff] }
0x183d   :  { %6747 = vmatpush3.msk.msra.mxu1 %vm1555_vm15, %v4390_v56  ;;  %6752 = vmatpush3.xpose.msk.msra.mxu0 %vm177_vm1, %v3905_v9 }
0x183e   :  { %6753 = vmatprep.mubr.msk.f32.mxu0 %vm7371_vm0, %v8485_v61  ;;  %6748 = vmatprep.mubr.msk.f32.mxu1 %vm7371_vm0, %v8485_v61 }
0x183f   :  { %6756 = vmatprep.subr.mxu1 %v8485_v61  ;;  %7082 = vmatprep.subr.bf16.mxu0 %v8484_v45 }
0x1840   :  { %6754 = vmatmul.mubr.msk.f32.vlgmr.msra.gmra.mrb[46].mxu0 %vm177_vm1, %v4468_v2  ;;  %v8490_v2 = vld [vmem:[#allocation25_spill] sm:$0xff] }
0x1841   :  { %7084 = vmatpush3.bf16.msra.mxu0 %v7884_v47  ;;  %6777 = vmatprep.mubr.msk.f32.mxu0 %vm7371_vm0, %v8485_v61 }
0x1842   :  { %7085 = vmatprep.subr.bf16.mxu0 %v8484_v45 }
0x1845   :  { %7087 = vmatpush3.bf16.msra.mxu0 %v7888_v63 }
0x1846   :  { %7088 = vmatprep.subr.bf16.mxu0 %v8484_v45 }
0x1849   :  { %7090 = vmatpush3.bf16.msra.mxu0 %v7905_v26 }
0x184a   :  { %7091 = vmatprep.subr.bf16.mxu0 %v8484_v45 }
0x184d   :  { %7093 = vmatpush3.bf16.msra.mxu0 %v7911_v38 }
0x184e   :  { %7106 = vmatprep.subr.bf16.mxu0 %v8484_v45 }
0x190b   :  { %v4225_v3 = vpop.f32.mrb[42].mxu0 }
0x190c   :  { %v6735_v5 = vpop.f32.mrb[43].mxu0 }
0x190f   :  { %v4301_v47 = vpop.f32.mrb[54].mxu1  ;;  %v4375_v23 = vpop.f32.mrb[44].mxu0 }
0x1910   :  { %v4302_v9 = vadd.f32 %v4301_v47, %v4225_v3  ;;  %v6740_v27 = vpop.f32.mrb[55].mxu1  ;;  %v6745_v40 = vpop.f32.mrb[45].mxu0  ;;  %v4379_v36 = vsel %vm1452_vm2, %v4375_v23, -inf  ;;  %v8491_v3 = vld [vmem:[#allocation26_spill] sm:$0xff]  ;;  %v8492_v47 = vld [vmem:[#allocation27_spill] sm:$0xff] }
0x1911   :  { %4380 = vmax.xlane.f32.xlu0 %v4379_v36 }
0x1913   :  { %v4538_v63 = vpop.f32.mrb[46].mxu0 }
0x1914   :  { %v6755_v8 = vpop.f32.mrb[47].mxu0  ;;  %v4542_v26 = vsel %vm1452_vm2, %v4538_v63, -inf }
0x1915   :  { %4543 = vmax.xlane.f32.xlu0 %v4542_v26 }
0x199e   :  { %v4381_v43 = vpop.xlane.xlu0 %4380 }
0x199f   :  { %v4382_v14 = vsub.f32 %v4375_v23, %v4381_v43  ;;  %v8493_v23 = vld [vmem:[#allocation28_spill] sm:$0xff] }
0x19a1   :  { %v4383_v38 = vmul.f32 1.442695, %v4382_v14 }
0x19a2   :  { %v4544_v55 = vpop.xlane.xlu0 %4543 }
0x19a3   :  { %7259 = vpow2.f32 %v4383_v38  ;;  %v4545_v35 = vsub.f32 %v4538_v63, %v4544_v55 }
0x19a5   :  { %v4546_v41 = vmul.f32 1.442695, %v4545_v35 }
0x19a7   :  { %7261 = vpow2.f32 %v4546_v41 }
0x19ad   :  { %v7260_v20 = vpop.eup %7259 }
0x19ae   :  { %v4385_v57 = vsel %vm1452_vm2, %v7260_v20, 0.0 }
0x19af   :  { %4386 = vadd.xlane.f32.xlu0 %v4385_v57 }
0x19b1   :  { %v7262_v10 = vpop.eup %7261 }
0x19b2   :  { %v4548_v4 = vsel %vm1452_vm2, %v7262_v10, 0.0 }
0x19b3   :  { %4549 = vadd.xlane.f32.xlu1 %v4548_v4 }
0x1a3c   :  { %v4387_v16 = vpop.xlane.xlu0 %4386 }
0x1a3d   :  { %7263 = vrcp.f32 %v4387_v16 }
0x1a40   :  { %v4550_v7 = vpop.xlane.xlu1 %4549 }
0x1a41   :  { %7265 = vrcp.f32 %v4550_v7 }
0x1a47   :  { %v7264_v22 = vpop.eup %7263 }
0x1a48   :  { %v4389_v19 = vmul.f32 %v7264_v22, %v7260_v20 }
0x1a4a   :  { %6749 = vmatmul.mubr.msk.f32.vlgmr.msra.gmra.mrb[56].mxu1 %vm1551_vm3, %v4389_v19 }
0x1a4b   :  { %v7266_v11 = vpop.eup %7265  ;;  %6757 = vmatpush3.msk.msra.mxu1 %vm1555_vm15, %v4553_v12  ;;  %6758 = vmatprep.mubr.msk.f32.mxu1 %vm7371_vm0, %v8485_v61 }
0x1a4c   :  { %v4552_v49 = vmul.f32 %v7266_v11, %v7262_v10  ;;  %7094 = vmatprep.subr.bf16.mxu1 %v8484_v45 }
0x1a4e   :  { %6759 = vmatmul.mubr.msk.f32.vlgmr.msra.gmra.mrb[58].mxu1 %vm1551_vm3, %v4552_v49 }
0x1a4f   :  { %7096 = vmatpush3.bf16.msra.mxu1 %v7917_v44  ;;  %6796 = vmatprep.mubr.msk.f32.mxu1 %vm7371_vm0, %v8485_v61 }
0x1a50   :  { %7097 = vmatprep.subr.bf16.mxu1 %v8484_v45 }
0x1a53   :  { %7099 = vmatpush3.bf16.msra.mxu1 %v7922_v50  ;;  %v8486_v50 = vld [vmem:[#allocation21_spill] sm:$0xff] }
0x1a54   :  { %7100 = vmatprep.subr.bf16.mxu1 %v8484_v45 }
0x1a57   :  { %7102 = vmatpush3.bf16.msra.mxu1 %v7946_v30 }
0x1a58   :  { %7103 = vmatprep.subr.bf16.mxu1 %v8484_v45 }
0x1a5b   :  { %7105 = vmatpush3.bf16.msra.mxu1 %v7958_v52  ;;  %v8487_v52 = vld [vmem:[#allocation22_spill] sm:$0xff] }
0x1a5c   :  { %6818 = vmatprep.subr.mxu1 %v8485_v61 }
0x1b1d   :  { %v4463_v34 = vpop.f32.mrb[56].mxu1 }
0x1b1e   :  { %v4467_v28 = vadd.f32 %v4463_v34, %v4302_v9  ;;  %v6750_v44 = vpop.f32.mrb[57].mxu1 }
0x1b21   :  { %v4626_v25 = vpop.f32.mrb[58].mxu1 }
0x1b22   :  { %v4630_v24 = vadd.f32 %v4626_v25, %v4467_v28  ;;  %v6760_v58 = vpop.f32.mrb[59].mxu1 }
0x1b24   :  { %v4631_v29 = vadd.f32 %v4630_v24, %v8219_v17 }
0x1b26   :  { %6778 = vmatmul.mubr.msk.f32.vlgmr.msra.gmra.mrb[48].mxu0 %vm177_vm1, %v4631_v29 }
0x1b27   :  { %7108 = vmatpush3.bf16.msra.mxu0 %v7929_v15  ;;  %6815 = vmatprep.mubr.msk.f32.mxu0 %vm7371_vm0, %v8485_v61 }
0x1b28   :  { %7109 = vmatprep.subr.bf16.mxu0 %v8484_v45 }
0x1b2b   :  { %7111 = vmatpush3.bf16.msra.mxu0 %v7936_v18 }
0x1b2c   :  { %7112 = vmatprep.subr.bf16.mxu0 %v8484_v45 }
0x1b2f   :  { %7114 = vmatpush3.bf16.msra.mxu0 %v7949_v53 }
0x1b30   :  { %7115 = vmatprep.subr.bf16.mxu0 %v8484_v45 }
0x1b33   :  { %7117 = vmatpush3.bf16.msra.mxu0 %v8486_v50 }
0x1b34   :  { %6838 = vmatprep.subr.mxu0 %v8485_v61 }
0x1bf9   :  { %v4701_v30 = vpop.f32.mrb[48].mxu0 }
0x1bfa   :  { %v4702_v15 = vadd.f32 %v8487_v52, %v4701_v30  ;;  %v6779_v17 = vpop.f32.mrb[49].mxu0 }
0x1bfc   :  { %v4705_v37 = vmax.f32 %v4702_v15, 0.0 }
0x1bfe   :  { %v4706_v60 = vadd.f32 %v4705_v37, %v4631_v29 }
0x1c00   :  { %6797 = vmatmul.mubr.msk.f32.vlgmr.msra.gmra.mrb[60].mxu1 %vm177_vm1, %v4706_v60  ;;  %6816 = vmatmul.mubr.msk.f32.vlgmr.msra.gmra.mrb[50].mxu0 %vm177_vm1, %v4706_v60 }
0x1c01   :  { %6820 = vmatprep.mubr.msk.f32.mxu1 %vm7371_vm0, %v8485_v61  ;;  %6840 = vmatprep.mubr.msk.f32.mxu0 %vm7371_vm0, %v8485_v61 }
0x1cd3   :  { %v4776_v18 = vpop.f32.mrb[60].mxu1  ;;  %v4846_v53 = vpop.f32.mrb[50].mxu0 }
0x1cd4   :  { %v4777_v48 = vadd.f32 %v8488_v46, %v4776_v18  ;;  %v6798_v6 = vpop.f32.mrb[61].mxu1  ;;  %v6817_v54 = vpop.f32.mrb[51].mxu0  ;;  %v8329_v56 = vadd.f32 %v8489_v51, %v4846_v53  ;;  %v5568_v46 = vld [vmem:[%s8494_s5] sm:$0xff] }
0x1cd5   :  { %v5570_v6 = vld [vmem:[%s8494_s5 + $0x10] sm:$0xff] }
0x1cd6   :  { %6819 = vmatpush3.xpose.msk.msra.mxu1 %vm177_vm1, %v4777_v48  ;;  %6839 = vmatpush3.xpose.msk.msra.mxu0 %vm177_vm1, %v4777_v48  ;;  %v5016_v5 = vmul.f32 %v7584_v32, %v8329_v56  ;;  %v4934_v15 = vmul.f32 %v7581_v31, %v8329_v56  ;;  %v5250_v60 = vmul.f32 %v7638_v62, %v8329_v56 }
0x1cd7   :  { %6823 = vmatprep.subr.mxu1 %v8485_v61  ;;  %6848 = vmatprep.subr.mxu0 %v8485_v61  ;;  %v5409_v53 = vmul.f32 %v7631_v59, %v8329_v56  ;;  %v5571_v59 = vld [vmem:[%s8494_s5 + $0x18] sm:$0xff] }
0x1cd8   :  { %v7134_v51 = vpack.c.bf16 %v5571_v59, %v5570_v6 }
0x1cd9   :  { %6821 = vmatmul.mubr.msk.f32.vlgmr.msra.gmra.mrb[62].mxu1 %vm177_vm1, %v8490_v2  ;;  %6841 = vmatmul.mubr.msk.f32.vlgmr.msra.gmra.mrb[52].mxu0 %vm177_vm1, %v8491_v3 }
0x1cda   :  { %6824 = vmatpush3.xpose.msk.msra.mxu1 %vm177_vm1, %v4777_v48  ;;  %6849 = vmatpush3.xpose.msk.msra.mxu0 %vm177_vm1, %v4777_v48  ;;  %v5569_v48 = vld [vmem:[%s8494_s5 + $0x8] sm:$0xff] }
0x1cdb   :  { %6825 = vmatprep.mubr.msk.f32.mxu1 %vm7371_vm0, %v8485_v61  ;;  %6850 = vmatprep.mubr.msk.f32.mxu0 %vm7371_vm0, %v8485_v61  ;;  %v7131_v54 = vpack.c.bf16 %v5569_v48, %v5568_v46 }
0x1cdc   :  { %6828 = vmatprep.subr.mxu1 %v8485_v61  ;;  %7118 = vmatprep.subr.bf16.mxu0 %v8484_v45 }
0x1cdd   :  { %6826 = vmatmul.mubr.msk.f32.vlgmr.msra.gmra.mrb[64].mxu1 %vm177_vm1, %v8492_v47  ;;  %6851 = vmatmul.mubr.msk.f32.vlgmr.msra.gmra.mrb[54].mxu0 %vm177_vm1, %v8493_v23 }
0x1cde   :  { %6829 = vmatpush3.msk.msra.mxu1 %vm1555_vm15, %v5016_v5  ;;  %6830 = vmatprep.mubr.msk.f32.mxu1 %vm7371_vm0, %v8485_v61 }
0x1cdf   :  { %6833 = vmatprep.subr.mxu1 %v8485_v61  ;;  %7120 = vmatpush3.bf16.msra.mxu0 %v8045_v42 }
0x1ce0   :  { %6874 = vmatprep.mubr.msk.f32.mxu0 %vm7371_vm0, %v8485_v61  ;;  %7121 = vmatprep.subr.bf16.mxu0 %v8484_v45 }
0x1ce3   :  { %7123 = vmatpush3.bf16.msra.mxu0 %v8092_v33 }
0x1ce4   :  { %7124 = vmatprep.subr.bf16.mxu0 %v8484_v45 }
0x1ce7   :  { %7126 = vmatpush3.bf16.msra.mxu0 %v8098_v13 }
0x1ce8   :  { %7127 = vmatprep.subr.bf16.mxu0 %v8484_v45 }
0x1ceb   :  { %7129 = vmatpush3.bf16.msra.mxu0 %v8104_v1 }
0x1cec   :  { %7142 = vmatprep.subr.bf16.mxu0 %v8484_v45 }
0x1dac   :  { %v4919_v32 = vpop.f32.mrb[62].mxu1  ;;  %v5235_v9 = vpop.f32.mrb[52].mxu0 }
0x1dad   :  { %v6822_v42 = vpop.f32.mrb[63].mxu1  ;;  %v4923_v27 = vsel %vm2372_vm4, %v4919_v32, -inf  ;;  %v6842_v40 = vpop.f32.mrb[53].mxu0  ;;  %v5239_v1 = vsel %vm2372_vm4, %v5235_v9, -inf }
0x1dae   :  { %4924 = vmax.xlane.f32.xlu1 %v4923_v27 }
0x1db0   :  { %v5001_v36 = vpop.f32.mrb[64].mxu1  ;;  %v5394_v63 = vpop.f32.mrb[54].mxu0 }
0x1db1   :  { %v6827_v33 = vpop.f32.mrb[65].mxu1  ;;  %v5005_v8 = vsel %vm2372_vm4, %v5001_v36, -inf  ;;  %v6852_v26 = vpop.f32.mrb[55].mxu0  ;;  %v5398_v13 = vsel %vm2372_vm4, %v5394_v63, -inf }
0x1db2   :  { %5006 = vmax.xlane.f32.xlu0 %v5005_v8  ;;  %5399 = vmax.xlane.f32.xlu1 %v5398_v13  ;;  %v5573_v33 = vld [vmem:[%s8494_s5 + $0x28] sm:$0xff]  ;;  %v5574_v26 = vld [vmem:[%s8494_s5 + $0x30] sm:$0xff]  ;;  %v5575_v13 = vld [vmem:[%s8494_s5 + $0x38] sm:$0xff] }
0x1db6   :  { %5240 = vmax.xlane.f32.xlu0 %v5239_v1  ;;  %v7140_v1 = vpack.c.bf16 %v5575_v13, %v5574_v26 }
0x1e3b   :  { %v4925_v43 = vpop.xlane.xlu1 %4924 }
0x1e3c   :  { %v4926_v14 = vsub.f32 %v4919_v32, %v4925_v43  ;;  %v5656_v43 = vld [vmem:[%s8495_s9] sm:$0xff] }
0x1e3e   :  { %v4927_v38 = vmul.f32 1.442695, %v4926_v14  ;;  %v5657_v14 = vld [vmem:[%s8495_s9 + $0x8] sm:$0xff] }
0x1e3f   :  { %v5007_v55 = vpop.xlane.xlu0 %5006  ;;  %v5400_v41 = vpop.xlane.xlu1 %5399 }
0x1e40   :  { %7267 = vpow2.f32 %v4927_v38  ;;  %v5008_v35 = vsub.f32 %v5001_v36, %v5007_v55  ;;  %v5401_v20 = vsub.f32 %v5394_v63, %v5400_v41  ;;  %v5572_v63 = vld [vmem:[%s8494_s5 + $0x20] sm:$0xff] }
0x1e41   :  { %v7137_v8 = vpack.c.bf16 %v5573_v33, %v5572_v63  ;;  %v2958_v38 = vld [vmem:[%s8496_s29] sm:$0x1] }
0x1e42   :  { %v5009_v57 = vmul.f32 1.442695, %v5008_v35  ;;  %v5402_v10 = vmul.f32 1.442695, %v5401_v20  ;;  %v3029_v55 = vadd.f32 %v8140_v39, %v2958_v38  ;;  %v5659_v39 = vld [vmem:[%s8495_s9 + $0x18] sm:$0xff] }
0x1e43   :  { %v5241_v4 = vpop.xlane.xlu0 %5240 }
0x1e44   :  { %7269 = vpow2.f32 %v5009_v57  ;;  %v5242_v16 = vsub.f32 %v5235_v9, %v5241_v4  ;;  %v3032_v57 = vmax.f32 %v3029_v55, 0.0 }
0x1e45   :  { %7271 = vpow2.f32 %v5402_v10 }
0x1e46   :  { %v5243_v7 = vmul.f32 1.442695, %v5242_v16  ;;  %v3033_v16 = vadd.f32 %v3032_v57, %v8109_v0  ;;  %v5742_v0 = vld [vmem:[%s7523_s30] sm:$0xff] }
0x1e48   :  { %7273 = vpow2.f32 %v5243_v7 }
0x1e4a   :  { %v7268_v22 = vpop.eup %7267 }
0x1e4b   :  { %v4929_v19 = vsel %vm2372_vm4, %v7268_v22, 0.0 }
0x1e4c   :  { %4930 = vadd.xlane.f32.xlu1 %v4929_v19 }
0x1e4e   :  { %v7270_v12 = vpop.eup %7269 }
0x1e4f   :  { %v7272_v11 = vpop.eup %7271  ;;  %v5011_v49 = vsel %vm2372_vm4, %v7270_v12, 0.0 }
0x1e50   :  { %5012 = vadd.xlane.f32.xlu0 %v5011_v49  ;;  %v5404_v34 = vsel %vm2372_vm4, %v7272_v11, 0.0 }
0x1e51   :  { %5405 = vadd.xlane.f32.xlu1 %v5404_v34 }
0x1e52   :  { %v7274_v28 = vpop.eup %7273 }
0x1e53   :  { %v5245_v44 = vsel %vm2372_vm4, %v7274_v28, 0.0 }
0x1e54   :  { %5246 = vadd.xlane.f32.xlu0 %v5245_v44 }
0x1ed9   :  { %v4931_v25 = vpop.xlane.xlu1 %4930 }
0x1edd   :  { %v5013_v24 = vpop.xlane.xlu0 %5012 }
0x1ede   :  { %7275 = vrcp.f32 %v5013_v24  ;;  %v5406_v29 = vpop.xlane.xlu1 %5405 }
0x1edf   :  { %7277 = vrcp.f32 %v4931_v25  ;;  %v6016_v25 = vld [vmem:[%s7518_s6] ss:$0 sm:$0xff] }
0x1ee1   :  { %v5247_v58 = vpop.xlane.xlu0 %5246 }
0x1ee2   :  { %7279 = vrcp.f32 %v5247_v58 }
0x1ee3   :  { %7281 = vrcp.f32 %v5406_v29 }
0x1ee8   :  { %v7276_v50 = vpop.eup %7275 }
0x1ee9   :  { %v5015_v30 = vmul.f32 %v7276_v50, %v7270_v12  ;;  %v7278_v52 = vpop.eup %7277  ;;  %v6014_v12 = vld [vmem:[%s8497_s8] ss:$0 sm:$0xff] }
0x1eea   :  { %v4933_v17 = vmul.f32 %v7278_v52, %v7268_v22  ;;  %v6018_v50 = vld [vmem:[#allocation2] ss:$0 sm:$0xff] }
0x1eeb   :  { %6831 = vmatmul.mubr.msk.f32.vlgmr.msra.gmra.mrb[66].mxu1 %vm1551_vm3, %v5015_v30 }
0x1eec   :  { %6834 = vmatpush3.msk.msra.mxu1 %vm1555_vm15, %v4934_v15  ;;  %6835 = vmatprep.mubr.msk.f32.mxu1 %vm7371_vm0, %v8485_v61  ;;  %v7280_v37 = vpop.eup %7279 }
0x1eed   :  { %6843 = vmatprep.subr.mxu1 %v8485_v61  ;;  %v5249_v31 = vmul.f32 %v7280_v37, %v7274_v28  ;;  %v7282_v18 = vpop.eup %7281  ;;  %v5743_v28 = vld [vmem:[%s7523_s30 + $0x8] sm:$0xff]  ;;  %s5845_s30 = sshll.u32 %s7374_s19, 4  ;;  %s5846_s30 = int_to_ptr.vmem [resolvable:$true] %s5845_s30 }
0x1eee   :  { %v5408_v62 = vmul.f32 %v7282_v18, %v7272_v11  ;;  %v7149_v44 = vpack.c.bf16 %v5743_v28, %v5742_v0  ;;  %s7313_s6 = scalar_lea.vmem %s5846_s30, 32  ;;  %p7318_p9 = scmp.lt.s32.totalorder %s5846_s30, %s5846_s30 }
0x1eef   :  { %6836 = vmatmul.mubr.msk.f32.vlgmr.msra.gmra.mrb[68].mxu1 %vm1551_vm3, %v4933_v17  ;;  %p7314_p8 = scmp.ne.s32.totalorder %s5846_s30, %s7313_s6  ;;  %p7319_p10 = scmp.lt.s32.totalorder %s7313_s6, %s7313_s6 }
0x1ef0   :  { %6844 = vmatpush3.msk.msra.mxu1 %vm1555_vm15, %v5250_v60  ;;  %6845 = vmatprep.mubr.msk.f32.mxu1 %vm7371_vm0, %v8485_v61 }
0x1ef1   :  { %6853 = vmatprep.subr.mxu1 %v8485_v61  ;;  %p7320_p11 = por %p7319_p10, %p7318_p9 }
0x1ef3   :  { %6846 = vmatmul.mubr.msk.f32.vlgmr.msra.gmra.mrb[70].mxu1 %vm1551_vm3, %v5249_v31  ;;  %p7321_p12 = pnand %p7320_p11, %p7314_p8 }
0x1ef4   :  { %6854 = vmatpush3.msk.msra.mxu1 %vm1555_vm15, %v5409_v53  ;;  %6855 = vmatprep.mubr.msk.f32.mxu1 %vm7371_vm0, %v8485_v61 }
0x1ef5   :  { %7130 = vmatprep.subr.bf16.mxu1 %v8484_v45 }
0x1ef7   :  { %6856 = vmatmul.mubr.msk.f32.vlgmr.msra.gmra.mrb[72].mxu1 %vm1551_vm3, %v5408_v62 }
0x1ef8   :  { %6893 = vmatprep.mubr.msk.f32.mxu1 %vm7371_vm0, %v8485_v61  ;;  %7132 = vmatpush3.bf16.msra.mxu1 %v7131_v54 }
0x1ef9   :  { %7133 = vmatprep.subr.bf16.mxu1 %v8484_v45 }
0x1efc   :  { %7135 = vmatpush3.bf16.msra.mxu1 %v7134_v51 }
0x1efd   :  { %7136 = vmatprep.subr.bf16.mxu1 %v8484_v45 }
0x1f00   :  { %7138 = vmatpush3.bf16.msra.mxu1 %v7137_v8 }
0x1f01   :  { %7139 = vmatprep.subr.bf16.mxu1 %v8484_v45 }
0x1f04   :  { %7141 = vmatpush3.bf16.msra.mxu1 %v7140_v1 }
0x1f05   :  { %7148 = vmatprep.subr.bf16.mxu1 %v8484_v45 }
0x1fbe   :  { %v5089_v56 = vpop.f32.mrb[66].mxu1 }
0x1fbf   :  { %v6832_v2 = vpop.f32.mrb[67].mxu1 }
0x1fc2   :  { %v5165_v3 = vpop.f32.mrb[68].mxu1 }
0x1fc3   :  { %v5166_v5 = vadd.f32 %v5165_v3, %v5089_v56  ;;  %v6837_v47 = vpop.f32.mrb[69].mxu1 }
0x1fc6   :  { %v5323_v23 = vpop.f32.mrb[70].mxu1 }
0x1fc7   :  { %v5327_v32 = vadd.f32 %v5323_v23, %v5166_v5  ;;  %v6847_v9 = vpop.f32.mrb[71].mxu1 }
0x1fca   :  { %v5482_v42 = vpop.f32.mrb[72].mxu1 }
0x1fcb   :  { %v5486_v27 = vadd.f32 %v5482_v42, %v5327_v32  ;;  %v6857_v40 = vpop.f32.mrb[73].mxu1 }
0x1fcd   :  { %v5487_v36 = vadd.f32 %v5486_v27, %v7982_v21  ;;  %v7143_v21 = vpack.c.bf16 %v5657_v14, %v5656_v43 }
0x1fcf   :  { %6875 = vmatmul.mubr.msk.f32.vlgmr.msra.gmra.mrb[56].mxu0 %vm177_vm1, %v5487_v36 }
0x1fd0   :  { %6904 = vmatprep.mubr.msk.f32.mxu0 %vm7371_vm0, %v8485_v61  ;;  %7144 = vmatpush3.bf16.msra.mxu0 %v7143_v21 }
0x1fd1   :  { %7145 = vmatprep.subr.bf16.mxu0 %v8484_v45  ;;  %v5658_v45 = vld [vmem:[%s8495_s9 + $0x10] sm:$0xff] }
0x1fd2   :  { %v7146_v19 = vpack.c.bf16 %v5659_v39, %v5658_v45 }
0x1fd4   :  { %7147 = vmatpush3.bf16.msra.mxu0 %v7146_v19 }
0x20a2   :  { %v5557_v35 = vpop.f32.mrb[56].mxu0 }
0x20a3   :  { %v5558_v41 = vadd.f32 %v5557_v35, %v2958_v38  ;;  %v6876_v20 = vpop.f32.mrb[57].mxu0 }
0x20a5   :  { %v5561_v10 = vmax.f32 %v5558_v41, 0.0 }
0x20a7   :  { %v5562_v4 = vadd.f32 %v5561_v10, %v5487_v36 }
0x20a9   :  { %v5564_v7 = vrot.slane %v5562_v4, 7 }
0x20ab   :  { %v5567_v22 = vsel %vm5566_vm5, %v3033_v16, %v5564_v7 }
0x20ac   :  { %6894 = vmatmul.mubr.msk.f32.vlgmr.msra.gmra.mrb[74].mxu1 %vm177_vm1, %v5567_v22  ;;  %vm5751_vm1 = vcmask 130048  }
0x20ad   :  { %6911 = vmatprep.mubr.msk.f32.mxu1 %vm7371_vm0, %v8485_v61  ;;  %7150 = vmatpush3.bf16.msra.mxu1 %v7149_v44  ;;  %vm5825_vm0 = vcmask 9216  }
0x217f   :  { %v5652_v11 = vpop.f32.mrb[74].mxu1 }
0x2180   :  { %v5653_v49 = vadd.f32 %v6014_v12, %v5652_v11  ;;  %v6895_v34 = vpop.f32.mrb[75].mxu1 }
0x2182   :  { %6905 = vmatmul.mubr.msk.f32.vlgmr.msra.gmra.mrb[58].mxu0 %vm5667_vm6, %v5653_v49 }
0x2255   :  { %v5737_v24 = vpop.f32.mrb[58].mxu0 }
0x2256   :  { %v5738_v58 = vadd.f32 %v6016_v25, %v5737_v24  ;;  %v6906_v29 = vpop.f32.mrb[59].mxu0 }
0x2258   :  { %v5741_v61 = vmax.f32 %v5738_v58, 0.0 }
0x225a   :  { %6912 = vmatmul.mubr.msk.f32.vlgmr.msra.gmra.mrb[76].mxu1 %vm5751_vm1, %v5741_v61 }
0x232d   :  { %v5821_v30 = vpop.f32.mrb[76].mxu1 }
0x232e   :  { %v5822_v52 = vadd.f32 %v6018_v50, %v5821_v30  ;;  %v6913_v15 = vpop.f32.mrb[77].mxu1 }
0x2330   :  { %v5826_v17 = vsel %vm5825_vm0, %v5822_v52, -inf }
0x2331   :  { %5827 = vmax.xlane.f32.xlu0 %v5826_v17 }
0x23be   :  { %v5828_v37 = vpop.xlane.xlu0 %5827 }
0x23bf   :  { %v5829_v60 = vsub.f32 %v5822_v52, %v5828_v37 }
0x23c1   :  { %v5830_v31 = vmul.f32 1.442695, %v5829_v60 }
0x23c3   :  { %7283 = vpow2.f32 %v5830_v31 }
0x23cd   :  { %v7284_v18 = vpop.eup %7283 }
0x23ce   :  { %v5832_v53 = vsel %vm5825_vm0, %v7284_v18, 0.0 }
0x23cf   :  { %5833 = vadd.xlane.f32.xlu1 %v5832_v53 }
0x245c   :  { %v5834_v62 = vpop.xlane.xlu1 %5833 }
0x245d   :  { %7285 = vlog2.f32 %v5834_v62 }
0x2467   :  { %v7286_v46 = vpop.eup %7285 }
0x2468   :  { %v5836_v48 = vmul.f32 0.6931472, %v7286_v46 }
0x246a   :  { %v5837_v6 = vsub.f32 %v5829_v60, %v5836_v48 }
0x246c   :  { %5838 = vst.msk [vmem:[#allocation5] sm:$0x3] %vm5825_vm0, %v5837_v6 }
0x246d   :  { %7324 = shalt.err (!%p7321_p12)
}
0x246e   :  { %s7325_s4 = scalar_lea.hbm %s7531_s12, 32 }
0x246f   :  { %p7326_p13 = scmp.ne.s32.totalorder %s7531_s12, %s7325_s4  ;;  %p7329_p0 = scmp.lt.u32.totalorder %s7325_s4, %s7531_s12 }
0x2471   :  { %p7331_p1 = pnand %p7329_p0, %p7326_p13 }
0x2473   :  { %7334 = shalt.err (!%p7331_p1)
}
0x2474   :  { %5848 = dma.vmem_to_hbm [thread:$0]  %s5846_s30, 32, %s7531_s12, [#allocation4]  }
0x2475   :  { %7337 = dma.done.wait [#allocation4], 32  }
0x2476   :  { %7338 = vsyncadd [#allocation4], 4294967264 }
0x2477   :  { %5852 = vsyncpa [#allocation3], 1 }
0x2478   :  { %5853 = vsyncpa [#allocation4], 1 }

</bundles_post_ra>
